<compile_context>
chip_gen: v7x
topology: tpu7x:2x2x1
jax: 0.10.0
libtpu: 0.0.40
codegen_flags: <defaults>
</compile_context>

<pallas_src>
import jax
import jax.numpy as jnp
from jax.experimental import pallas as pl
from jax.experimental.pallas import tpu as pltpu

# TODO(synk): the ResNet-50 backbone (create_feature_extractor(resnet, {'layer4': 'out'}))
# is a large pretrained CNN and is not re-implemented here; the kernel consumes the
# backbone output feature map directly.

B = 2
C = 2048          # layer4 output channels of ResNet-50
H = W = 7         # layer4 spatial size for 224x224 input
C_HEADS, R_HEADS, V_HEADS = 8, 168, 11

# 128-aligned column offsets for the fused head weight; each head owns a lane-dense segment.
C_OFF, R_OFF, V_OFF = 0, 128, 384
TOTAL = 512
_SEGMENTS = ((C_OFF, 128), (R_OFF, 256), (V_OFF, 128))
_PAD_NEG = -1e30  # pad-column bias -> exp() underflows to 0, never enters a softmax denom


def bongnet_head_kernel(pooled_ref, w_ref, b_ref, out_ref):
    # pooled_ref: (B, C) f32, w_ref: (C, 512) f32, b_ref: (1, 512) f32, out_ref: (B, 512) f32.
    logits = jnp.dot(pooled_ref[...], w_ref[...],
                     preferred_element_type=jnp.float32) + b_ref[...]      # (B, 512)
    # Per-head numerically-stable log_softmax on 128-aligned, 128-multiple-wide segments.
    for start, width in _SEGMENTS:
        seg = logits[:, start:start + width]
        m = jnp.max(seg, axis=-1, keepdims=True)
        shifted = seg - m
        lse = jnp.log(jnp.sum(jnp.exp(shifted), axis=-1, keepdims=True))
        out_ref[:, start:start + width] = shifted - lse                    # lane-dense store


def fuse_head_params(wc, bc, wr, br, wv, bv):
    """Pack the three (C, n) weights / (n,) biases into one 128-aligned (C, 512) / (1, 512)."""
    c = wc.shape[0]
    w = jnp.zeros((c, TOTAL), jnp.float32)
    w = w.at[:, C_OFF:C_OFF + C_HEADS].set(wc)
    w = w.at[:, R_OFF:R_OFF + R_HEADS].set(wr)
    w = w.at[:, V_OFF:V_OFF + V_HEADS].set(wv)
    b = jnp.full((1, TOTAL), _PAD_NEG, jnp.float32)
    b = b.at[0, C_OFF:C_OFF + C_HEADS].set(bc)
    b = b.at[0, R_OFF:R_OFF + R_HEADS].set(br)
    b = b.at[0, V_OFF:V_OFF + V_HEADS].set(bv)
    return w, b


def bongnet_heads(feats_nchw, wc, bc, wr, br, wv, bv):
    """feats_nchw: (B, 2048, 7, 7) backbone output; weights as (C, n) (transposed vs nn.Linear)."""
    b, c, h, w_sp = feats_nchw.shape
    # AvgPool2d(7) on the 7x7 map == global mean over spatial positions.  Contiguous
    # trailing-axis reduce in plain XLA -> no HBM transpose pass, kernel only sees (B, 2048).
    pooled = jnp.mean(feats_nchw.reshape(b, c, h * w_sp), axis=-1)         # (B, C) f32

    w_fused, b_fused = fuse_head_params(wc, bc, wr, br, wv, bv)

    bytes_accessed = 4 * (pooled.size + w_fused.size + b_fused.size + b * TOTAL)
    cost = pl.CostEstimate(flops=2 * b * c * TOTAL,
                           transcendentals=b * TOTAL,
                           bytes_accessed=bytes_accessed)

    vmem = pl.BlockSpec(memory_space=pltpu.MemorySpace.VMEM)
    out = pl.pallas_call(
        bongnet_head_kernel,
        out_shape=jax.ShapeDtypeStruct((b, TOTAL), jnp.float32),
        in_specs=[vmem, vmem, vmem],
        out_specs=vmem,
        cost_estimate=cost,
    )(pooled, w_fused, b_fused)

    return (out[:, C_OFF:C_OFF + C_HEADS],
            out[:, R_OFF:R_OFF + R_HEADS],
            out[:, V_OFF:V_OFF + V_HEADS])


def _reference(feats_nchw, wc, bc, wr, br, wv, bv):
    pooled = jnp.mean(
        feats_nchw.reshape(feats_nchw.shape[0], feats_nchw.shape[1], -1), axis=-1)  # (B, C)

    def head(wt, bias):
        logits = pooled @ wt + bias
        return jax.nn.log_softmax(logits, axis=-1)

    return head(wc, bc), head(wr, br), head(wv, bv)


if __name__ == "__main__":
    key = jax.random.PRNGKey(0)
    k_feat, k_wc, k_bc, k_wr, k_br, k_wv, k_bv = jax.random.split(key, 7)

    # Synthetic backbone output + deterministic head parameters.
    feats = jax.random.normal(k_feat, (B, C, H, W), jnp.float32)
    wc = jax.random.normal(k_wc, (C, C_HEADS), jnp.float32) * 0.02
    bc = jax.random.normal(k_bc, (C_HEADS,), jnp.float32) * 0.02
    wr = jax.random.normal(k_wr, (C, R_HEADS), jnp.float32) * 0.02
    br = jax.random.normal(k_br, (R_HEADS,), jnp.float32) * 0.02
    wv = jax.random.normal(k_wv, (C, V_HEADS), jnp.float32) * 0.02
    bv = jax.random.normal(k_bv, (V_HEADS,), jnp.float32) * 0.02

    fn = jax.jit(bongnet_heads)
    out_c, out_r, out_v = jax.block_until_ready(fn(feats, wc, bc, wr, br, wv, bv))

    ref_c, ref_r, ref_v = _reference(feats, wc, bc, wr, br, wv, bv)
    assert out_c.shape == (B, C_HEADS)
    assert out_r.shape == (B, R_HEADS)
    assert out_v.shape == (B, V_HEADS)
    assert jnp.allclose(out_c, ref_c, atol=1e-4)
    assert jnp.allclose(out_r, ref_r, atol=1e-4)
    assert jnp.allclose(out_v, ref_v, atol=1e-4)

    print("KERNEL_OK")
</pallas_src>

<mosaic_0001>
module attributes {stable_mosaic.version = 11 : i64} {
  func.func @bongnet_head_kernel(%arg0: memref<2x2048xf32, #tpu.memory_space<vmem>>, %arg1: memref<2048x512xf32, #tpu.memory_space<vmem>>, %arg2: memref<1x512xf32, #tpu.memory_space<vmem>>, %arg3: memref<2x512xf32, #tpu.memory_space<vmem>>) attributes {dimension_semantics = [], scalar_prefetch = 0 : i64, scratch_operands = 0 : i64, tpu.core_type = #tpu.core_type<tc>} {
    %c0 = arith.constant 0 : index
    %c0_0 = arith.constant 0 : index
    %0 = vector.load %arg0[%c0, %c0_0] : memref<2x2048xf32, #tpu.memory_space<vmem>>, vector<2x2048xf32>
    %c0_1 = arith.constant 0 : index
    %c0_2 = arith.constant 0 : index
    %1 = vector.load %arg1[%c0_1, %c0_2] : memref<2048x512xf32, #tpu.memory_space<vmem>>, vector<2048x512xf32>
    %cst = arith.constant dense<0.000000e+00> : vector<2x512xf32>
    %2 = tpu.matmul %0, %1, %cst {dimension_numbers = #tpu.dot_dimension_numbers<[1], [0], [0], [1], [0, 0, 1, 1], [], []>} : vector<2x2048xf32>, vector<2048x512xf32>, vector<2x512xf32> -> vector<2x512xf32>
    %c0_3 = arith.constant 0 : index
    %c0_4 = arith.constant 0 : index
    %3 = vector.load %arg2[%c0_3, %c0_4] : memref<1x512xf32, #tpu.memory_space<vmem>>, vector<1x512xf32>
    %4 = vector.broadcast %3 : vector<1x512xf32> to vector<2x512xf32>
    %5 = arith.addf %2, %4 : vector<2x512xf32>
    %6 = vector.extract_strided_slice %5 {offsets = [0, 0], sizes = [2, 128], strides = [1, 1]} : vector<2x512xf32> to vector<2x128xf32>
    %cst_5 = arith.constant dense<0xFF800000> : vector<2xf32>
    %7 = vector.multi_reduction <maximumf>, %6, %cst_5 [1] : vector<2x128xf32> to vector<2xf32>
    %8 = vector.shape_cast %7 : vector<2xf32> to vector<2x1xf32>
    %9 = vector.broadcast %8 : vector<2x1xf32> to vector<2x128xf32>
    %10 = arith.subf %6, %9 : vector<2x128xf32>
    %11 = math.exp %10 : vector<2x128xf32>
    %cst_6 = arith.constant dense<0.000000e+00> : vector<2xf32>
    %12 = vector.multi_reduction <add>, %11, %cst_6 [1] : vector<2x128xf32> to vector<2xf32>
    %13 = vector.shape_cast %12 : vector<2xf32> to vector<2x1xf32>
    %14 = math.log %13 : vector<2x1xf32>
    %15 = vector.broadcast %14 : vector<2x1xf32> to vector<2x128xf32>
    %16 = arith.subf %10, %15 : vector<2x128xf32>
    %c0_7 = arith.constant 0 : index
    %c0_8 = arith.constant 0 : index
    %17 = vector.load %arg3[%c0_7, %c0_8] : memref<2x512xf32, #tpu.memory_space<vmem>>, vector<2x128xf32>
    tpu.vector_store %arg3[%c0_7, %c0_8], %16 {strides = array<i32>} : memref<2x512xf32, #tpu.memory_space<vmem>>, vector<2x128xf32>,
    %18 = vector.extract_strided_slice %5 {offsets = [0, 128], sizes = [2, 256], strides = [1, 1]} : vector<2x512xf32> to vector<2x256xf32>
    %cst_9 = arith.constant dense<0xFF800000> : vector<2xf32>
    %19 = vector.multi_reduction <maximumf>, %18, %cst_9 [1] : vector<2x256xf32> to vector<2xf32>
    %20 = vector.shape_cast %19 : vector<2xf32> to vector<2x1xf32>
    %21 = vector.broadcast %20 : vector<2x1xf32> to vector<2x256xf32>
    %22 = arith.subf %18, %21 : vector<2x256xf32>
    %23 = math.exp %22 : vector<2x256xf32>
    %cst_10 = arith.constant dense<0.000000e+00> : vector<2xf32>
    %24 = vector.multi_reduction <add>, %23, %cst_10 [1] : vector<2x256xf32> to vector<2xf32>
    %25 = vector.shape_cast %24 : vector<2xf32> to vector<2x1xf32>
    %26 = math.log %25 : vector<2x1xf32>
    %27 = vector.broadcast %26 : vector<2x1xf32> to vector<2x256xf32>
    %28 = arith.subf %22, %27 : vector<2x256xf32>
    %c0_11 = arith.constant 0 : index
    %c128 = arith.constant 128 : index
    %29 = vector.load %arg3[%c0_11, %c128] : memref<2x512xf32, #tpu.memory_space<vmem>>, vector<2x256xf32>
    tpu.vector_store %arg3[%c0_11, %c128], %28 {strides = array<i32>} : memref<2x512xf32, #tpu.memory_space<vmem>>, vector<2x256xf32>,
    %30 = vector.extract_strided_slice %5 {offsets = [0, 384], sizes = [2, 128], strides = [1, 1]} : vector<2x512xf32> to vector<2x128xf32>
    %cst_12 = arith.constant dense<0xFF800000> : vector<2xf32>
    %31 = vector.multi_reduction <maximumf>, %30, %cst_12 [1] : vector<2x128xf32> to vector<2xf32>
    %32 = vector.shape_cast %31 : vector<2xf32> to vector<2x1xf32>
    %33 = vector.broadcast %32 : vector<2x1xf32> to vector<2x128xf32>
    %34 = arith.subf %30, %33 : vector<2x128xf32>
    %35 = math.exp %34 : vector<2x128xf32>
    %cst_13 = arith.constant dense<0.000000e+00> : vector<2xf32>
    %36 = vector.multi_reduction <add>, %35, %cst_13 [1] : vector<2x128xf32> to vector<2xf32>
    %37 = vector.shape_cast %36 : vector<2xf32> to vector<2x1xf32>
    %38 = math.log %37 : vector<2x1xf32>
    %39 = vector.broadcast %38 : vector<2x1xf32> to vector<2x128xf32>
    %40 = arith.subf %34, %39 : vector<2x128xf32>
    %c0_14 = arith.constant 0 : index
    %c384 = arith.constant 384 : index
    %41 = vector.load %arg3[%c0_14, %c384] : memref<2x512xf32, #tpu.memory_space<vmem>>, vector<2x128xf32>
    tpu.vector_store %arg3[%c0_14, %c384], %40 {strides = array<i32>} : memref<2x512xf32, #tpu.memory_space<vmem>>, vector<2x128xf32>,
    return
  }
}

</mosaic_0001>

<bundles_post_ra>
// kernel: bongnet_heads.1
= control target key start
LH: loop header
LB: loop body
LE: loop exit
PB: predicated region body
PF: predicated region fallthrough
CT: control target
= control target key end

     0   :  { %vm2288_vm0 = vcmask 1041408   ;;  %s6637_s1 = inlined_call_operand.vmem [shape: f32[2048,512], index: 1, kind: input, shape index: {}]   ;;  %s6638_s0 = inlined_call_operand.vmem [shape: f32[2,2048], index: 0, kind: input, shape index: {}]   ;;  %s6639_s2 = inlined_call_operand.vmem [shape: f32[1,512], index: 2, kind: input, shape index: {}]   ;;  %s6640_s3 = inlined_call_operand.vmem [shape: f32[2,512], index: 3, kind: output, shape index: {}]  }
   0x1   :  { %v19_v0 = vld [vmem:[%s6637_s1 + $0x8] sm:$0xff]  ;;  %v21_v2 = vld [vmem:[%s6637_s1 + $0x18] sm:$0xff]  ;;  %v18_v5 = vld [vmem:[%s6637_s1] sm:$0xff] }
   0x2   :  { %v23_v1 = vld [vmem:[%s6637_s1 + $0x28] sm:$0xff]  ;;  %v25_v4 = vld [vmem:[%s6637_s1 + $0x38] sm:$0xff]  ;;  %v22_v6 = vld [vmem:[%s6637_s1 + $0x20] sm:$0xff] }
   0x3   :  { %v2352_v3 = vpack.c.bf16 %v23_v1, %v19_v0  ;;  %v2864_v7 = vpack.c.bf16 %v25_v4, %v21_v2  ;;  %v2354_v8 = vpack.c.bf16 %v22_v6, %v18_v5  ;;  %v20_v9 = vld [vmem:[%s6637_s1 + $0x10] sm:$0xff]  ;;  %v27_v11 = vld [vmem:[%s6637_s1 + $0x48] sm:$0xff]  ;;  %v29_v14 = vld [vmem:[%s6637_s1 + $0x58] sm:$0xff] }
   0x4   :  { %v24_v10 = vld [vmem:[%s6637_s1 + $0x30] sm:$0xff]  ;;  %v31_v13 = vld [vmem:[%s6637_s1 + $0x68] sm:$0xff]  ;;  %v33_v15 = vld [vmem:[%s6637_s1 + $0x78] sm:$0xff] }
   0x5   :  { %2353 = vmatprep.subr.bf16.mxu0 %v2352_v3  ;;  %v2866_v12 = vpack.c.bf16 %v24_v10, %v20_v9  ;;  %2865 = vmatprep.subr.bf16.mxu1 %v2864_v7  ;;  %v2356_v16 = vpack.c.bf16 %v31_v13, %v27_v11  ;;  %v2868_v17 = vpack.c.bf16 %v33_v15, %v29_v14  ;;  %v26_v18 = vld [vmem:[%s6637_s1 + $0x40] sm:$0xff]  ;;  %v28_v20 = vld [vmem:[%s6637_s1 + $0x50] sm:$0xff]  ;;  %v35_v23 = vld [vmem:[%s6637_s1 + $0x88] sm:$0xff] }
   0x6   :  { %2355 = vmatpush1.bf16.msra.mxu0 %v2354_v8  ;;  %v30_v19 = vld [vmem:[%s6637_s1 + $0x60] sm:$0xff]  ;;  %v32_v22 = vld [vmem:[%s6637_s1 + $0x70] sm:$0xff]  ;;  %v39_v24 = vld [vmem:[%s6637_s1 + $0xa8] sm:$0xff] }
   0x7   :  { %2867 = vmatpush1.bf16.msra.mxu1 %v2866_v12  ;;  %v2358_v21 = vpack.c.bf16 %v30_v19, %v26_v18  ;;  %2357 = vmatprep.subr.bf16.mxu0 %v2356_v16  ;;  %v2870_v25 = vpack.c.bf16 %v32_v22, %v28_v20  ;;  %v2360_v26 = vpack.c.bf16 %v39_v24, %v35_v23  ;;  %v37_v27 = vld [vmem:[%s6637_s1 + $0x98] sm:$0xff]  ;;  %v34_v29 = vld [vmem:[%s6637_s1 + $0x80] sm:$0xff]  ;;  %v36_v32 = vld [vmem:[%s6637_s1 + $0x90] sm:$0xff] }
   0x8   :  { %2869 = vmatprep.subr.bf16.mxu1 %v2868_v17  ;;  %v41_v28 = vld [vmem:[%s6637_s1 + $0xb8] sm:$0xff]  ;;  %v38_v31 = vld [vmem:[%s6637_s1 + $0xa0] sm:$0xff]  ;;  %v40_v33 = vld [vmem:[%s6637_s1 + $0xb0] sm:$0xff] }
   0x9   :  { %v2872_v30 = vpack.c.bf16 %v41_v28, %v37_v27  ;;  %v2362_v34 = vpack.c.bf16 %v38_v31, %v34_v29  ;;  %v43_v35 = vld [vmem:[%s6637_s1 + $0xc8] sm:$0xff]  ;;  %v45_v37 = vld [vmem:[%s6637_s1 + $0xd8] sm:$0xff]  ;;  %v2874_v38 = vpack.c.bf16 %v40_v33, %v36_v32  ;;  %v42_v41 = vld [vmem:[%s6637_s1 + $0xc0] sm:$0xff] }
   0xa   :  { %2359 = vmatpush1.bf16.msra.mxu0 %v2358_v21  ;;  %v47_v36 = vld [vmem:[%s6637_s1 + $0xe8] sm:$0xff]  ;;  %v49_v40 = vld [vmem:[%s6637_s1 + $0xf8] sm:$0xff]  ;;  %v46_v42 = vld [vmem:[%s6637_s1 + $0xe0] sm:$0xff] }
   0xb   :  { %2871 = vmatpush1.bf16.msra.mxu1 %v2870_v25  ;;  %2361 = vmatprep.subr.bf16.mxu0 %v2360_v26  ;;  %v2364_v39 = vpack.c.bf16 %v47_v36, %v43_v35  ;;  %v2876_v43 = vpack.c.bf16 %v49_v40, %v45_v37  ;;  %v44_v44 = vld [vmem:[%s6637_s1 + $0xd0] sm:$0xff]  ;;  %v51_v46 = vld [vmem:[%s6637_s1 + $0x108] sm:$0xff]  ;;  %v53_v48 = vld [vmem:[%s6637_s1 + $0x118] sm:$0xff]  ;;  %v2366_v50 = vpack.c.bf16 %v46_v42, %v42_v41 }
   0xc   :  { %2873 = vmatprep.subr.bf16.mxu1 %v2872_v30  ;;  %v48_v45 = vld [vmem:[%s6637_s1 + $0xf0] sm:$0xff]  ;;  %v55_v47 = vld [vmem:[%s6637_s1 + $0x128] sm:$0xff]  ;;  %v57_v49 = vld [vmem:[%s6637_s1 + $0x138] sm:$0xff] }
   0xd   :  { %v2878_v51 = vpack.c.bf16 %v48_v45, %v44_v44  ;;  %v2368_v52 = vpack.c.bf16 %v55_v47, %v51_v46  ;;  %v50_v53 = vld [vmem:[%s6637_s1 + $0x100] sm:$0xff]  ;;  %v52_v55 = vld [vmem:[%s6637_s1 + $0x110] sm:$0xff]  ;;  %v2880_v56 = vpack.c.bf16 %v57_v49, %v53_v48  ;;  %v59_v58 = vld [vmem:[%s6637_s1 + $0x148] sm:$0xff]  ;;  %v1044_v46 = vlaneseq }
   0xe   :  { %2363 = vmatpush1.bf16.msra.mxu0 %v2362_v34  ;;  %v54_v54 = vld [vmem:[%s6637_s1 + $0x120] sm:$0xff]  ;;  %v56_v57 = vld [vmem:[%s6637_s1 + $0x130] sm:$0xff]  ;;  %v63_v59 = vld [vmem:[%s6637_s1 + $0x168] sm:$0xff]  ;;  %v3427_v47 = vmov 1983009808  }
   0xf   :  { %2875 = vmatpush1.bf16.msra.mxu1 %v2874_v38  ;;  %2365 = vmatprep.subr.bf16.mxu0 %v2364_v39  ;;  %v61_v60 = vld [vmem:[%s6637_s1 + $0x158] sm:$0xff]  ;;  %v2370_v62 = vpack.c.bf16 %v54_v54, %v50_v53  ;;  %v2882_v63 = vpack.c.bf16 %v56_v57, %v52_v55  ;;  %v2372_v0 = vpack.c.bf16 %v63_v59, %v59_v58  ;;  %v58_v1 = vld [vmem:[%s6637_s1 + $0x140] sm:$0xff]  ;;  %v60_v3 = vld [vmem:[%s6637_s1 + $0x150] sm:$0xff]  ;;  %v1070_v48 = vunpack.c.l.s4 %v3427_v47 }
  0x10   :  { %2877 = vmatprep.subr.bf16.mxu1 %v2876_v43  ;;  %v65_v61 = vld [vmem:[%s6637_s1 + $0x178] sm:$0xff]  ;;  %v62_v2 = vld [vmem:[%s6637_s1 + $0x160] sm:$0xff]  ;;  %v64_v5 = vld [vmem:[%s6637_s1 + $0x170] sm:$0xff] }
  0x11   :  { %v2884_v4 = vpack.c.bf16 %v65_v61, %v61_v60  ;;  %v67_v6 = vld [vmem:[%s6637_s1 + $0x188] sm:$0xff]  ;;  %v69_v8 = vld [vmem:[%s6637_s1 + $0x198] sm:$0xff]  ;;  %v2374_v10 = vpack.c.bf16 %v62_v2, %v58_v1  ;;  %v2886_v11 = vpack.c.bf16 %v64_v5, %v60_v3  ;;  %v66_v13 = vld [vmem:[%s6637_s1 + $0x180] sm:$0xff]  ;;  %v3700_v61 = vshrl.u32 %v1044_v46, 7 }
  0x12   :  { %2367 = vmatpush1.bf16.msra.mxu0 %v2366_v50  ;;  %v71_v7 = vld [vmem:[%s6637_s1 + $0x1a8] sm:$0xff]  ;;  %v73_v9 = vld [vmem:[%s6637_s1 + $0x1b8] sm:$0xff]  ;;  %v70_v14 = vld [vmem:[%s6637_s1 + $0x1a0] sm:$0xff] }
  0x13   :  { %2879 = vmatpush1.bf16.msra.mxu1 %v2878_v51  ;;  %2369 = vmatprep.subr.bf16.mxu0 %v2368_v52  ;;  %v2376_v12 = vpack.c.bf16 %v71_v7, %v67_v6  ;;  %v68_v15 = vld [vmem:[%s6637_s1 + $0x190] sm:$0xff]  ;;  %v2888_v16 = vpack.c.bf16 %v73_v9, %v69_v8  ;;  %v75_v18 = vld [vmem:[%s6637_s1 + $0x1c8] sm:$0xff]  ;;  %v77_v20 = vld [vmem:[%s6637_s1 + $0x1d8] sm:$0xff]  ;;  %v2378_v22 = vpack.c.bf16 %v70_v14, %v66_v13 }
  0x14   :  { %2881 = vmatprep.subr.bf16.mxu1 %v2880_v56  ;;  %v72_v17 = vld [vmem:[%s6637_s1 + $0x1b0] sm:$0xff]  ;;  %v79_v19 = vld [vmem:[%s6637_s1 + $0x1e8] sm:$0xff]  ;;  %v81_v21 = vld [vmem:[%s6637_s1 + $0x1f8] sm:$0xff] }
  0x15   :  { %v2890_v23 = vpack.c.bf16 %v72_v17, %v68_v15  ;;  %v2380_v24 = vpack.c.bf16 %v79_v19, %v75_v18  ;;  %v74_v25 = vld [vmem:[%s6637_s1 + $0x1c0] sm:$0xff]  ;;  %v76_v27 = vld [vmem:[%s6637_s1 + $0x1d0] sm:$0xff]  ;;  %v2892_v28 = vpack.c.bf16 %v81_v21, %v77_v20  ;;  %v83_v30 = vld [vmem:[%s6637_s1 + $0x208] sm:$0xff] }
  0x16   :  { %2371 = vmatpush1.bf16.msra.mxu0 %v2370_v62  ;;  %v78_v26 = vld [vmem:[%s6637_s1 + $0x1e0] sm:$0xff]  ;;  %v80_v29 = vld [vmem:[%s6637_s1 + $0x1f0] sm:$0xff]  ;;  %v87_v31 = vld [vmem:[%s6637_s1 + $0x228] sm:$0xff]  ;;  %v1071_v62 = vunpack.c.0.s8 %v1070_v48 }
  0x17   :  { %2883 = vmatpush1.bf16.msra.mxu1 %v2882_v63  ;;  %2373 = vmatprep.subr.bf16.mxu0 %v2372_v0  ;;  %v85_v32 = vld [vmem:[%s6637_s1 + $0x218] sm:$0xff]  ;;  %v2382_v34 = vpack.c.bf16 %v78_v26, %v74_v25  ;;  %v2894_v35 = vpack.c.bf16 %v80_v29, %v76_v27  ;;  %v2384_v36 = vpack.c.bf16 %v87_v31, %v83_v30  ;;  %v82_v37 = vld [vmem:[%s6637_s1 + $0x200] sm:$0xff]  ;;  %v84_v39 = vld [vmem:[%s6637_s1 + $0x210] sm:$0xff] }
  0x18   :  { %2885 = vmatprep.subr.bf16.mxu1 %v2884_v4  ;;  %v89_v33 = vld [vmem:[%s6637_s1 + $0x238] sm:$0xff]  ;;  %v86_v38 = vld [vmem:[%s6637_s1 + $0x220] sm:$0xff]  ;;  %v88_v41 = vld [vmem:[%s6637_s1 + $0x230] sm:$0xff] }
  0x19   :  { %v2896_v40 = vpack.c.bf16 %v89_v33, %v85_v32  ;;  %v91_v42 = vld [vmem:[%s6637_s1 + $0x248] sm:$0xff]  ;;  %v93_v44 = vld [vmem:[%s6637_s1 + $0x258] sm:$0xff]  ;;  %v2386_v49 = vpack.c.bf16 %v86_v38, %v82_v37  ;;  %v2898_v50 = vpack.c.bf16 %v88_v41, %v84_v39  ;;  %v90_v52 = vld [vmem:[%s6637_s1 + $0x240] sm:$0xff] }
  0x1a   :  { %2375 = vmatpush1.bf16.msra.mxu0 %v2374_v10  ;;  %v95_v43 = vld [vmem:[%s6637_s1 + $0x268] sm:$0xff]  ;;  %v97_v45 = vld [vmem:[%s6637_s1 + $0x278] sm:$0xff]  ;;  %v94_v53 = vld [vmem:[%s6637_s1 + $0x260] sm:$0xff] }
  0x1b   :  { %2887 = vmatpush1.bf16.msra.mxu1 %v2886_v11  ;;  %2377 = vmatprep.subr.bf16.mxu0 %v2376_v12  ;;  %v2388_v51 = vpack.c.bf16 %v95_v43, %v91_v42  ;;  %v92_v54 = vld [vmem:[%s6637_s1 + $0x250] sm:$0xff]  ;;  %v2900_v55 = vpack.c.bf16 %v97_v45, %v93_v44  ;;  %v99_v57 = vld [vmem:[%s6637_s1 + $0x288] sm:$0xff]  ;;  %v101_v59 = vld [vmem:[%s6637_s1 + $0x298] sm:$0xff]  ;;  %v2390_v63 = vpack.c.bf16 %v94_v53, %v90_v52 }
  0x1c   :  { %2889 = vmatprep.subr.bf16.mxu1 %v2888_v16  ;;  %v96_v56 = vld [vmem:[%s6637_s1 + $0x270] sm:$0xff]  ;;  %v103_v58 = vld [vmem:[%s6637_s1 + $0x2a8] sm:$0xff]  ;;  %v105_v60 = vld [vmem:[%s6637_s1 + $0x2b8] sm:$0xff]  ;;  %v3727_v11 = vsub.s32 %v1071_v62, %v3700_v61 }
  0x1d   :  { %v2902_v0 = vpack.c.bf16 %v96_v56, %v92_v54  ;;  %v2392_v1 = vpack.c.bf16 %v103_v58, %v99_v57  ;;  %v98_v2 = vld [vmem:[%s6637_s1 + $0x280] sm:$0xff]  ;;  %v100_v4 = vld [vmem:[%s6637_s1 + $0x290] sm:$0xff]  ;;  %v2904_v5 = vpack.c.bf16 %v105_v60, %v101_v59  ;;  %v107_v7 = vld [vmem:[%s6637_s1 + $0x2c8] sm:$0xff] }
  0x1e   :  { %2379 = vmatpush1.bf16.msra.mxu0 %v2378_v22  ;;  %v102_v3 = vld [vmem:[%s6637_s1 + $0x2a0] sm:$0xff]  ;;  %v104_v6 = vld [vmem:[%s6637_s1 + $0x2b0] sm:$0xff]  ;;  %v111_v8 = vld [vmem:[%s6637_s1 + $0x2e8] sm:$0xff] }
  0x1f   :  { %2891 = vmatpush1.bf16.msra.mxu1 %v2890_v23  ;;  %2381 = vmatprep.subr.bf16.mxu0 %v2380_v24  ;;  %v109_v9 = vld [vmem:[%s6637_s1 + $0x2d8] sm:$0xff]  ;;  %v2394_v12 = vpack.c.bf16 %v102_v3, %v98_v2  ;;  %v106_v13 = vld [vmem:[%s6637_s1 + $0x2c0] sm:$0xff]  ;;  %v2906_v14 = vpack.c.bf16 %v104_v6, %v100_v4  ;;  %v2396_v15 = vpack.c.bf16 %v111_v8, %v107_v7  ;;  %v108_v17 = vld [vmem:[%s6637_s1 + $0x2d0] sm:$0xff] }
  0x20   :  { %2893 = vmatprep.subr.bf16.mxu1 %v2892_v28  ;;  %v113_v10 = vld [vmem:[%s6637_s1 + $0x2f8] sm:$0xff]  ;;  %v110_v16 = vld [vmem:[%s6637_s1 + $0x2e0] sm:$0xff]  ;;  %v112_v18 = vld [vmem:[%s6637_s1 + $0x2f0] sm:$0xff] }
  0x21   :  { %v2908_v19 = vpack.c.bf16 %v113_v10, %v109_v9  ;;  %v115_v20 = vld [vmem:[%s6637_s1 + $0x308] sm:$0xff]  ;;  %v3750_v22 = vld [vmem:[%s6638_s0] sm:$0xff]  ;;  %v117_v23 = vld [vmem:[%s6637_s1 + $0x318] sm:$0xff]  ;;  %v2398_v26 = vpack.c.bf16 %v110_v16, %v106_v13  ;;  %v2910_v27 = vpack.c.bf16 %v112_v18, %v108_v17 }
  0x22   :  { %2383 = vmatpush1.bf16.msra.mxu0 %v2382_v34  ;;  %v119_v21 = vld [vmem:[%s6637_s1 + $0x328] sm:$0xff]  ;;  %v121_v24 = vld [vmem:[%s6637_s1 + $0x338] sm:$0xff]  ;;  %v3760_v25 = vrot.slane %v3750_v22, %v3727_v11  ;;  %v114_v29 = vld [vmem:[%s6637_s1 + $0x300] sm:$0xff]  ;;  %v1068_v8 = vcombine.high %v3750_v22, %v3750_v22 }
  0x23   :  { %2895 = vmatpush1.bf16.msra.mxu1 %v2894_v35  ;;  %2385 = vmatprep.subr.bf16.mxu0 %v2384_v36  ;;  %v2400_v28 = vpack.c.bf16 %v119_v21, %v115_v20  ;;  %v118_v30 = vld [vmem:[%s6637_s1 + $0x320] sm:$0xff]  ;;  %v116_v31 = vld [vmem:[%s6637_s1 + $0x310] sm:$0xff]  ;;  %v2912_v33 = vpack.c.bf16 %v121_v24, %v117_v23  ;;  %v123_v35 = vld [vmem:[%s6637_s1 + $0x348] sm:$0xff] }
  0x24   :  { %2897 = vmatprep.subr.bf16.mxu1 %v2896_v40  ;;  %v1083_v32 = vcombine.high %v3760_v25, %v3760_v25  ;;  %v120_v34 = vld [vmem:[%s6637_s1 + $0x330] sm:$0xff]  ;;  %v127_v36 = vld [vmem:[%s6637_s1 + $0x368] sm:$0xff]  ;;  %v125_v37 = vld [vmem:[%s6637_s1 + $0x358] sm:$0xff]  ;;  %v2402_v39 = vpack.c.bf16 %v118_v30, %v114_v29  ;;  %v3881_v24 = vrot.slane %v1068_v8, %v3727_v11 }
  0x25   :  { %v129_v38 = vld [vmem:[%s6637_s1 + $0x378] sm:$0xff]  ;;  %v2914_v40 = vpack.c.bf16 %v120_v34, %v116_v31  ;;  %v2404_v41 = vpack.c.bf16 %v127_v36, %v123_v35  ;;  %v122_v42 = vld [vmem:[%s6637_s1 + $0x340] sm:$0xff]  ;;  %v124_v44 = vld [vmem:[%s6637_s1 + $0x350] sm:$0xff] }
  0x26   :  { %2387 = vmatpush1.bf16.msra.mxu0 %v2386_v49  ;;  %1216 = vmatprep.mubr.f32.mxu0 %v1083_v32  ;;  %v126_v43 = vld [vmem:[%s6637_s1 + $0x360] sm:$0xff]  ;;  %v2916_v45 = vpack.c.bf16 %v129_v38, %v125_v37  ;;  %v128_v46 = vld [vmem:[%s6637_s1 + $0x370] sm:$0xff]  ;;  %v131_v47 = vld [vmem:[%s6637_s1 + $0x388] sm:$0xff]  ;;  %v1084_v38 = vcombine.high %v3881_v24, %v3881_v24 }
  0x27   :  { %2899 = vmatpush1.bf16.msra.mxu1 %v2898_v50  ;;  %2389 = vmatprep.subr.bf16.mxu0 %v2388_v51  ;;  %v135_v48 = vld [vmem:[%s6637_s1 + $0x3a8] sm:$0xff]  ;;  %v133_v49 = vld [vmem:[%s6637_s1 + $0x398] sm:$0xff]  ;;  %v2406_v51 = vpack.c.bf16 %v126_v43, %v122_v42  ;;  %v2918_v52 = vpack.c.bf16 %v128_v46, %v124_v44  ;;  %v130_v54 = vld [vmem:[%s6637_s1 + $0x380] sm:$0xff] }
  0x28   :  { %2901 = vmatprep.subr.bf16.mxu1 %v2900_v55  ;;  %1784 = vmatprep.mubr.f32.mxu1 %v1083_v32  ;;  %v137_v50 = vld [vmem:[%s6637_s1 + $0x3b8] sm:$0xff]  ;;  %v2408_v53 = vpack.c.bf16 %v135_v48, %v131_v47  ;;  %v134_v55 = vld [vmem:[%s6637_s1 + $0x3a0] sm:$0xff]  ;;  %v132_v56 = vld [vmem:[%s6637_s1 + $0x390] sm:$0xff] }
  0x29   :  { %v2920_v57 = vpack.c.bf16 %v137_v50, %v133_v49  ;;  %v136_v58 = vld [vmem:[%s6637_s1 + $0x3b0] sm:$0xff]  ;;  %v139_v59 = vld [vmem:[%s6637_s1 + $0x3c8] sm:$0xff]  ;;  %v141_v62 = vld [vmem:[%s6637_s1 + $0x3d8] sm:$0xff] }
  0x2a   :  { %2391 = vmatpush1.bf16.msra.mxu0 %v2390_v63  ;;  %v143_v60 = vld [vmem:[%s6637_s1 + $0x3e8] sm:$0xff]  ;;  %v145_v63 = vld [vmem:[%s6637_s1 + $0x3f8] sm:$0xff]  ;;  %v138_v3 = vld [vmem:[%s6637_s1 + $0x3c0] sm:$0xff] }
  0x2b   :  { %2903 = vmatpush1.bf16.msra.mxu1 %v2902_v0  ;;  %2393 = vmatprep.subr.bf16.mxu0 %v2392_v1  ;;  %v2410_v0 = vpack.c.bf16 %v134_v55, %v130_v54  ;;  %v2922_v1 = vpack.c.bf16 %v136_v58, %v132_v56  ;;  %v2412_v2 = vpack.c.bf16 %v143_v60, %v139_v59  ;;  %v142_v4 = vld [vmem:[%s6637_s1 + $0x3e0] sm:$0xff]  ;;  %v144_v7 = vld [vmem:[%s6637_s1 + $0x3f0] sm:$0xff]  ;;  %v147_v9 = vld [vmem:[%s6637_s1 + $0x408] sm:$0xff] }
  0x2c   :  { %2905 = vmatprep.subr.bf16.mxu1 %v2904_v5  ;;  %v140_v5 = vld [vmem:[%s6637_s1 + $0x3d0] sm:$0xff]  ;;  %v2924_v6 = vpack.c.bf16 %v145_v63, %v141_v62  ;;  %v151_v10 = vld [vmem:[%s6637_s1 + $0x428] sm:$0xff]  ;;  %v153_v13 = vld [vmem:[%s6637_s1 + $0x438] sm:$0xff] }
  0x2d   :  { %v2416_v16 = vpack.c.bf16 %v151_v10, %v147_v9  ;;  %v146_v17 = vld [vmem:[%s6637_s1 + $0x400] sm:$0xff]  ;;  %v152_v21 = vld [vmem:[%s6637_s1 + $0x430] sm:$0xff]  ;;  %v155_v22 = vld [vmem:[%s6637_s1 + $0x448] sm:$0xff] }
  0x2e   :  { %2395 = vmatpush1.bf16.msra.mxu0 %v2394_v12  ;;  %v149_v12 = vld [vmem:[%s6637_s1 + $0x418] sm:$0xff]  ;;  %v150_v18 = vld [vmem:[%s6637_s1 + $0x420] sm:$0xff]  ;;  %v159_v23 = vld [vmem:[%s6637_s1 + $0x468] sm:$0xff] }
  0x2f   :  { %2907 = vmatpush1.bf16.msra.mxu1 %v2906_v14  ;;  %2397 = vmatprep.subr.bf16.mxu0 %v2396_v15  ;;  %v2414_v14 = vpack.c.bf16 %v142_v4, %v138_v3  ;;  %v2926_v15 = vpack.c.bf16 %v144_v7, %v140_v5  ;;  %v2928_v20 = vpack.c.bf16 %v153_v13, %v149_v12  ;;  %v154_v31 = vld [vmem:[%s6637_s1 + $0x440] sm:$0xff]  ;;  %v160_v35 = vld [vmem:[%s6637_s1 + $0x470] sm:$0xff]  ;;  %v163_v36 = vld [vmem:[%s6637_s1 + $0x488] sm:$0xff] }
  0x30   :  { %2909 = vmatprep.subr.bf16.mxu1 %v2908_v19  ;;  %v148_v19 = vld [vmem:[%s6637_s1 + $0x410] sm:$0xff]  ;;  %v2420_v30 = vpack.c.bf16 %v159_v23, %v155_v22  ;;  %v158_v32 = vld [vmem:[%s6637_s1 + $0x460] sm:$0xff]  ;;  %v167_v37 = vld [vmem:[%s6637_s1 + $0x4a8] sm:$0xff] }
  0x31   :  { %v2930_v29 = vpack.c.bf16 %v152_v21, %v148_v19  ;;  %v2424_v43 = vpack.c.bf16 %v167_v37, %v163_v36  ;;  %v162_v44 = vld [vmem:[%s6637_s1 + $0x480] sm:$0xff]  ;;  %v164_v46 = vld [vmem:[%s6637_s1 + $0x490] sm:$0xff]  ;;  %v171_v48 = vld [vmem:[%s6637_s1 + $0x4c8] sm:$0xff] }
  0x32   :  { %2399 = vmatpush1.bf16.msra.mxu0 %v2398_v26  ;;  %v157_v26 = vld [vmem:[%s6637_s1 + $0x458] sm:$0xff]  ;;  %v175_v49 = vld [vmem:[%s6637_s1 + $0x4e8] sm:$0xff]  ;;  %v170_v55 = vld [vmem:[%s6637_s1 + $0x4c0] sm:$0xff] }
  0x33   :  { %2911 = vmatpush1.bf16.msra.mxu1 %v2910_v27  ;;  %2401 = vmatprep.subr.bf16.mxu0 %v2400_v28  ;;  %v161_v27 = vld [vmem:[%s6637_s1 + $0x478] sm:$0xff]  ;;  %v2418_v28 = vpack.c.bf16 %v150_v18, %v146_v17  ;;  %v2428_v54 = vpack.c.bf16 %v175_v49, %v171_v48  ;;  %v174_v56 = vld [vmem:[%s6637_s1 + $0x4e0] sm:$0xff]  ;;  %v176_v59 = vld [vmem:[%s6637_s1 + $0x4f0] sm:$0xff] }
  0x34   :  { %2913 = vmatprep.subr.bf16.mxu1 %v2912_v33  ;;  %v156_v33 = vld [vmem:[%s6637_s1 + $0x450] sm:$0xff]  ;;  %v2932_v34 = vpack.c.bf16 %v161_v27, %v157_v26  ;;  %v173_v50 = vld [vmem:[%s6637_s1 + $0x4d8] sm:$0xff]  ;;  %v179_v60 = vld [vmem:[%s6637_s1 + $0x508] sm:$0xff] }
  0x35   :  { %v2934_v42 = vpack.c.bf16 %v160_v35, %v156_v33  ;;  %v183_v62 = vld [vmem:[%s6637_s1 + $0x528] sm:$0xff]  ;;  %v181_v63 = vld [vmem:[%s6637_s1 + $0x518] sm:$0xff]  ;;  %v178_v4 = vld [vmem:[%s6637_s1 + $0x500] sm:$0xff] }
  0x36   :  { %2403 = vmatpush1.bf16.msra.mxu0 %v2402_v39  ;;  %v165_v39 = vld [vmem:[%s6637_s1 + $0x498] sm:$0xff]  ;;  %v2432_v3 = vpack.c.bf16 %v183_v62, %v179_v60  ;;  %v182_v5 = vld [vmem:[%s6637_s1 + $0x520] sm:$0xff]  ;;  %v184_v8 = vld [vmem:[%s6637_s1 + $0x530] sm:$0xff] }
  0x37   :  { %2915 = vmatpush1.bf16.msra.mxu1 %v2914_v40  ;;  %2405 = vmatprep.subr.bf16.mxu0 %v2404_v41  ;;  %v169_v40 = vld [vmem:[%s6637_s1 + $0x4b8] sm:$0xff]  ;;  %v2422_v41 = vpack.c.bf16 %v158_v32, %v154_v31  ;;  %v187_v9 = vld [vmem:[%s6637_s1 + $0x548] sm:$0xff]  ;;  %v186_v17 = vld [vmem:[%s6637_s1 + $0x540] sm:$0xff] }
  0x38   :  { %2917 = vmatprep.subr.bf16.mxu1 %v2916_v45  ;;  %v166_v45 = vld [vmem:[%s6637_s1 + $0x4a0] sm:$0xff]  ;;  %v2936_v47 = vpack.c.bf16 %v169_v40, %v165_v39  ;;  %v191_v10 = vld [vmem:[%s6637_s1 + $0x568] sm:$0xff]  ;;  %v189_v12 = vld [vmem:[%s6637_s1 + $0x558] sm:$0xff] }
  0x39   :  { %v193_v13 = vld [vmem:[%s6637_s1 + $0x578] sm:$0xff]  ;;  %v190_v18 = vld [vmem:[%s6637_s1 + $0x560] sm:$0xff]  ;;  %v188_v19 = vld [vmem:[%s6637_s1 + $0x550] sm:$0xff] }
  0x3a   :  { %2407 = vmatpush1.bf16.msra.mxu0 %v2406_v51  ;;  %v177_v51 = vld [vmem:[%s6637_s1 + $0x4f8] sm:$0xff]  ;;  %v192_v21 = vld [vmem:[%s6637_s1 + $0x570] sm:$0xff]  ;;  %v195_v22 = vld [vmem:[%s6637_s1 + $0x588] sm:$0xff] }
  0x3b   :  { %2919 = vmatpush1.bf16.msra.mxu1 %v2918_v52  ;;  %2409 = vmatprep.subr.bf16.mxu0 %v2408_v53  ;;  %v2426_v52 = vpack.c.bf16 %v166_v45, %v162_v44  ;;  %v2940_v58 = vpack.c.bf16 %v177_v51, %v173_v50  ;;  %v199_v23 = vld [vmem:[%s6637_s1 + $0x5a8] sm:$0xff]  ;;  %v197_v26 = vld [vmem:[%s6637_s1 + $0x598] sm:$0xff]  ;;  %v194_v31 = vld [vmem:[%s6637_s1 + $0x580] sm:$0xff] }
  0x3c   :  { %2921 = vmatprep.subr.bf16.mxu1 %v2920_v57  ;;  %v172_v57 = vld [vmem:[%s6637_s1 + $0x4d0] sm:$0xff]  ;;  %v201_v27 = vld [vmem:[%s6637_s1 + $0x5b8] sm:$0xff]  ;;  %v198_v32 = vld [vmem:[%s6637_s1 + $0x5a0] sm:$0xff] }
  0x3d   :  { %v196_v33 = vld [vmem:[%s6637_s1 + $0x590] sm:$0xff]  ;;  %v203_v36 = vld [vmem:[%s6637_s1 + $0x5c8] sm:$0xff]  ;;  %v209_v39 = vld [vmem:[%s6637_s1 + $0x5f8] sm:$0xff]  ;;  %v2442_v40 = vpack.c.bf16 %v198_v32, %v194_v31 }
  0x3e   :  { %2411 = vmatpush1.bf16.msra.mxu0 %v2410_v0  ;;  %v185_v0 = vld [vmem:[%s6637_s1 + $0x538] sm:$0xff]  ;;  %v200_v35 = vld [vmem:[%s6637_s1 + $0x5b0] sm:$0xff]  ;;  %v207_v37 = vld [vmem:[%s6637_s1 + $0x5e8] sm:$0xff] }
  0x3f   :  { %2923 = vmatpush1.bf16.msra.mxu1 %v2922_v1  ;;  %2413 = vmatprep.subr.bf16.mxu0 %v2412_v2  ;;  %v2430_v1 = vpack.c.bf16 %v174_v56, %v170_v55  ;;  %v2942_v2 = vpack.c.bf16 %v176_v59, %v172_v57  ;;  %v2944_v7 = vpack.c.bf16 %v185_v0, %v181_v63  ;;  %v206_v44 = vld [vmem:[%s6637_s1 + $0x5e0] sm:$0xff]  ;;  %v204_v45 = vld [vmem:[%s6637_s1 + $0x5d0] sm:$0xff]  ;;  %v215_v48 = vld [vmem:[%s6637_s1 + $0x628] sm:$0xff] }
  0x40   :  { %2925 = vmatprep.subr.bf16.mxu1 %v2924_v6  ;;  %v180_v6 = vld [vmem:[%s6637_s1 + $0x510] sm:$0xff]  ;;  %v213_v49 = vld [vmem:[%s6637_s1 + $0x618] sm:$0xff]  ;;  %v214_v55 = vld [vmem:[%s6637_s1 + $0x620] sm:$0xff] }
  0x41   :  { %v217_v50 = vld [vmem:[%s6637_s1 + $0x638] sm:$0xff]  ;;  %v212_v56 = vld [vmem:[%s6637_s1 + $0x610] sm:$0xff]  ;;  %v219_v59 = vld [vmem:[%s6637_s1 + $0x648] sm:$0xff] }
  0x42   :  { %2415 = vmatpush1.bf16.msra.mxu0 %v2414_v14  ;;  %v2434_v14 = vpack.c.bf16 %v182_v5, %v178_v4  ;;  %v2960_v57 = vpack.c.bf16 %v217_v50, %v213_v49  ;;  %v223_v60 = vld [vmem:[%s6637_s1 + $0x668] sm:$0xff]  ;;  %v221_v62 = vld [vmem:[%s6637_s1 + $0x658] sm:$0xff]  ;;  %v222_v4 = vld [vmem:[%s6637_s1 + $0x660] sm:$0xff] }
  0x43   :  { %2927 = vmatpush1.bf16.msra.mxu1 %v2926_v15  ;;  %2417 = vmatprep.subr.bf16.mxu0 %v2416_v16  ;;  %v2946_v15 = vpack.c.bf16 %v184_v8, %v180_v6  ;;  %v2436_v16 = vpack.c.bf16 %v191_v10, %v187_v9  ;;  %v225_v63 = vld [vmem:[%s6637_s1 + $0x678] sm:$0xff]  ;;  %v220_v5 = vld [vmem:[%s6637_s1 + $0x650] sm:$0xff]  ;;  %v227_v8 = vld [vmem:[%s6637_s1 + $0x688] sm:$0xff] }
  0x44   :  { %2929 = vmatprep.subr.bf16.mxu1 %v2928_v20  ;;  %v2948_v20 = vpack.c.bf16 %v193_v13, %v189_v12  ;;  %v2964_v6 = vpack.c.bf16 %v225_v63, %v221_v62  ;;  %v231_v9 = vld [vmem:[%s6637_s1 + $0x6a8] sm:$0xff]  ;;  %v229_v10 = vld [vmem:[%s6637_s1 + $0x698] sm:$0xff]  ;;  %v238_v31 = vld [vmem:[%s6637_s1 + $0x6e0] sm:$0xff] }
  0x45   :  { %1217 = vmatmul.mubr.f32.vlgmr.msra.gmra.mrb[0].mxu0 %v3760_v25  ;;  %v233_v12 = vld [vmem:[%s6637_s1 + $0x6b8] sm:$0xff]  ;;  %v236_v32 = vld [vmem:[%s6637_s1 + $0x6d0] sm:$0xff] }
  0x46   :  { %2419 = vmatpush1.bf16.msra.mxu0 %v2418_v28  ;;  %1785 = vmatmul.mubr.f32.vlgmr.msra.gmra.mrb[0].mxu1 %v3760_v25  ;;  %v168_v25 = vld [vmem:[%s6637_s1 + $0x4b0] sm:$0xff]  ;;  %v2438_v28 = vpack.c.bf16 %v190_v18, %v186_v17  ;;  %v230_v17 = vld [vmem:[%s6637_s1 + $0x6a0] sm:$0xff]  ;;  %v257_v49 = vld [vmem:[%s6637_s1 + $0x778] sm:$0xff] }
  0x47   :  { %2931 = vmatpush1.bf16.msra.mxu1 %v2930_v29  ;;  %2421 = vmatprep.subr.bf16.mxu0 %v2420_v30  ;;  %v2938_v53 = vpack.c.bf16 %v168_v25, %v164_v46  ;;  %v2950_v29 = vpack.c.bf16 %v192_v21, %v188_v19  ;;  %v2440_v30 = vpack.c.bf16 %v199_v23, %v195_v22  ;;  %v211_v25 = vld [vmem:[%s6637_s1 + $0x608] sm:$0xff]  ;;  %v228_v18 = vld [vmem:[%s6637_s1 + $0x690] sm:$0xff]  ;;  %v237_v23 = vld [vmem:[%s6637_s1 + $0x6d8] sm:$0xff] }
  0x48   :  { %2933 = vmatprep.subr.bf16.mxu1 %v2932_v34  ;;  %1287 = vmatprep.mubr.f32.mxu0 %v1084_v38  ;;  %v2952_v34 = vpack.c.bf16 %v201_v27, %v197_v26  ;;  %v2968_v19 = vpack.c.bf16 %v233_v12, %v229_v10  ;;  %v235_v21 = vld [vmem:[%s6637_s1 + $0x6c8] sm:$0xff]  ;;  %v241_v26 = vld [vmem:[%s6637_s1 + $0x6f8] sm:$0xff] }
  0x49   :  { %1855 = vmatprep.mubr.f32.mxu1 %v1084_v38  ;;  %v205_v38 = vld [vmem:[%s6637_s1 + $0x5d8] sm:$0xff]  ;;  %v239_v22 = vld [vmem:[%s6637_s1 + $0x6e8] sm:$0xff] }
  0x4a   :  { %2423 = vmatpush1.bf16.msra.mxu0 %v2422_v41  ;;  %v2954_v41 = vpack.c.bf16 %v200_v35, %v196_v33  ;;  %v2956_v46 = vpack.c.bf16 %v209_v39, %v205_v38  ;;  %v2972_v33 = vpack.c.bf16 %v241_v26, %v237_v23  ;;  %v243_v35 = vld [vmem:[%s6637_s1 + $0x708] sm:$0xff]  ;;  %v249_v38 = vld [vmem:[%s6637_s1 + $0x738] sm:$0xff] }
  0x4b   :  { %2935 = vmatpush1.bf16.msra.mxu1 %v2934_v42  ;;  %2425 = vmatprep.subr.bf16.mxu0 %v2424_v43  ;;  %v2444_v42 = vpack.c.bf16 %v207_v37, %v203_v36  ;;  %v202_v43 = vld [vmem:[%s6637_s1 + $0x5c0] sm:$0xff]  ;;  %v247_v36 = vld [vmem:[%s6637_s1 + $0x728] sm:$0xff]  ;;  %v245_v37 = vld [vmem:[%s6637_s1 + $0x718] sm:$0xff] }
  0x4c   :  { %2937 = vmatprep.subr.bf16.mxu1 %v2936_v47  ;;  %v208_v47 = vld [vmem:[%s6637_s1 + $0x5f0] sm:$0xff]  ;;  %v2446_v51 = vpack.c.bf16 %v206_v44, %v202_v43  ;;  %v246_v43 = vld [vmem:[%s6637_s1 + $0x720] sm:$0xff]  ;;  %v265_v62 = vld [vmem:[%s6637_s1 + $0x7b8] sm:$0xff] }
  0x4d   :  { %v244_v44 = vld [vmem:[%s6637_s1 + $0x710] sm:$0xff]  ;;  %v273_v10 = vld [vmem:[%s6637_s1 + $0x7f8] sm:$0xff] }
  0x4e   :  { %2427 = vmatpush1.bf16.msra.mxu0 %v2426_v52  ;;  %v2958_v52 = vpack.c.bf16 %v208_v47, %v204_v45  ;;  %v2976_v45 = vpack.c.bf16 %v249_v38, %v245_v37  ;;  %v251_v47 = vld [vmem:[%s6637_s1 + $0x748] sm:$0xff]  ;;  %v281_v23 = vld [vmem:[%s6637_s1 + $0x838] sm:$0xff] }
  0x4f   :  { %2939 = vmatpush1.bf16.msra.mxu1 %v2938_v53  ;;  %2429 = vmatprep.subr.bf16.mxu0 %v2428_v54  ;;  %v2448_v53 = vpack.c.bf16 %v215_v48, %v211_v25  ;;  %v210_v54 = vld [vmem:[%s6637_s1 + $0x600] sm:$0xff]  ;;  %v255_v25 = vld [vmem:[%s6637_s1 + $0x768] sm:$0xff]  ;;  %v253_v48 = vld [vmem:[%s6637_s1 + $0x758] sm:$0xff] }
  0x50   :  { %2941 = vmatprep.subr.bf16.mxu1 %v2940_v58  ;;  %v216_v58 = vld [vmem:[%s6637_s1 + $0x630] sm:$0xff]  ;;  %v2450_v0 = vpack.c.bf16 %v214_v55, %v210_v54  ;;  %v254_v54 = vld [vmem:[%s6637_s1 + $0x760] sm:$0xff]  ;;  %v289_v37 = vld [vmem:[%s6637_s1 + $0x878] sm:$0xff] }
  0x51   :  { %v252_v55 = vld [vmem:[%s6637_s1 + $0x750] sm:$0xff] }
  0x52   :  { %2431 = vmatpush1.bf16.msra.mxu0 %v2430_v1  ;;  %v2962_v1 = vpack.c.bf16 %v216_v58, %v212_v56  ;;  %v2980_v56 = vpack.c.bf16 %v257_v49, %v253_v48  ;;  %v259_v58 = vld [vmem:[%s6637_s1 + $0x788] sm:$0xff]  ;;  %v293_v49 = vld [vmem:[%s6637_s1 + $0x898] sm:$0xff] }
  0x53   :  { %2943 = vmatpush1.bf16.msra.mxu1 %v2942_v2  ;;  %2433 = vmatprep.subr.bf16.mxu0 %v2432_v3  ;;  %v2452_v2 = vpack.c.bf16 %v223_v60, %v219_v59  ;;  %v218_v3 = vld [vmem:[%s6637_s1 + $0x640] sm:$0xff]  ;;  %v263_v59 = vld [vmem:[%s6637_s1 + $0x7a8] sm:$0xff]  ;;  %v261_v60 = vld [vmem:[%s6637_s1 + $0x798] sm:$0xff] }
  0x54   :  { %2945 = vmatprep.subr.bf16.mxu1 %v2944_v7  ;;  %v224_v7 = vld [vmem:[%s6637_s1 + $0x670] sm:$0xff]  ;;  %v2454_v13 = vpack.c.bf16 %v222_v4, %v218_v3  ;;  %v262_v3 = vld [vmem:[%s6637_s1 + $0x7a0] sm:$0xff]  ;;  %v295_v48 = vld [vmem:[%s6637_s1 + $0x8a8] sm:$0xff] }
  0x55   :  { %v260_v4 = vld [vmem:[%s6637_s1 + $0x790] sm:$0xff] }
  0x56   :  { %2435 = vmatpush1.bf16.msra.mxu0 %v2434_v14  ;;  %v2966_v14 = vpack.c.bf16 %v224_v7, %v220_v5  ;;  %v2984_v5 = vpack.c.bf16 %v265_v62, %v261_v60  ;;  %v267_v7 = vld [vmem:[%s6637_s1 + $0x7c8] sm:$0xff]  ;;  %v301_v62 = vld [vmem:[%s6637_s1 + $0x8d8] sm:$0xff] }
  0x57   :  { %2947 = vmatpush1.bf16.msra.mxu1 %v2946_v15  ;;  %2437 = vmatprep.subr.bf16.mxu0 %v2436_v16  ;;  %v2456_v15 = vpack.c.bf16 %v231_v9, %v227_v8  ;;  %v226_v16 = vld [vmem:[%s6637_s1 + $0x680] sm:$0xff]  ;;  %v271_v8 = vld [vmem:[%s6637_s1 + $0x7e8] sm:$0xff]  ;;  %v269_v9 = vld [vmem:[%s6637_s1 + $0x7d8] sm:$0xff] }
  0x58   :  { %2949 = vmatprep.subr.bf16.mxu1 %v2948_v20  ;;  %v232_v20 = vld [vmem:[%s6637_s1 + $0x6b0] sm:$0xff]  ;;  %v2458_v27 = vpack.c.bf16 %v230_v17, %v226_v16  ;;  %v270_v16 = vld [vmem:[%s6637_s1 + $0x7e0] sm:$0xff]  ;;  %v303_v60 = vld [vmem:[%s6637_s1 + $0x8e8] sm:$0xff] }
  0x59   :  { %v268_v17 = vld [vmem:[%s6637_s1 + $0x7d0] sm:$0xff] }
  0x5a   :  { %2439 = vmatpush1.bf16.msra.mxu0 %v2438_v28  ;;  %v2970_v28 = vpack.c.bf16 %v232_v20, %v228_v18  ;;  %v2988_v18 = vpack.c.bf16 %v273_v10, %v269_v9  ;;  %v275_v20 = vld [vmem:[%s6637_s1 + $0x808] sm:$0xff]  ;;  %v309_v10 = vld [vmem:[%s6637_s1 + $0x918] sm:$0xff] }
  0x5b   :  { %2951 = vmatpush1.bf16.msra.mxu1 %v2950_v29  ;;  %2441 = vmatprep.subr.bf16.mxu0 %v2440_v30  ;;  %v2460_v29 = vpack.c.bf16 %v239_v22, %v235_v21  ;;  %v234_v30 = vld [vmem:[%s6637_s1 + $0x6c0] sm:$0xff]  ;;  %v279_v21 = vld [vmem:[%s6637_s1 + $0x828] sm:$0xff]  ;;  %v277_v22 = vld [vmem:[%s6637_s1 + $0x818] sm:$0xff] }
  0x5c   :  { %2953 = vmatprep.subr.bf16.mxu1 %v2952_v34  ;;  %v240_v34 = vld [vmem:[%s6637_s1 + $0x6f0] sm:$0xff]  ;;  %v2462_v39 = vpack.c.bf16 %v238_v31, %v234_v30  ;;  %v278_v30 = vld [vmem:[%s6637_s1 + $0x820] sm:$0xff]  ;;  %v311_v9 = vld [vmem:[%s6637_s1 + $0x928] sm:$0xff] }
  0x5d   :  { %v276_v31 = vld [vmem:[%s6637_s1 + $0x810] sm:$0xff] }
  0x5e   :  { %2443 = vmatpush1.bf16.msra.mxu0 %v2442_v40  ;;  %v2974_v40 = vpack.c.bf16 %v240_v34, %v236_v32  ;;  %v2992_v32 = vpack.c.bf16 %v281_v23, %v277_v22  ;;  %v283_v34 = vld [vmem:[%s6637_s1 + $0x848] sm:$0xff]  ;;  %v317_v23 = vld [vmem:[%s6637_s1 + $0x958] sm:$0xff] }
  0x5f   :  { %2955 = vmatpush1.bf16.msra.mxu1 %v2954_v41  ;;  %2445 = vmatprep.subr.bf16.mxu0 %v2444_v42  ;;  %v2464_v41 = vpack.c.bf16 %v247_v36, %v243_v35  ;;  %v242_v42 = vld [vmem:[%s6637_s1 + $0x700] sm:$0xff]  ;;  %v287_v35 = vld [vmem:[%s6637_s1 + $0x868] sm:$0xff]  ;;  %v285_v36 = vld [vmem:[%s6637_s1 + $0x858] sm:$0xff] }
  0x60   :  { %2957 = vmatprep.subr.bf16.mxu1 %v2956_v46  ;;  %v248_v46 = vld [vmem:[%s6637_s1 + $0x730] sm:$0xff]  ;;  %v2466_v50 = vpack.c.bf16 %v246_v43, %v242_v42  ;;  %v282_v42 = vld [vmem:[%s6637_s1 + $0x840] sm:$0xff]  ;;  %v319_v22 = vld [vmem:[%s6637_s1 + $0x968] sm:$0xff] }
  0x61   :  { %v286_v43 = vld [vmem:[%s6637_s1 + $0x860] sm:$0xff] }
  0x62   :  { %2447 = vmatpush1.bf16.msra.mxu0 %v2446_v51  ;;  %v2978_v51 = vpack.c.bf16 %v248_v46, %v244_v44  ;;  %v284_v44 = vld [vmem:[%s6637_s1 + $0x850] sm:$0xff]  ;;  %v2996_v46 = vpack.c.bf16 %v289_v37, %v285_v36  ;;  %v327_v36 = vld [vmem:[%s6637_s1 + $0x9a8] sm:$0xff]  ;;  %v325_v37 = vld [vmem:[%s6637_s1 + $0x998] sm:$0xff] }
  0x63   :  { %2959 = vmatpush1.bf16.msra.mxu1 %v2958_v52  ;;  %2449 = vmatprep.subr.bf16.mxu0 %v2448_v53  ;;  %v2468_v52 = vpack.c.bf16 %v255_v25, %v251_v47  ;;  %v250_v53 = vld [vmem:[%s6637_s1 + $0x740] sm:$0xff]  ;;  %v288_v47 = vld [vmem:[%s6637_s1 + $0x870] sm:$0xff]  ;;  %v291_v25 = vld [vmem:[%s6637_s1 + $0x888] sm:$0xff] }
  0x64   :  { %2961 = vmatprep.subr.bf16.mxu1 %v2960_v57  ;;  %v256_v57 = vld [vmem:[%s6637_s1 + $0x770] sm:$0xff]  ;;  %v2470_v63 = vpack.c.bf16 %v254_v54, %v250_v53  ;;  %v2998_v53 = vpack.c.bf16 %v288_v47, %v284_v44  ;;  %v2488_v54 = vpack.c.bf16 %v295_v48, %v291_v25  ;;  %v326_v44 = vld [vmem:[%s6637_s1 + $0x9a0] sm:$0xff]  ;;  %v331_v48 = vld [vmem:[%s6637_s1 + $0x9c8] sm:$0xff] }
  0x65   :  { %v328_v25 = vld [vmem:[%s6637_s1 + $0x9b0] sm:$0xff] }
  0x66   :  { %2451 = vmatpush1.bf16.msra.mxu0 %v2450_v0  ;;  %v2982_v0 = vpack.c.bf16 %v256_v57, %v252_v55  ;;  %v290_v55 = vld [vmem:[%s6637_s1 + $0x880] sm:$0xff]  ;;  %v292_v57 = vld [vmem:[%s6637_s1 + $0x890] sm:$0xff] }
  0x67   :  { %2963 = vmatpush1.bf16.msra.mxu1 %v2962_v1  ;;  %2453 = vmatprep.subr.bf16.mxu0 %v2452_v2  ;;  %v2472_v1 = vpack.c.bf16 %v263_v59, %v259_v58  ;;  %v258_v2 = vld [vmem:[%s6637_s1 + $0x780] sm:$0xff]  ;;  %v299_v59 = vld [vmem:[%s6637_s1 + $0x8c8] sm:$0xff] }
  0x68   :  { %2965 = vmatprep.subr.bf16.mxu1 %v2964_v6  ;;  %v264_v6 = vld [vmem:[%s6637_s1 + $0x7b0] sm:$0xff]  ;;  %v2474_v12 = vpack.c.bf16 %v262_v3, %v258_v2  ;;  %v2492_v2 = vpack.c.bf16 %v303_v60, %v299_v59  ;;  %v298_v3 = vld [vmem:[%s6637_s1 + $0x8c0] sm:$0xff]  ;;  %v339_v59 = vld [vmem:[%s6637_s1 + $0xa08] sm:$0xff] }
  0x69   :  { %v343_v60 = vld [vmem:[%s6637_s1 + $0xa28] sm:$0xff] }
  0x6a   :  { %2455 = vmatpush1.bf16.msra.mxu0 %v2454_v13  ;;  %v2986_v13 = vpack.c.bf16 %v264_v6, %v260_v4  ;;  %v302_v4 = vld [vmem:[%s6637_s1 + $0x8e0] sm:$0xff] }
  0x6b   :  { %2967 = vmatpush1.bf16.msra.mxu1 %v2966_v14  ;;  %2457 = vmatprep.subr.bf16.mxu0 %v2456_v15  ;;  %v2476_v14 = vpack.c.bf16 %v271_v8, %v267_v7  ;;  %v266_v15 = vld [vmem:[%s6637_s1 + $0x7c0] sm:$0xff]  ;;  %v304_v7 = vld [vmem:[%s6637_s1 + $0x8f0] sm:$0xff]  ;;  %v307_v8 = vld [vmem:[%s6637_s1 + $0x908] sm:$0xff] }
  0x6c   :  { %2969 = vmatprep.subr.bf16.mxu1 %v2968_v19  ;;  %v272_v19 = vld [vmem:[%s6637_s1 + $0x7f0] sm:$0xff]  ;;  %v2478_v26 = vpack.c.bf16 %v270_v16, %v266_v15  ;;  %v2496_v15 = vpack.c.bf16 %v311_v9, %v307_v8  ;;  %v306_v16 = vld [vmem:[%s6637_s1 + $0x900] sm:$0xff]  ;;  %v347_v8 = vld [vmem:[%s6637_s1 + $0xa48] sm:$0xff] }
  0x6d   :  { %v351_v9 = vld [vmem:[%s6637_s1 + $0xa68] sm:$0xff] }
  0x6e   :  { %2459 = vmatpush1.bf16.msra.mxu0 %v2458_v27  ;;  %v2990_v27 = vpack.c.bf16 %v272_v19, %v268_v17  ;;  %v310_v17 = vld [vmem:[%s6637_s1 + $0x920] sm:$0xff] }
  0x6f   :  { %2971 = vmatpush1.bf16.msra.mxu1 %v2970_v28  ;;  %2461 = vmatprep.subr.bf16.mxu0 %v2460_v29  ;;  %v2480_v28 = vpack.c.bf16 %v279_v21, %v275_v20  ;;  %v274_v29 = vld [vmem:[%s6637_s1 + $0x800] sm:$0xff]  ;;  %v312_v20 = vld [vmem:[%s6637_s1 + $0x930] sm:$0xff]  ;;  %v315_v21 = vld [vmem:[%s6637_s1 + $0x948] sm:$0xff] }
  0x70   :  { %2973 = vmatprep.subr.bf16.mxu1 %v2972_v33  ;;  %v280_v33 = vld [vmem:[%s6637_s1 + $0x830] sm:$0xff]  ;;  %v2482_v38 = vpack.c.bf16 %v278_v30, %v274_v29  ;;  %v2500_v29 = vpack.c.bf16 %v319_v22, %v315_v21  ;;  %v314_v30 = vld [vmem:[%s6637_s1 + $0x940] sm:$0xff]  ;;  %v355_v21 = vld [vmem:[%s6637_s1 + $0xa88] sm:$0xff] }
  0x71   :  { %v359_v22 = vld [vmem:[%s6637_s1 + $0xaa8] sm:$0xff] }
  0x72   :  { %2463 = vmatpush1.bf16.msra.mxu0 %v2462_v39  ;;  %v4280_v39 = vld [vmem:[%s6638_s0 + $0x8] sm:$0xff] }
  0x73   :  { %2975 = vmatpush1.bf16.msra.mxu1 %v2974_v40  ;;  %2465 = vmatprep.subr.bf16.mxu0 %v2464_v41  ;;  %v2994_v40 = vpack.c.bf16 %v280_v33, %v276_v31  ;;  %v2484_v41 = vpack.c.bf16 %v287_v35, %v283_v34  ;;  %v318_v31 = vld [vmem:[%s6637_s1 + $0x960] sm:$0xff]  ;;  %v320_v34 = vld [vmem:[%s6637_s1 + $0x970] sm:$0xff]  ;;  %v323_v35 = vld [vmem:[%s6637_s1 + $0x988] sm:$0xff] }
  0x74   :  { %2977 = vmatprep.subr.bf16.mxu1 %v2976_v45  ;;  %v4293_v45 = vrot.slane %v4280_v39, %v3727_v11 }
  0x76   :  { %2467 = vmatpush1.bf16.msra.mxu0 %v2466_v50  ;;  %v297_v50 = vld [vmem:[%s6637_s1 + $0x8b8] sm:$0xff] }
  0x77   :  { %2979 = vmatpush1.bf16.msra.mxu1 %v2978_v51  ;;  %2469 = vmatprep.subr.bf16.mxu0 %v2468_v52  ;;  %v1100_v51 = vcombine.high %v4293_v45, %v4293_v45  ;;  %v2486_v52 = vpack.c.bf16 %v286_v43, %v282_v42  ;;  %v3000_v58 = vpack.c.bf16 %v297_v50, %v293_v49  ;;  %v322_v43 = vld [vmem:[%s6637_s1 + $0x980] sm:$0xff]  ;;  %v335_v49 = vld [vmem:[%s6637_s1 + $0x9e8] sm:$0xff]  ;;  %v333_v50 = vld [vmem:[%s6637_s1 + $0x9d8] sm:$0xff] }
  0x78   :  { %2981 = vmatprep.subr.bf16.mxu1 %v2980_v56  ;;  %v294_v56 = vld [vmem:[%s6637_s1 + $0x8a0] sm:$0xff]  ;;  %v2504_v42 = vpack.c.bf16 %v327_v36, %v323_v35  ;;  %v363_v35 = vld [vmem:[%s6637_s1 + $0xac8] sm:$0xff] }
  0x79   :  { %v367_v36 = vld [vmem:[%s6637_s1 + $0xae8] sm:$0xff] }
  0x7a   :  { %2471 = vmatpush1.bf16.msra.mxu0 %v2470_v63  ;;  %v305_v63 = vld [vmem:[%s6637_s1 + $0x8f8] sm:$0xff] }
  0x7b   :  { %2983 = vmatpush1.bf16.msra.mxu1 %v2982_v0  ;;  %2473 = vmatprep.subr.bf16.mxu0 %v2472_v1  ;;  %v2490_v0 = vpack.c.bf16 %v294_v56, %v290_v55  ;;  %v3004_v6 = vpack.c.bf16 %v305_v63, %v301_v62  ;;  %v330_v55 = vld [vmem:[%s6637_s1 + $0x9c0] sm:$0xff]  ;;  %v341_v62 = vld [vmem:[%s6637_s1 + $0xa18] sm:$0xff] }
  0x7c   :  { %2985 = vmatprep.subr.bf16.mxu1 %v2984_v5  ;;  %v300_v5 = vld [vmem:[%s6637_s1 + $0x8d0] sm:$0xff]  ;;  %v334_v56 = vld [vmem:[%s6637_s1 + $0x9e0] sm:$0xff]  ;;  %v345_v63 = vld [vmem:[%s6637_s1 + $0xa38] sm:$0xff] }
  0x7e   :  { %2475 = vmatpush1.bf16.msra.mxu0 %v2474_v12  ;;  %v313_v12 = vld [vmem:[%s6637_s1 + $0x938] sm:$0xff] }
  0x7f   :  { %2987 = vmatpush1.bf16.msra.mxu1 %v2986_v13  ;;  %2477 = vmatprep.subr.bf16.mxu0 %v2476_v14  ;;  %v2494_v13 = vpack.c.bf16 %v302_v4, %v298_v3  ;;  %v3006_v14 = vpack.c.bf16 %v304_v7, %v300_v5  ;;  %v3008_v19 = vpack.c.bf16 %v313_v12, %v309_v10  ;;  %v338_v3 = vld [vmem:[%s6637_s1 + $0xa00] sm:$0xff]  ;;  %v340_v5 = vld [vmem:[%s6637_s1 + $0xa10] sm:$0xff]  ;;  %v349_v10 = vld [vmem:[%s6637_s1 + $0xa58] sm:$0xff] }
  0x80   :  { %2989 = vmatprep.subr.bf16.mxu1 %v2988_v18  ;;  %v308_v18 = vld [vmem:[%s6637_s1 + $0x910] sm:$0xff]  ;;  %v342_v4 = vld [vmem:[%s6637_s1 + $0xa20] sm:$0xff]  ;;  %v353_v12 = vld [vmem:[%s6637_s1 + $0xa78] sm:$0xff] }
  0x81   :  { %v344_v7 = vld [vmem:[%s6637_s1 + $0xa30] sm:$0xff] }
  0x82   :  { %2479 = vmatpush1.bf16.msra.mxu0 %v2478_v26  ;;  %v321_v26 = vld [vmem:[%s6637_s1 + $0x978] sm:$0xff] }
  0x83   :  { %2991 = vmatpush1.bf16.msra.mxu1 %v2990_v27  ;;  %2481 = vmatprep.subr.bf16.mxu0 %v2480_v28  ;;  %v2498_v27 = vpack.c.bf16 %v310_v17, %v306_v16  ;;  %v3010_v28 = vpack.c.bf16 %v312_v20, %v308_v18  ;;  %v3012_v33 = vpack.c.bf16 %v321_v26, %v317_v23  ;;  %v346_v16 = vld [vmem:[%s6637_s1 + $0xa40] sm:$0xff]  ;;  %v348_v18 = vld [vmem:[%s6637_s1 + $0xa50] sm:$0xff]  ;;  %v357_v23 = vld [vmem:[%s6637_s1 + $0xa98] sm:$0xff] }
  0x84   :  { %2993 = vmatprep.subr.bf16.mxu1 %v2992_v32  ;;  %v316_v32 = vld [vmem:[%s6637_s1 + $0x950] sm:$0xff]  ;;  %v350_v17 = vld [vmem:[%s6637_s1 + $0xa60] sm:$0xff]  ;;  %v361_v26 = vld [vmem:[%s6637_s1 + $0xab8] sm:$0xff] }
  0x85   :  { %1288 = vmatmul.mubr.f32.vlgmr.msra.gmra.mrb[0].mxu0 %v3881_v24  ;;  %v352_v20 = vld [vmem:[%s6637_s1 + $0xa70] sm:$0xff] }
  0x86   :  { %2483 = vmatpush1.bf16.msra.mxu0 %v2482_v38  ;;  %1856 = vmatmul.mubr.f32.vlgmr.msra.gmra.mrb[0].mxu1 %v3881_v24  ;;  %v296_v24 = vld [vmem:[%s6637_s1 + $0x8b0] sm:$0xff]  ;;  %v329_v38 = vld [vmem:[%s6637_s1 + $0x9b8] sm:$0xff] }
  0x87   :  { %2995 = vmatpush1.bf16.msra.mxu1 %v2994_v40  ;;  %2485 = vmatprep.subr.bf16.mxu0 %v2484_v41  ;;  %v3002_v1 = vpack.c.bf16 %v296_v24, %v292_v57  ;;  %v2502_v40 = vpack.c.bf16 %v318_v31, %v314_v30  ;;  %v3014_v41 = vpack.c.bf16 %v320_v34, %v316_v32  ;;  %v332_v57 = vld [vmem:[%s6637_s1 + $0x9d0] sm:$0xff]  ;;  %v354_v30 = vld [vmem:[%s6637_s1 + $0xa80] sm:$0xff] }
  0x88   :  { %2997 = vmatprep.subr.bf16.mxu1 %v2996_v46  ;;  %1358 = vmatprep.mubr.f32.mxu0 %v1100_v51  ;;  %v324_v46 = vld [vmem:[%s6637_s1 + $0x990] sm:$0xff]  ;;  %v3016_v47 = vpack.c.bf16 %v329_v38, %v325_v37  ;;  %v358_v31 = vld [vmem:[%s6637_s1 + $0xaa0] sm:$0xff]  ;;  %v365_v37 = vld [vmem:[%s6637_s1 + $0xad8] sm:$0xff] }
  0x89   :  { %1926 = vmatprep.mubr.f32.mxu1 %v1100_v51  ;;  %v337_v51 = vld [vmem:[%s6637_s1 + $0x9f8] sm:$0xff]  ;;  %v336_v24 = vld [vmem:[%s6637_s1 + $0x9f0] sm:$0xff] }
  0x8a   :  { %2487 = vmatpush1.bf16.msra.mxu0 %v2486_v52  ;;  %v2506_v52 = vpack.c.bf16 %v326_v44, %v322_v43  ;;  %v356_v32 = vld [vmem:[%s6637_s1 + $0xa90] sm:$0xff]  ;;  %v369_v38 = vld [vmem:[%s6637_s1 + $0xaf8] sm:$0xff]  ;;  %v362_v43 = vld [vmem:[%s6637_s1 + $0xac0] sm:$0xff] }
  0x8b   :  { %2999 = vmatpush1.bf16.msra.mxu1 %v2998_v53  ;;  %2489 = vmatprep.subr.bf16.mxu0 %v2488_v54  ;;  %v3018_v53 = vpack.c.bf16 %v328_v25, %v324_v46  ;;  %v2508_v54 = vpack.c.bf16 %v335_v49, %v331_v48  ;;  %v360_v34 = vld [vmem:[%s6637_s1 + $0xab0] sm:$0xff]  ;;  %v366_v44 = vld [vmem:[%s6637_s1 + $0xae0] sm:$0xff]  ;;  %v371_v48 = vld [vmem:[%s6637_s1 + $0xb08] sm:$0xff] }
  0x8c   :  { %3001 = vmatprep.subr.bf16.mxu1 %v3000_v58  ;;  %v3020_v58 = vpack.c.bf16 %v337_v51, %v333_v50  ;;  %v364_v46 = vld [vmem:[%s6637_s1 + $0xad0] sm:$0xff]  ;;  %v375_v49 = vld [vmem:[%s6637_s1 + $0xb28] sm:$0xff]  ;;  %v373_v50 = vld [vmem:[%s6637_s1 + $0xb18] sm:$0xff] }
  0x8d   :  { %v368_v25 = vld [vmem:[%s6637_s1 + $0xaf0] sm:$0xff]  ;;  %v377_v51 = vld [vmem:[%s6637_s1 + $0xb38] sm:$0xff] }
  0x8e   :  { %2491 = vmatpush1.bf16.msra.mxu0 %v2490_v0  ;;  %v2510_v0 = vpack.c.bf16 %v334_v56, %v330_v55  ;;  %v370_v55 = vld [vmem:[%s6637_s1 + $0xb00] sm:$0xff] }
  0x8f   :  { %3003 = vmatpush1.bf16.msra.mxu1 %v3002_v1  ;;  %2493 = vmatprep.subr.bf16.mxu0 %v2492_v2  ;;  %v3022_v1 = vpack.c.bf16 %v336_v24, %v332_v57  ;;  %v2512_v2 = vpack.c.bf16 %v343_v60, %v339_v59  ;;  %v374_v56 = vld [vmem:[%s6637_s1 + $0xb20] sm:$0xff]  ;;  %v372_v57 = vld [vmem:[%s6637_s1 + $0xb10] sm:$0xff]  ;;  %v379_v59 = vld [vmem:[%s6637_s1 + $0xb48] sm:$0xff] }
  0x90   :  { %3005 = vmatprep.subr.bf16.mxu1 %v3004_v6  ;;  %v3024_v6 = vpack.c.bf16 %v345_v63, %v341_v62  ;;  %v376_v24 = vld [vmem:[%s6637_s1 + $0xb30] sm:$0xff]  ;;  %v383_v60 = vld [vmem:[%s6637_s1 + $0xb68] sm:$0xff]  ;;  %v381_v62 = vld [vmem:[%s6637_s1 + $0xb58] sm:$0xff] }
  0x91   :  { %v385_v63 = vld [vmem:[%s6637_s1 + $0xb78] sm:$0xff] }
  0x92   :  { %2495 = vmatpush1.bf16.msra.mxu0 %v2494_v13  ;;  %v2514_v13 = vpack.c.bf16 %v342_v4, %v338_v3  ;;  %v378_v3 = vld [vmem:[%s6637_s1 + $0xb40] sm:$0xff] }
  0x93   :  { %3007 = vmatpush1.bf16.msra.mxu1 %v3006_v14  ;;  %2497 = vmatprep.subr.bf16.mxu0 %v2496_v15  ;;  %v3026_v14 = vpack.c.bf16 %v344_v7, %v340_v5  ;;  %v2516_v15 = vpack.c.bf16 %v351_v9, %v347_v8  ;;  %v382_v4 = vld [vmem:[%s6637_s1 + $0xb60] sm:$0xff]  ;;  %v380_v5 = vld [vmem:[%s6637_s1 + $0xb50] sm:$0xff]  ;;  %v387_v8 = vld [vmem:[%s6637_s1 + $0xb88] sm:$0xff] }
  0x94   :  { %3009 = vmatprep.subr.bf16.mxu1 %v3008_v19  ;;  %v3028_v19 = vpack.c.bf16 %v353_v12, %v349_v10  ;;  %v384_v7 = vld [vmem:[%s6637_s1 + $0xb70] sm:$0xff]  ;;  %v391_v9 = vld [vmem:[%s6637_s1 + $0xba8] sm:$0xff]  ;;  %v389_v10 = vld [vmem:[%s6637_s1 + $0xb98] sm:$0xff] }
  0x95   :  { %v393_v12 = vld [vmem:[%s6637_s1 + $0xbb8] sm:$0xff] }
  0x96   :  { %2499 = vmatpush1.bf16.msra.mxu0 %v2498_v27  ;;  %v2518_v27 = vpack.c.bf16 %v350_v17, %v346_v16  ;;  %v386_v16 = vld [vmem:[%s6637_s1 + $0xb80] sm:$0xff] }
  0x97   :  { %3011 = vmatpush1.bf16.msra.mxu1 %v3010_v28  ;;  %2501 = vmatprep.subr.bf16.mxu0 %v2500_v29  ;;  %v3030_v28 = vpack.c.bf16 %v352_v20, %v348_v18  ;;  %v2520_v29 = vpack.c.bf16 %v359_v22, %v355_v21  ;;  %v390_v17 = vld [vmem:[%s6637_s1 + $0xba0] sm:$0xff]  ;;  %v388_v18 = vld [vmem:[%s6637_s1 + $0xb90] sm:$0xff]  ;;  %v395_v21 = vld [vmem:[%s6637_s1 + $0xbc8] sm:$0xff] }
  0x98   :  { %3013 = vmatprep.subr.bf16.mxu1 %v3012_v33  ;;  %v3032_v33 = vpack.c.bf16 %v361_v26, %v357_v23  ;;  %v392_v20 = vld [vmem:[%s6637_s1 + $0xbb0] sm:$0xff]  ;;  %v399_v22 = vld [vmem:[%s6637_s1 + $0xbe8] sm:$0xff]  ;;  %v397_v23 = vld [vmem:[%s6637_s1 + $0xbd8] sm:$0xff] }
  0x99   :  { %v401_v26 = vld [vmem:[%s6637_s1 + $0xbf8] sm:$0xff] }
  0x9a   :  { %2503 = vmatpush1.bf16.msra.mxu0 %v2502_v40  ;;  %v2522_v40 = vpack.c.bf16 %v358_v31, %v354_v30  ;;  %v394_v30 = vld [vmem:[%s6637_s1 + $0xbc0] sm:$0xff] }
  0x9b   :  { %3015 = vmatpush1.bf16.msra.mxu1 %v3014_v41  ;;  %2505 = vmatprep.subr.bf16.mxu0 %v2504_v42  ;;  %v3034_v41 = vpack.c.bf16 %v360_v34, %v356_v32  ;;  %v2524_v42 = vpack.c.bf16 %v367_v36, %v363_v35  ;;  %v398_v31 = vld [vmem:[%s6637_s1 + $0xbe0] sm:$0xff]  ;;  %v396_v32 = vld [vmem:[%s6637_s1 + $0xbd0] sm:$0xff]  ;;  %v403_v35 = vld [vmem:[%s6637_s1 + $0xc08] sm:$0xff] }
  0x9c   :  { %3017 = vmatprep.subr.bf16.mxu1 %v3016_v47  ;;  %v3036_v47 = vpack.c.bf16 %v369_v38, %v365_v37  ;;  %v400_v34 = vld [vmem:[%s6637_s1 + $0xbf0] sm:$0xff]  ;;  %v407_v36 = vld [vmem:[%s6637_s1 + $0xc28] sm:$0xff]  ;;  %v1085_v37 = vcombine.high %v4280_v39, %v4280_v39  ;;  %v405_v38 = vld [vmem:[%s6637_s1 + $0xc18] sm:$0xff] }
  0x9d   :  { %v406_v39 = vld [vmem:[%s6637_s1 + $0xc20] sm:$0xff] }
  0x9e   :  { %2507 = vmatpush1.bf16.msra.mxu0 %v2506_v52  ;;  %v2526_v52 = vpack.c.bf16 %v366_v44, %v362_v43  ;;  %v2544_v43 = vpack.c.bf16 %v407_v36, %v403_v35  ;;  %v402_v44 = vld [vmem:[%s6637_s1 + $0xc00] sm:$0xff]  ;;  %v440_v35 = vld [vmem:[%s6637_s1 + $0xd30] sm:$0xff]  ;;  %v443_v36 = vld [vmem:[%s6637_s1 + $0xd48] sm:$0xff] }
  0x9f   :  { %3019 = vmatpush1.bf16.msra.mxu1 %v3018_v53  ;;  %2509 = vmatprep.subr.bf16.mxu0 %v2508_v54  ;;  %v3038_v53 = vpack.c.bf16 %v368_v25, %v364_v46  ;;  %v2528_v54 = vpack.c.bf16 %v375_v49, %v371_v48  ;;  %v404_v46 = vld [vmem:[%s6637_s1 + $0xc10] sm:$0xff]  ;;  %v411_v48 = vld [vmem:[%s6637_s1 + $0xc48] sm:$0xff] }
  0xa0   :  { %3021 = vmatprep.subr.bf16.mxu1 %v3020_v58  ;;  %v3040_v58 = vpack.c.bf16 %v377_v51, %v373_v50  ;;  %v408_v25 = vld [vmem:[%s6637_s1 + $0xc30] sm:$0xff]  ;;  %v415_v49 = vld [vmem:[%s6637_s1 + $0xc68] sm:$0xff]  ;;  %v4671_v50 = vrot.slane %v1085_v37, %v3727_v11  ;;  %v413_v51 = vld [vmem:[%s6637_s1 + $0xc58] sm:$0xff] }
  0xa1   :  { %v447_v37 = vld [vmem:[%s6637_s1 + $0xd68] sm:$0xff] }
  0xa2   :  { %2511 = vmatpush1.bf16.msra.mxu0 %v2510_v0  ;;  %v2530_v0 = vpack.c.bf16 %v374_v56, %v370_v55  ;;  %v2548_v55 = vpack.c.bf16 %v415_v49, %v411_v48  ;;  %v410_v56 = vld [vmem:[%s6637_s1 + $0xc40] sm:$0xff]  ;;  %v451_v48 = vld [vmem:[%s6637_s1 + $0xd88] sm:$0xff] }
  0xa3   :  { %3023 = vmatpush1.bf16.msra.mxu1 %v3022_v1  ;;  %2513 = vmatprep.subr.bf16.mxu0 %v2512_v2  ;;  %v3042_v1 = vpack.c.bf16 %v376_v24, %v372_v57  ;;  %v2532_v2 = vpack.c.bf16 %v383_v60, %v379_v59  ;;  %v414_v57 = vld [vmem:[%s6637_s1 + $0xc60] sm:$0xff]  ;;  %v416_v59 = vld [vmem:[%s6637_s1 + $0xc70] sm:$0xff]  ;;  %v419_v60 = vld [vmem:[%s6637_s1 + $0xc88] sm:$0xff] }
  0xa4   :  { %3025 = vmatprep.subr.bf16.mxu1 %v3024_v6  ;;  %v3044_v6 = vpack.c.bf16 %v385_v63, %v381_v62  ;;  %v423_v62 = vld [vmem:[%s6637_s1 + $0xca8] sm:$0xff]  ;;  %v1101_v63 = vcombine.high %v4671_v50, %v4671_v50 }
  0xa5   :  { %v455_v49 = vld [vmem:[%s6637_s1 + $0xda8] sm:$0xff] }
  0xa6   :  { %2515 = vmatpush1.bf16.msra.mxu0 %v2514_v13  ;;  %v2534_v13 = vpack.c.bf16 %v382_v4, %v378_v3  ;;  %v2552_v4 = vpack.c.bf16 %v423_v62, %v419_v60  ;;  %v459_v60 = vld [vmem:[%s6637_s1 + $0xdc8] sm:$0xff] }
  0xa7   :  { %3027 = vmatpush1.bf16.msra.mxu1 %v3026_v14  ;;  %2517 = vmatprep.subr.bf16.mxu0 %v2516_v15  ;;  %v3046_v14 = vpack.c.bf16 %v384_v7, %v380_v5  ;;  %v2536_v15 = vpack.c.bf16 %v391_v9, %v387_v8  ;;  %v418_v5 = vld [vmem:[%s6637_s1 + $0xc80] sm:$0xff]  ;;  %v420_v7 = vld [vmem:[%s6637_s1 + $0xc90] sm:$0xff]  ;;  %v427_v9 = vld [vmem:[%s6637_s1 + $0xcc8] sm:$0xff] }
  0xa8   :  { %3029 = vmatprep.subr.bf16.mxu1 %v3028_v19  ;;  %v3048_v19 = vpack.c.bf16 %v393_v12, %v389_v10  ;;  %v431_v10 = vld [vmem:[%s6637_s1 + $0xce8] sm:$0xff]  ;;  %v429_v12 = vld [vmem:[%s6637_s1 + $0xcd8] sm:$0xff] }
  0xa9   :  { %v463_v62 = vld [vmem:[%s6637_s1 + $0xde8] sm:$0xff] }
  0xaa   :  { %2519 = vmatpush1.bf16.msra.mxu0 %v2518_v27  ;;  %v2538_v27 = vpack.c.bf16 %v390_v17, %v386_v16  ;;  %v2556_v16 = vpack.c.bf16 %v431_v10, %v427_v9  ;;  %v426_v17 = vld [vmem:[%s6637_s1 + $0xcc0] sm:$0xff]  ;;  %v471_v9 = vld [vmem:[%s6637_s1 + $0xe28] sm:$0xff]  ;;  %v469_v10 = vld [vmem:[%s6637_s1 + $0xe18] sm:$0xff] }
  0xab   :  { %3031 = vmatpush1.bf16.msra.mxu1 %v3030_v28  ;;  %2521 = vmatprep.subr.bf16.mxu0 %v2520_v29  ;;  %v3050_v28 = vpack.c.bf16 %v392_v20, %v388_v18  ;;  %v2540_v29 = vpack.c.bf16 %v399_v22, %v395_v21  ;;  %v430_v18 = vld [vmem:[%s6637_s1 + $0xce0] sm:$0xff]  ;;  %v432_v21 = vld [vmem:[%s6637_s1 + $0xcf0] sm:$0xff]  ;;  %v435_v22 = vld [vmem:[%s6637_s1 + $0xd08] sm:$0xff] }
  0xac   :  { %3033 = vmatprep.subr.bf16.mxu1 %v3032_v33  ;;  %v3052_v33 = vpack.c.bf16 %v401_v26, %v397_v23  ;;  %v439_v23 = vld [vmem:[%s6637_s1 + $0xd28] sm:$0xff]  ;;  %v437_v26 = vld [vmem:[%s6637_s1 + $0xd18] sm:$0xff] }
  0xae   :  { %2523 = vmatpush1.bf16.msra.mxu0 %v2522_v40  ;;  %v409_v40 = vld [vmem:[%s6637_s1 + $0xc38] sm:$0xff] }
  0xaf   :  { %3035 = vmatpush1.bf16.msra.mxu1 %v3034_v41  ;;  %2525 = vmatprep.subr.bf16.mxu0 %v2524_v42  ;;  %v2542_v41 = vpack.c.bf16 %v398_v31, %v394_v30  ;;  %v3054_v42 = vpack.c.bf16 %v400_v34, %v396_v32  ;;  %v2560_v30 = vpack.c.bf16 %v439_v23, %v435_v22  ;;  %v434_v31 = vld [vmem:[%s6637_s1 + $0xd00] sm:$0xff]  ;;  %v479_v22 = vld [vmem:[%s6637_s1 + $0xe68] sm:$0xff]  ;;  %v477_v23 = vld [vmem:[%s6637_s1 + $0xe58] sm:$0xff] }
  0xb0   :  { %3037 = vmatprep.subr.bf16.mxu1 %v3036_v47  ;;  %v3056_v47 = vpack.c.bf16 %v409_v40, %v405_v38  ;;  %v438_v32 = vld [vmem:[%s6637_s1 + $0xd20] sm:$0xff]  ;;  %v445_v38 = vld [vmem:[%s6637_s1 + $0xd58] sm:$0xff] }
  0xb1   :  { %v449_v40 = vld [vmem:[%s6637_s1 + $0xd78] sm:$0xff] }
  0xb2   :  { %2527 = vmatpush1.bf16.msra.mxu0 %v2526_v52  ;;  %v417_v52 = vld [vmem:[%s6637_s1 + $0xc78] sm:$0xff] }
  0xb3   :  { %3039 = vmatpush1.bf16.msra.mxu1 %v3038_v53  ;;  %2529 = vmatprep.subr.bf16.mxu0 %v2528_v54  ;;  %v2546_v53 = vpack.c.bf16 %v406_v39, %v402_v44  ;;  %v3058_v54 = vpack.c.bf16 %v408_v25, %v404_v46  ;;  %v3060_v24 = vpack.c.bf16 %v417_v52, %v413_v51  ;;  %v442_v44 = vld [vmem:[%s6637_s1 + $0xd40] sm:$0xff]  ;;  %v444_v46 = vld [vmem:[%s6637_s1 + $0xd50] sm:$0xff]  ;;  %v453_v51 = vld [vmem:[%s6637_s1 + $0xd98] sm:$0xff] }
  0xb4   :  { %3041 = vmatprep.subr.bf16.mxu1 %v3040_v58  ;;  %v412_v58 = vld [vmem:[%s6637_s1 + $0xc50] sm:$0xff]  ;;  %v446_v39 = vld [vmem:[%s6637_s1 + $0xd60] sm:$0xff]  ;;  %v457_v52 = vld [vmem:[%s6637_s1 + $0xdb8] sm:$0xff] }
  0xb5   :  { %v3062_v3 = vpack.c.bf16 %v416_v59, %v412_v58  ;;  %v448_v25 = vld [vmem:[%s6637_s1 + $0xd70] sm:$0xff] }
  0xb6   :  { %2531 = vmatpush1.bf16.msra.mxu0 %v2530_v0  ;;  %v421_v0 = vld [vmem:[%s6637_s1 + $0xc98] sm:$0xff]  ;;  %v452_v58 = vld [vmem:[%s6637_s1 + $0xd90] sm:$0xff] }
  0xb7   :  { %3043 = vmatpush1.bf16.msra.mxu1 %v3042_v1  ;;  %2533 = vmatprep.subr.bf16.mxu0 %v2532_v2  ;;  %v425_v1 = vld [vmem:[%s6637_s1 + $0xcb8] sm:$0xff]  ;;  %v2550_v2 = vpack.c.bf16 %v414_v57, %v410_v56  ;;  %v450_v56 = vld [vmem:[%s6637_s1 + $0xd80] sm:$0xff]  ;;  %v456_v59 = vld [vmem:[%s6637_s1 + $0xdb0] sm:$0xff] }
  0xb8   :  { %3045 = vmatprep.subr.bf16.mxu1 %v3044_v6  ;;  %v422_v6 = vld [vmem:[%s6637_s1 + $0xca0] sm:$0xff]  ;;  %v3064_v8 = vpack.c.bf16 %v425_v1, %v421_v0  ;;  %v465_v0 = vld [vmem:[%s6637_s1 + $0xdf8] sm:$0xff] }
  0xb9   :  { %v454_v57 = vld [vmem:[%s6637_s1 + $0xda0] sm:$0xff] }
  0xba   :  { %2535 = vmatpush1.bf16.msra.mxu0 %v2534_v13  ;;  %v433_v13 = vld [vmem:[%s6637_s1 + $0xcf8] sm:$0xff]  ;;  %v2570_v1 = vpack.c.bf16 %v454_v57, %v450_v56  ;;  %v494_v56 = vld [vmem:[%s6637_s1 + $0xee0] sm:$0xff]  ;;  %v492_v57 = vld [vmem:[%s6637_s1 + $0xed0] sm:$0xff] }
  0xbb   :  { %3047 = vmatpush1.bf16.msra.mxu1 %v3046_v14  ;;  %2537 = vmatprep.subr.bf16.mxu0 %v2536_v15  ;;  %v2554_v14 = vpack.c.bf16 %v422_v6, %v418_v5  ;;  %v3068_v20 = vpack.c.bf16 %v433_v13, %v429_v12  ;;  %v462_v5 = vld [vmem:[%s6637_s1 + $0xde0] sm:$0xff]  ;;  %v460_v6 = vld [vmem:[%s6637_s1 + $0xdd0] sm:$0xff]  ;;  %v473_v12 = vld [vmem:[%s6637_s1 + $0xe38] sm:$0xff] }
  0xbc   :  { %3049 = vmatprep.subr.bf16.mxu1 %v3048_v19  ;;  %v428_v19 = vld [vmem:[%s6637_s1 + $0xcd0] sm:$0xff] }
  0xbe   :  { %2539 = vmatpush1.bf16.msra.mxu0 %v2538_v27  ;;  %v441_v27 = vld [vmem:[%s6637_s1 + $0xd38] sm:$0xff] }
  0xbf   :  { %3051 = vmatpush1.bf16.msra.mxu1 %v3050_v28  ;;  %2541 = vmatprep.subr.bf16.mxu0 %v2540_v29  ;;  %v2558_v28 = vpack.c.bf16 %v430_v18, %v426_v17  ;;  %v3070_v29 = vpack.c.bf16 %v432_v21, %v428_v19  ;;  %v3072_v34 = vpack.c.bf16 %v441_v27, %v437_v26  ;;  %v470_v17 = vld [vmem:[%s6637_s1 + $0xe20] sm:$0xff]  ;;  %v468_v18 = vld [vmem:[%s6637_s1 + $0xe10] sm:$0xff]  ;;  %v475_v21 = vld [vmem:[%s6637_s1 + $0xe48] sm:$0xff] }
  0xc0   :  { %3053 = vmatprep.subr.bf16.mxu1 %v3052_v33  ;;  %v436_v33 = vld [vmem:[%s6637_s1 + $0xd10] sm:$0xff]  ;;  %v3088_v19 = vpack.c.bf16 %v473_v12, %v469_v10  ;;  %v481_v26 = vld [vmem:[%s6637_s1 + $0xe78] sm:$0xff] }
  0xc1   :  { %v513_v10 = vld [vmem:[%s6637_s1 + $0xf78] sm:$0xff] }
  0xc2   :  { %2543 = vmatpush1.bf16.msra.mxu0 %v2542_v41  ;;  %v2562_v41 = vpack.c.bf16 %v438_v32, %v434_v31  ;;  %v478_v31 = vld [vmem:[%s6637_s1 + $0xe60] sm:$0xff]  ;;  %v476_v32 = vld [vmem:[%s6637_s1 + $0xe50] sm:$0xff] }
  0xc3   :  { %3055 = vmatpush1.bf16.msra.mxu1 %v3054_v42  ;;  %2545 = vmatprep.subr.bf16.mxu0 %v2544_v43  ;;  %v3074_v42 = vpack.c.bf16 %v440_v35, %v436_v33  ;;  %v2564_v43 = vpack.c.bf16 %v447_v37, %v443_v36  ;;  %v3092_v33 = vpack.c.bf16 %v481_v26, %v477_v23  ;;  %v483_v35 = vld [vmem:[%s6637_s1 + $0xe88] sm:$0xff]  ;;  %v485_v37 = vld [vmem:[%s6637_s1 + $0xe98] sm:$0xff] }
  0xc4   :  { %3057 = vmatprep.subr.bf16.mxu1 %v3056_v47  ;;  %v3076_v47 = vpack.c.bf16 %v449_v40, %v445_v38  ;;  %v487_v36 = vld [vmem:[%s6637_s1 + $0xea8] sm:$0xff]  ;;  %v489_v38 = vld [vmem:[%s6637_s1 + $0xeb8] sm:$0xff] }
  0xc5   :  { %1359 = vmatmul.mubr.f32.vlgmr.msra.gmra.mrb[0].mxu0 %v4293_v45  ;;  %v521_v23 = vld [vmem:[%s6637_s1 + $0xfb8] sm:$0xff] }
  0xc6   :  { %2547 = vmatpush1.bf16.msra.mxu0 %v2546_v53  ;;  %1927 = vmatmul.mubr.f32.vlgmr.msra.gmra.mrb[0].mxu1 %v4293_v45  ;;  %v424_v45 = vld [vmem:[%s6637_s1 + $0xcb0] sm:$0xff]  ;;  %v2566_v53 = vpack.c.bf16 %v446_v39, %v442_v44  ;;  %v486_v44 = vld [vmem:[%s6637_s1 + $0xea0] sm:$0xff] }
  0xc7   :  { %3059 = vmatpush1.bf16.msra.mxu1 %v3058_v54  ;;  %2549 = vmatprep.subr.bf16.mxu0 %v2548_v55  ;;  %v3066_v15 = vpack.c.bf16 %v424_v45, %v420_v7  ;;  %v3078_v54 = vpack.c.bf16 %v448_v25, %v444_v46  ;;  %v2568_v55 = vpack.c.bf16 %v455_v49, %v451_v48  ;;  %v467_v45 = vld [vmem:[%s6637_s1 + $0xe08] sm:$0xff]  ;;  %v484_v39 = vld [vmem:[%s6637_s1 + $0xe90] sm:$0xff]  ;;  %v493_v49 = vld [vmem:[%s6637_s1 + $0xed8] sm:$0xff] }
  0xc8   :  { %3061 = vmatprep.subr.bf16.mxu1 %v3060_v24  ;;  %1429 = vmatprep.mubr.f32.mxu0 %v1101_v63  ;;  %v3080_v24 = vpack.c.bf16 %v457_v52, %v453_v51  ;;  %v3096_v46 = vpack.c.bf16 %v489_v38, %v485_v37  ;;  %v491_v25 = vld [vmem:[%s6637_s1 + $0xec8] sm:$0xff]  ;;  %v497_v51 = vld [vmem:[%s6637_s1 + $0xef8] sm:$0xff] }
  0xc9   :  { %1997 = vmatprep.mubr.f32.mxu1 %v1101_v63  ;;  %v461_v63 = vld [vmem:[%s6637_s1 + $0xdd8] sm:$0xff]  ;;  %v495_v48 = vld [vmem:[%s6637_s1 + $0xee8] sm:$0xff] }
  0xca   :  { %2551 = vmatpush1.bf16.msra.mxu0 %v2550_v2  ;;  %v3082_v2 = vpack.c.bf16 %v456_v59, %v452_v58  ;;  %v3084_v7 = vpack.c.bf16 %v465_v0, %v461_v63  ;;  %v3100_v58 = vpack.c.bf16 %v497_v51, %v493_v49  ;;  %v499_v59 = vld [vmem:[%s6637_s1 + $0xf08] sm:$0xff]  ;;  %v505_v63 = vld [vmem:[%s6637_s1 + $0xf38] sm:$0xff]  ;;  %v5046_v51 = vld [vmem:[%s6638_s0 + $0x10] sm:$0xff] }
  0xcb   :  { %3063 = vmatpush1.bf16.msra.mxu1 %v3062_v3  ;;  %2553 = vmatprep.subr.bf16.mxu0 %v2552_v4  ;;  %v2572_v3 = vpack.c.bf16 %v463_v62, %v459_v60  ;;  %v458_v4 = vld [vmem:[%s6637_s1 + $0xdc0] sm:$0xff]  ;;  %v503_v60 = vld [vmem:[%s6637_s1 + $0xf28] sm:$0xff]  ;;  %v501_v62 = vld [vmem:[%s6637_s1 + $0xf18] sm:$0xff] }
  0xcc   :  { %3065 = vmatprep.subr.bf16.mxu1 %v3064_v8  ;;  %v464_v8 = vld [vmem:[%s6637_s1 + $0xdf0] sm:$0xff]  ;;  %v2574_v13 = vpack.c.bf16 %v462_v5, %v458_v4  ;;  %v502_v4 = vld [vmem:[%s6637_s1 + $0xf20] sm:$0xff]  ;;  %v529_v37 = vld [vmem:[%s6637_s1 + $0xff8] sm:$0xff] }
  0xcd   :  { %v500_v5 = vld [vmem:[%s6637_s1 + $0xf10] sm:$0xff]  ;;  %v537_v49 = vld [vmem:[%s6637_s1 + $0x1038] sm:$0xff] }
  0xce   :  { %2555 = vmatpush1.bf16.msra.mxu0 %v2554_v14  ;;  %v3086_v14 = vpack.c.bf16 %v464_v8, %v460_v6  ;;  %v3104_v6 = vpack.c.bf16 %v505_v63, %v501_v62  ;;  %v507_v8 = vld [vmem:[%s6637_s1 + $0xf48] sm:$0xff]  ;;  %v5068_v62 = vrot.slane %v5046_v51, %v3727_v11  ;;  %v541_v63 = vld [vmem:[%s6637_s1 + $0x1058] sm:$0xff] }
  0xcf   :  { %3067 = vmatpush1.bf16.msra.mxu1 %v3066_v15  ;;  %2557 = vmatprep.subr.bf16.mxu0 %v2556_v16  ;;  %v2576_v15 = vpack.c.bf16 %v471_v9, %v467_v45  ;;  %v466_v16 = vld [vmem:[%s6637_s1 + $0xe00] sm:$0xff]  ;;  %v511_v45 = vld [vmem:[%s6637_s1 + $0xf68] sm:$0xff]  ;;  %v509_v9 = vld [vmem:[%s6637_s1 + $0xf58] sm:$0xff] }
  0xd0   :  { %3069 = vmatprep.subr.bf16.mxu1 %v3068_v20  ;;  %v472_v20 = vld [vmem:[%s6637_s1 + $0xe30] sm:$0xff]  ;;  %v2578_v27 = vpack.c.bf16 %v470_v17, %v466_v16  ;;  %v510_v16 = vld [vmem:[%s6637_s1 + $0xf60] sm:$0xff] }
  0xd1   :  { %v508_v17 = vld [vmem:[%s6637_s1 + $0xf50] sm:$0xff] }
  0xd2   :  { %2559 = vmatpush1.bf16.msra.mxu0 %v2558_v28  ;;  %v3090_v28 = vpack.c.bf16 %v472_v20, %v468_v18  ;;  %v3108_v18 = vpack.c.bf16 %v513_v10, %v509_v9  ;;  %v515_v20 = vld [vmem:[%s6637_s1 + $0xf88] sm:$0xff]  ;;  %v1117_v10 = vcombine.high %v5068_v62, %v5068_v62 }
  0xd3   :  { %3071 = vmatpush1.bf16.msra.mxu1 %v3070_v29  ;;  %2561 = vmatprep.subr.bf16.mxu0 %v2560_v30  ;;  %v2580_v29 = vpack.c.bf16 %v479_v22, %v475_v21  ;;  %v474_v30 = vld [vmem:[%s6637_s1 + $0xe40] sm:$0xff]  ;;  %v519_v21 = vld [vmem:[%s6637_s1 + $0xfa8] sm:$0xff]  ;;  %v517_v22 = vld [vmem:[%s6637_s1 + $0xf98] sm:$0xff] }
  0xd4   :  { %3073 = vmatprep.subr.bf16.mxu1 %v3072_v34  ;;  %v480_v34 = vld [vmem:[%s6637_s1 + $0xe70] sm:$0xff]  ;;  %v2582_v40 = vpack.c.bf16 %v478_v31, %v474_v30  ;;  %v518_v30 = vld [vmem:[%s6637_s1 + $0xfa0] sm:$0xff]  ;;  %v551_v9 = vld [vmem:[%s6637_s1 + $0x10a8] sm:$0xff] }
  0xd5   :  { %v516_v31 = vld [vmem:[%s6637_s1 + $0xf90] sm:$0xff] }
  0xd6   :  { %2563 = vmatpush1.bf16.msra.mxu0 %v2562_v41  ;;  %v3094_v41 = vpack.c.bf16 %v480_v34, %v476_v32  ;;  %v3112_v32 = vpack.c.bf16 %v521_v23, %v517_v22  ;;  %v523_v34 = vld [vmem:[%s6637_s1 + $0xfc8] sm:$0xff]  ;;  %v557_v23 = vld [vmem:[%s6637_s1 + $0x10d8] sm:$0xff] }
  0xd7   :  { %3075 = vmatpush1.bf16.msra.mxu1 %v3074_v42  ;;  %2565 = vmatprep.subr.bf16.mxu0 %v2564_v43  ;;  %v2584_v42 = vpack.c.bf16 %v487_v36, %v483_v35  ;;  %v482_v43 = vld [vmem:[%s6637_s1 + $0xe80] sm:$0xff]  ;;  %v527_v35 = vld [vmem:[%s6637_s1 + $0xfe8] sm:$0xff]  ;;  %v525_v36 = vld [vmem:[%s6637_s1 + $0xfd8] sm:$0xff] }
  0xd8   :  { %3077 = vmatprep.subr.bf16.mxu1 %v3076_v47  ;;  %v488_v47 = vld [vmem:[%s6637_s1 + $0xeb0] sm:$0xff]  ;;  %v2586_v52 = vpack.c.bf16 %v486_v44, %v482_v43  ;;  %v526_v43 = vld [vmem:[%s6637_s1 + $0xfe0] sm:$0xff]  ;;  %v559_v22 = vld [vmem:[%s6637_s1 + $0x10e8] sm:$0xff] }
  0xd9   :  { %v524_v44 = vld [vmem:[%s6637_s1 + $0xfd0] sm:$0xff] }
  0xda   :  { %2567 = vmatpush1.bf16.msra.mxu0 %v2566_v53  ;;  %v3098_v53 = vpack.c.bf16 %v488_v47, %v484_v39  ;;  %v3116_v39 = vpack.c.bf16 %v529_v37, %v525_v36  ;;  %v531_v47 = vld [vmem:[%s6637_s1 + $0x1008] sm:$0xff]  ;;  %v565_v37 = vld [vmem:[%s6637_s1 + $0x1118] sm:$0xff] }
  0xdb   :  { %3079 = vmatpush1.bf16.msra.mxu1 %v3078_v54  ;;  %2569 = vmatprep.subr.bf16.mxu0 %v2568_v55  ;;  %v2588_v54 = vpack.c.bf16 %v495_v48, %v491_v25  ;;  %v490_v55 = vld [vmem:[%s6637_s1 + $0xec0] sm:$0xff]  ;;  %v535_v25 = vld [vmem:[%s6637_s1 + $0x1028] sm:$0xff]  ;;  %v533_v48 = vld [vmem:[%s6637_s1 + $0x1018] sm:$0xff] }
  0xdc   :  { %3081 = vmatprep.subr.bf16.mxu1 %v3080_v24  ;;  %v496_v24 = vld [vmem:[%s6637_s1 + $0xef0] sm:$0xff]  ;;  %v2590_v0 = vpack.c.bf16 %v494_v56, %v490_v55  ;;  %v530_v55 = vld [vmem:[%s6637_s1 + $0x1000] sm:$0xff]  ;;  %v567_v36 = vld [vmem:[%s6637_s1 + $0x1128] sm:$0xff] }
  0xdd   :  { %v534_v56 = vld [vmem:[%s6637_s1 + $0x1020] sm:$0xff] }
  0xde   :  { %2571 = vmatpush1.bf16.msra.mxu0 %v2570_v1  ;;  %v3102_v1 = vpack.c.bf16 %v496_v24, %v492_v57  ;;  %v532_v57 = vld [vmem:[%s6637_s1 + $0x1010] sm:$0xff] }
  0xdf   :  { %3083 = vmatpush1.bf16.msra.mxu1 %v3082_v2  ;;  %2573 = vmatprep.subr.bf16.mxu0 %v2572_v3  ;;  %v2592_v2 = vpack.c.bf16 %v503_v60, %v499_v59  ;;  %v498_v3 = vld [vmem:[%s6637_s1 + $0xf00] sm:$0xff]  ;;  %v536_v24 = vld [vmem:[%s6637_s1 + $0x1030] sm:$0xff]  ;;  %v539_v59 = vld [vmem:[%s6637_s1 + $0x1048] sm:$0xff] }
  0xe0   :  { %3085 = vmatprep.subr.bf16.mxu1 %v3084_v7  ;;  %v504_v7 = vld [vmem:[%s6637_s1 + $0xf30] sm:$0xff]  ;;  %v2594_v12 = vpack.c.bf16 %v502_v4, %v498_v3  ;;  %v543_v60 = vld [vmem:[%s6637_s1 + $0x1068] sm:$0xff]  ;;  %v538_v4 = vld [vmem:[%s6637_s1 + $0x1040] sm:$0xff] }
  0xe1   :  { %v2612_v3 = vpack.c.bf16 %v543_v60, %v539_v59  ;;  %v576_v59 = vld [vmem:[%s6637_s1 + $0x1170] sm:$0xff]  ;;  %v579_v60 = vld [vmem:[%s6637_s1 + $0x1188] sm:$0xff] }
  0xe2   :  { %2575 = vmatpush1.bf16.msra.mxu0 %v2574_v13  ;;  %v3106_v13 = vpack.c.bf16 %v504_v7, %v500_v5  ;;  %v542_v5 = vld [vmem:[%s6637_s1 + $0x1060] sm:$0xff] }
  0xe3   :  { %3087 = vmatpush1.bf16.msra.mxu1 %v3086_v14  ;;  %2577 = vmatprep.subr.bf16.mxu0 %v2576_v15  ;;  %v2596_v14 = vpack.c.bf16 %v511_v45, %v507_v8  ;;  %v506_v15 = vld [vmem:[%s6637_s1 + $0xf40] sm:$0xff]  ;;  %v544_v8 = vld [vmem:[%s6637_s1 + $0x1070] sm:$0xff]  ;;  %v547_v45 = vld [vmem:[%s6637_s1 + $0x1088] sm:$0xff] }
  0xe4   :  { %3089 = vmatprep.subr.bf16.mxu1 %v3088_v19  ;;  %v512_v19 = vld [vmem:[%s6637_s1 + $0xf70] sm:$0xff]  ;;  %v2598_v26 = vpack.c.bf16 %v510_v16, %v506_v15  ;;  %v2616_v16 = vpack.c.bf16 %v551_v9, %v547_v45  ;;  %v587_v9 = vld [vmem:[%s6637_s1 + $0x11c8] sm:$0xff] }
  0xe5   :  { %v584_v45 = vld [vmem:[%s6637_s1 + $0x11b0] sm:$0xff] }
  0xe6   :  { %2579 = vmatpush1.bf16.msra.mxu0 %v2578_v27  ;;  %v3110_v27 = vpack.c.bf16 %v512_v19, %v508_v17  ;;  %v546_v17 = vld [vmem:[%s6637_s1 + $0x1080] sm:$0xff]  ;;  %v548_v19 = vld [vmem:[%s6637_s1 + $0x1090] sm:$0xff] }
  0xe7   :  { %3091 = vmatpush1.bf16.msra.mxu1 %v3090_v28  ;;  %2581 = vmatprep.subr.bf16.mxu0 %v2580_v29  ;;  %v2600_v28 = vpack.c.bf16 %v519_v21, %v515_v20  ;;  %v514_v29 = vld [vmem:[%s6637_s1 + $0xf80] sm:$0xff]  ;;  %v555_v21 = vld [vmem:[%s6637_s1 + $0x10c8] sm:$0xff] }
  0xe8   :  { %3093 = vmatprep.subr.bf16.mxu1 %v3092_v33  ;;  %v520_v33 = vld [vmem:[%s6637_s1 + $0xfb0] sm:$0xff]  ;;  %v2602_v38 = vpack.c.bf16 %v518_v30, %v514_v29  ;;  %v2620_v29 = vpack.c.bf16 %v559_v22, %v555_v21  ;;  %v554_v30 = vld [vmem:[%s6637_s1 + $0x10c0] sm:$0xff]  ;;  %v595_v21 = vld [vmem:[%s6637_s1 + $0x1208] sm:$0xff] }
  0xe9   :  { %v599_v22 = vld [vmem:[%s6637_s1 + $0x1228] sm:$0xff] }
  0xea   :  { %2583 = vmatpush1.bf16.msra.mxu0 %v2582_v40  ;;  %v3114_v40 = vpack.c.bf16 %v520_v33, %v516_v31  ;;  %v558_v31 = vld [vmem:[%s6637_s1 + $0x10e0] sm:$0xff] }
  0xeb   :  { %3095 = vmatpush1.bf16.msra.mxu1 %v3094_v41  ;;  %2585 = vmatprep.subr.bf16.mxu0 %v2584_v42  ;;  %v2604_v41 = vpack.c.bf16 %v527_v35, %v523_v34  ;;  %v522_v42 = vld [vmem:[%s6637_s1 + $0xfc0] sm:$0xff]  ;;  %v560_v34 = vld [vmem:[%s6637_s1 + $0x10f0] sm:$0xff]  ;;  %v563_v35 = vld [vmem:[%s6637_s1 + $0x1108] sm:$0xff] }
  0xec   :  { %3097 = vmatprep.subr.bf16.mxu1 %v3096_v46  ;;  %v528_v46 = vld [vmem:[%s6637_s1 + $0xff0] sm:$0xff] }
  0xee   :  { %2587 = vmatpush1.bf16.msra.mxu0 %v2586_v52  ;;  %v2606_v52 = vpack.c.bf16 %v526_v43, %v522_v42  ;;  %v2624_v42 = vpack.c.bf16 %v567_v36, %v563_v35  ;;  %v562_v43 = vld [vmem:[%s6637_s1 + $0x1100] sm:$0xff]  ;;  %v603_v35 = vld [vmem:[%s6637_s1 + $0x1248] sm:$0xff] }
  0xef   :  { %3099 = vmatpush1.bf16.msra.mxu1 %v3098_v53  ;;  %2589 = vmatprep.subr.bf16.mxu0 %v2588_v54  ;;  %v3118_v53 = vpack.c.bf16 %v528_v46, %v524_v44  ;;  %v2608_v54 = vpack.c.bf16 %v535_v25, %v531_v47  ;;  %v566_v44 = vld [vmem:[%s6637_s1 + $0x1120] sm:$0xff]  ;;  %v568_v47 = vld [vmem:[%s6637_s1 + $0x1130] sm:$0xff]  ;;  %v571_v25 = vld [vmem:[%s6637_s1 + $0x1148] sm:$0xff] }
  0xf0   :  { %3101 = vmatprep.subr.bf16.mxu1 %v3100_v58  ;;  %v3120_v58 = vpack.c.bf16 %v537_v49, %v533_v48  ;;  %v575_v48 = vld [vmem:[%s6637_s1 + $0x1168] sm:$0xff]  ;;  %v573_v49 = vld [vmem:[%s6637_s1 + $0x1158] sm:$0xff] }
  0xf1   :  { %v607_v36 = vld [vmem:[%s6637_s1 + $0x1268] sm:$0xff] }
  0xf2   :  { %2591 = vmatpush1.bf16.msra.mxu0 %v2590_v0  ;;  %v545_v0 = vld [vmem:[%s6637_s1 + $0x1078] sm:$0xff] }
  0xf3   :  { %3103 = vmatpush1.bf16.msra.mxu1 %v3102_v1  ;;  %2593 = vmatprep.subr.bf16.mxu0 %v2592_v2  ;;  %v2610_v1 = vpack.c.bf16 %v534_v56, %v530_v55  ;;  %v3122_v2 = vpack.c.bf16 %v536_v24, %v532_v57  ;;  %v3124_v7 = vpack.c.bf16 %v545_v0, %v541_v63  ;;  %v570_v56 = vld [vmem:[%s6637_s1 + $0x1140] sm:$0xff]  ;;  %v583_v63 = vld [vmem:[%s6637_s1 + $0x11a8] sm:$0xff]  ;;  %v581_v0 = vld [vmem:[%s6637_s1 + $0x1198] sm:$0xff] }
  0xf4   :  { %3105 = vmatprep.subr.bf16.mxu1 %v3104_v6  ;;  %v540_v6 = vld [vmem:[%s6637_s1 + $0x1050] sm:$0xff]  ;;  %v2628_v55 = vpack.c.bf16 %v575_v48, %v571_v25  ;;  %v574_v57 = vld [vmem:[%s6637_s1 + $0x1160] sm:$0xff]  ;;  %v611_v25 = vld [vmem:[%s6637_s1 + $0x1288] sm:$0xff] }
  0xf5   :  { %v3126_v15 = vpack.c.bf16 %v544_v8, %v540_v6  ;;  %v582_v6 = vld [vmem:[%s6637_s1 + $0x11a0] sm:$0xff]  ;;  %v615_v48 = vld [vmem:[%s6637_s1 + $0x12a8] sm:$0xff] }
  0xf6   :  { %2595 = vmatpush1.bf16.msra.mxu0 %v2594_v12  ;;  %v549_v12 = vld [vmem:[%s6637_s1 + $0x1098] sm:$0xff] }
  0xf7   :  { %3107 = vmatpush1.bf16.msra.mxu1 %v3106_v13  ;;  %2597 = vmatprep.subr.bf16.mxu0 %v2596_v14  ;;  %v553_v13 = vld [vmem:[%s6637_s1 + $0x10b8] sm:$0xff]  ;;  %v2614_v14 = vpack.c.bf16 %v542_v5, %v538_v4  ;;  %v2632_v4 = vpack.c.bf16 %v583_v63, %v579_v60  ;;  %v578_v5 = vld [vmem:[%s6637_s1 + $0x1180] sm:$0xff]  ;;  %v619_v60 = vld [vmem:[%s6637_s1 + $0x12c8] sm:$0xff] }
  0xf8   :  { %3109 = vmatprep.subr.bf16.mxu1 %v3108_v18  ;;  %v550_v18 = vld [vmem:[%s6637_s1 + $0x10a0] sm:$0xff]  ;;  %v3128_v20 = vpack.c.bf16 %v553_v13, %v549_v12  ;;  %v589_v12 = vld [vmem:[%s6637_s1 + $0x11d8] sm:$0xff]  ;;  %v623_v63 = vld [vmem:[%s6637_s1 + $0x12e8] sm:$0xff] }
  0xf9   :  { %v593_v13 = vld [vmem:[%s6637_s1 + $0x11f8] sm:$0xff] }
  0xfa   :  { %2599 = vmatpush1.bf16.msra.mxu0 %v2598_v26  ;;  %v561_v26 = vld [vmem:[%s6637_s1 + $0x10f8] sm:$0xff] }
  0xfb   :  { %3111 = vmatpush1.bf16.msra.mxu1 %v3110_v27  ;;  %2601 = vmatprep.subr.bf16.mxu0 %v2600_v28  ;;  %v2618_v27 = vpack.c.bf16 %v550_v18, %v546_v17  ;;  %v3132_v33 = vpack.c.bf16 %v561_v26, %v557_v23  ;;  %v586_v17 = vld [vmem:[%s6637_s1 + $0x11c0] sm:$0xff]  ;;  %v597_v23 = vld [vmem:[%s6637_s1 + $0x1218] sm:$0xff] }
  0xfc   :  { %3113 = vmatprep.subr.bf16.mxu1 %v3112_v32  ;;  %v556_v32 = vld [vmem:[%s6637_s1 + $0x10d0] sm:$0xff]  ;;  %v590_v18 = vld [vmem:[%s6637_s1 + $0x11e0] sm:$0xff]  ;;  %v601_v26 = vld [vmem:[%s6637_s1 + $0x1238] sm:$0xff] }
  0xfe   :  { %2603 = vmatpush1.bf16.msra.mxu0 %v2602_v38  ;;  %v569_v38 = vld [vmem:[%s6637_s1 + $0x1138] sm:$0xff] }
  0xff   :  { %3115 = vmatpush1.bf16.msra.mxu1 %v3114_v40  ;;  %2605 = vmatprep.subr.bf16.mxu0 %v2604_v41  ;;  %v2622_v40 = vpack.c.bf16 %v558_v31, %v554_v30  ;;  %v3134_v41 = vpack.c.bf16 %v560_v34, %v556_v32  ;;  %v3136_v46 = vpack.c.bf16 %v569_v38, %v565_v37  ;;  %v594_v30 = vld [vmem:[%s6637_s1 + $0x1200] sm:$0xff]  ;;  %v596_v32 = vld [vmem:[%s6637_s1 + $0x1210] sm:$0xff]  ;;  %v605_v37 = vld [vmem:[%s6637_s1 + $0x1258] sm:$0xff] }
 0x100   :  { %3117 = vmatprep.subr.bf16.mxu1 %v3116_v39  ;;  %v564_v39 = vld [vmem:[%s6637_s1 + $0x1110] sm:$0xff]  ;;  %v598_v31 = vld [vmem:[%s6637_s1 + $0x1220] sm:$0xff]  ;;  %v609_v38 = vld [vmem:[%s6637_s1 + $0x1278] sm:$0xff] }
 0x101   :  { %v600_v34 = vld [vmem:[%s6637_s1 + $0x1230] sm:$0xff] }
 0x102   :  { %2607 = vmatpush1.bf16.msra.mxu0 %v2606_v52  ;;  %v577_v52 = vld [vmem:[%s6637_s1 + $0x1178] sm:$0xff] }
 0x103   :  { %3119 = vmatpush1.bf16.msra.mxu1 %v3118_v53  ;;  %2609 = vmatprep.subr.bf16.mxu0 %v2608_v54  ;;  %v2626_v53 = vpack.c.bf16 %v566_v44, %v562_v43  ;;  %v3138_v54 = vpack.c.bf16 %v568_v47, %v564_v39  ;;  %v3140_v24 = vpack.c.bf16 %v577_v52, %v573_v49  ;;  %v602_v43 = vld [vmem:[%s6637_s1 + $0x1240] sm:$0xff]  ;;  %v604_v39 = vld [vmem:[%s6637_s1 + $0x1250] sm:$0xff]  ;;  %v613_v49 = vld [vmem:[%s6637_s1 + $0x1298] sm:$0xff] }
 0x104   :  { %3121 = vmatprep.subr.bf16.mxu1 %v3120_v58  ;;  %v572_v58 = vld [vmem:[%s6637_s1 + $0x1150] sm:$0xff]  ;;  %v606_v44 = vld [vmem:[%s6637_s1 + $0x1260] sm:$0xff]  ;;  %v617_v52 = vld [vmem:[%s6637_s1 + $0x12b8] sm:$0xff] }
 0x105   :  { %1430 = vmatmul.mubr.f32.vlgmr.msra.gmra.mrb[0].mxu0 %v4671_v50  ;;  %v608_v47 = vld [vmem:[%s6637_s1 + $0x1270] sm:$0xff] }
 0x106   :  { %2611 = vmatpush1.bf16.msra.mxu0 %v2610_v1  ;;  %1998 = vmatmul.mubr.f32.vlgmr.msra.gmra.mrb[0].mxu1 %v4671_v50  ;;  %v552_v50 = vld [vmem:[%s6637_s1 + $0x10b0] sm:$0xff]  ;;  %v585_v1 = vld [vmem:[%s6637_s1 + $0x11b8] sm:$0xff] }
 0x107   :  { %3123 = vmatpush1.bf16.msra.mxu1 %v3122_v2  ;;  %2613 = vmatprep.subr.bf16.mxu0 %v2612_v3  ;;  %v3130_v28 = vpack.c.bf16 %v552_v50, %v548_v19  ;;  %v2630_v2 = vpack.c.bf16 %v574_v57, %v570_v56  ;;  %v3142_v3 = vpack.c.bf16 %v576_v59, %v572_v58  ;;  %v588_v19 = vld [vmem:[%s6637_s1 + $0x11d0] sm:$0xff]  ;;  %v610_v56 = vld [vmem:[%s6637_s1 + $0x1280] sm:$0xff] }
 0x108   :  { %3125 = vmatprep.subr.bf16.mxu1 %v3124_v7  ;;  %1500 = vmatprep.mubr.f32.mxu0 %v1117_v10  ;;  %v580_v7 = vld [vmem:[%s6637_s1 + $0x1190] sm:$0xff]  ;;  %v3144_v8 = vpack.c.bf16 %v585_v1, %v581_v0  ;;  %v614_v57 = vld [vmem:[%s6637_s1 + $0x12a0] sm:$0xff]  ;;  %v621_v0 = vld [vmem:[%s6637_s1 + $0x12d8] sm:$0xff] }
 0x109   :  { %2068 = vmatprep.mubr.f32.mxu1 %v1117_v10  ;;  %v591_v10 = vld [vmem:[%s6637_s1 + $0x11e8] sm:$0xff]  ;;  %v592_v50 = vld [vmem:[%s6637_s1 + $0x11f0] sm:$0xff]  ;;  %v625_v1 = vld [vmem:[%s6637_s1 + $0x12f8] sm:$0xff] }
 0x10a   :  { %2615 = vmatpush1.bf16.msra.mxu0 %v2614_v14  ;;  %v2634_v14 = vpack.c.bf16 %v582_v6, %v578_v5  ;;  %v612_v58 = vld [vmem:[%s6637_s1 + $0x1290] sm:$0xff]  ;;  %v618_v5 = vld [vmem:[%s6637_s1 + $0x12c0] sm:$0xff] }
 0x10b   :  { %3127 = vmatpush1.bf16.msra.mxu1 %v3126_v15  ;;  %2617 = vmatprep.subr.bf16.mxu0 %v2616_v16  ;;  %v3146_v15 = vpack.c.bf16 %v584_v45, %v580_v7  ;;  %v2636_v16 = vpack.c.bf16 %v591_v10, %v587_v9  ;;  %v616_v59 = vld [vmem:[%s6637_s1 + $0x12b0] sm:$0xff]  ;;  %v622_v6 = vld [vmem:[%s6637_s1 + $0x12e0] sm:$0xff]  ;;  %v627_v9 = vld [vmem:[%s6637_s1 + $0x1308] sm:$0xff] }
 0x10c   :  { %3129 = vmatprep.subr.bf16.mxu1 %v3128_v20  ;;  %v3148_v20 = vpack.c.bf16 %v593_v13, %v589_v12  ;;  %v620_v7 = vld [vmem:[%s6637_s1 + $0x12d0] sm:$0xff]  ;;  %v631_v10 = vld [vmem:[%s6637_s1 + $0x1328] sm:$0xff]  ;;  %v629_v12 = vld [vmem:[%s6637_s1 + $0x1318] sm:$0xff] }
 0x10d   :  { %v624_v45 = vld [vmem:[%s6637_s1 + $0x12f0] sm:$0xff]  ;;  %v633_v13 = vld [vmem:[%s6637_s1 + $0x1338] sm:$0xff] }
 0x10e   :  { %2619 = vmatpush1.bf16.msra.mxu0 %v2618_v27  ;;  %v2638_v27 = vpack.c.bf16 %v590_v18, %v586_v17  ;;  %v626_v17 = vld [vmem:[%s6637_s1 + $0x1300] sm:$0xff] }
 0x10f   :  { %3131 = vmatpush1.bf16.msra.mxu1 %v3130_v28  ;;  %2621 = vmatprep.subr.bf16.mxu0 %v2620_v29  ;;  %v3150_v28 = vpack.c.bf16 %v592_v50, %v588_v19  ;;  %v2640_v29 = vpack.c.bf16 %v599_v22, %v595_v21  ;;  %v630_v18 = vld [vmem:[%s6637_s1 + $0x1320] sm:$0xff]  ;;  %v628_v19 = vld [vmem:[%s6637_s1 + $0x1310] sm:$0xff]  ;;  %v635_v21 = vld [vmem:[%s6637_s1 + $0x1348] sm:$0xff] }
 0x110   :  { %3133 = vmatprep.subr.bf16.mxu1 %v3132_v33  ;;  %v3152_v33 = vpack.c.bf16 %v601_v26, %v597_v23  ;;  %v632_v50 = vld [vmem:[%s6637_s1 + $0x1330] sm:$0xff]  ;;  %v639_v22 = vld [vmem:[%s6637_s1 + $0x1368] sm:$0xff]  ;;  %v637_v23 = vld [vmem:[%s6637_s1 + $0x1358] sm:$0xff] }
 0x111   :  { %v641_v26 = vld [vmem:[%s6637_s1 + $0x1378] sm:$0xff] }
 0x112   :  { %2623 = vmatpush1.bf16.msra.mxu0 %v2622_v40  ;;  %v2642_v40 = vpack.c.bf16 %v598_v31, %v594_v30  ;;  %v634_v30 = vld [vmem:[%s6637_s1 + $0x1340] sm:$0xff] }
 0x113   :  { %3135 = vmatpush1.bf16.msra.mxu1 %v3134_v41  ;;  %2625 = vmatprep.subr.bf16.mxu0 %v2624_v42  ;;  %v3154_v41 = vpack.c.bf16 %v600_v34, %v596_v32  ;;  %v2644_v42 = vpack.c.bf16 %v607_v36, %v603_v35  ;;  %v638_v31 = vld [vmem:[%s6637_s1 + $0x1360] sm:$0xff]  ;;  %v636_v32 = vld [vmem:[%s6637_s1 + $0x1350] sm:$0xff]  ;;  %v643_v35 = vld [vmem:[%s6637_s1 + $0x1388] sm:$0xff] }
 0x114   :  { %3137 = vmatprep.subr.bf16.mxu1 %v3136_v46  ;;  %v3156_v46 = vpack.c.bf16 %v609_v38, %v605_v37  ;;  %v640_v34 = vld [vmem:[%s6637_s1 + $0x1370] sm:$0xff]  ;;  %v647_v36 = vld [vmem:[%s6637_s1 + $0x13a8] sm:$0xff]  ;;  %v645_v37 = vld [vmem:[%s6637_s1 + $0x1398] sm:$0xff] }
 0x115   :  { %v649_v38 = vld [vmem:[%s6637_s1 + $0x13b8] sm:$0xff] }
 0x116   :  { %2627 = vmatpush1.bf16.msra.mxu0 %v2626_v53  ;;  %v2646_v53 = vpack.c.bf16 %v606_v44, %v602_v43  ;;  %v642_v43 = vld [vmem:[%s6637_s1 + $0x1380] sm:$0xff] }
 0x117   :  { %3139 = vmatpush1.bf16.msra.mxu1 %v3138_v54  ;;  %2629 = vmatprep.subr.bf16.mxu0 %v2628_v55  ;;  %v3158_v54 = vpack.c.bf16 %v608_v47, %v604_v39  ;;  %v2648_v55 = vpack.c.bf16 %v615_v48, %v611_v25  ;;  %v646_v44 = vld [vmem:[%s6637_s1 + $0x13a0] sm:$0xff]  ;;  %v644_v39 = vld [vmem:[%s6637_s1 + $0x1390] sm:$0xff]  ;;  %v651_v25 = vld [vmem:[%s6637_s1 + $0x13c8] sm:$0xff] }
 0x118   :  { %3141 = vmatprep.subr.bf16.mxu1 %v3140_v24  ;;  %v3160_v24 = vpack.c.bf16 %v617_v52, %v613_v49  ;;  %v648_v47 = vld [vmem:[%s6637_s1 + $0x13b0] sm:$0xff]  ;;  %v655_v48 = vld [vmem:[%s6637_s1 + $0x13e8] sm:$0xff]  ;;  %v653_v49 = vld [vmem:[%s6637_s1 + $0x13d8] sm:$0xff] }
 0x119   :  { %v657_v52 = vld [vmem:[%s6637_s1 + $0x13f8] sm:$0xff] }
 0x11a   :  { %2631 = vmatpush1.bf16.msra.mxu0 %v2630_v2  ;;  %v2650_v2 = vpack.c.bf16 %v614_v57, %v610_v56  ;;  %v650_v56 = vld [vmem:[%s6637_s1 + $0x13c0] sm:$0xff] }
 0x11b   :  { %3143 = vmatpush1.bf16.msra.mxu1 %v3142_v3  ;;  %2633 = vmatprep.subr.bf16.mxu0 %v2632_v4  ;;  %v3162_v3 = vpack.c.bf16 %v616_v59, %v612_v58  ;;  %v2652_v4 = vpack.c.bf16 %v623_v63, %v619_v60  ;;  %v654_v57 = vld [vmem:[%s6637_s1 + $0x13e0] sm:$0xff]  ;;  %v652_v58 = vld [vmem:[%s6637_s1 + $0x13d0] sm:$0xff]  ;;  %v659_v60 = vld [vmem:[%s6637_s1 + $0x1408] sm:$0xff] }
 0x11c   :  { %3145 = vmatprep.subr.bf16.mxu1 %v3144_v8  ;;  %v3164_v8 = vpack.c.bf16 %v625_v1, %v621_v0  ;;  %v656_v59 = vld [vmem:[%s6637_s1 + $0x13f0] sm:$0xff]  ;;  %v663_v63 = vld [vmem:[%s6637_s1 + $0x1428] sm:$0xff]  ;;  %v1102_v0 = vcombine.high %v5046_v51, %v5046_v51  ;;  %v661_v1 = vld [vmem:[%s6637_s1 + $0x1418] sm:$0xff] }
 0x11d   :  { %v662_v51 = vld [vmem:[%s6637_s1 + $0x1420] sm:$0xff] }
 0x11e   :  { %2635 = vmatpush1.bf16.msra.mxu0 %v2634_v14  ;;  %v2654_v14 = vpack.c.bf16 %v622_v6, %v618_v5  ;;  %v2672_v5 = vpack.c.bf16 %v663_v63, %v659_v60  ;;  %v658_v6 = vld [vmem:[%s6637_s1 + $0x1400] sm:$0xff]  ;;  %v696_v60 = vld [vmem:[%s6637_s1 + $0x1530] sm:$0xff]  ;;  %v699_v63 = vld [vmem:[%s6637_s1 + $0x1548] sm:$0xff] }
 0x11f   :  { %3147 = vmatpush1.bf16.msra.mxu1 %v3146_v15  ;;  %2637 = vmatprep.subr.bf16.mxu0 %v2636_v16  ;;  %v3166_v15 = vpack.c.bf16 %v624_v45, %v620_v7  ;;  %v2656_v16 = vpack.c.bf16 %v631_v10, %v627_v9  ;;  %v660_v7 = vld [vmem:[%s6637_s1 + $0x1410] sm:$0xff]  ;;  %v667_v9 = vld [vmem:[%s6637_s1 + $0x1448] sm:$0xff] }
 0x120   :  { %3149 = vmatprep.subr.bf16.mxu1 %v3148_v20  ;;  %v3168_v20 = vpack.c.bf16 %v633_v13, %v629_v12  ;;  %v664_v45 = vld [vmem:[%s6637_s1 + $0x1430] sm:$0xff]  ;;  %v671_v10 = vld [vmem:[%s6637_s1 + $0x1468] sm:$0xff]  ;;  %v5461_v12 = vrot.slane %v1102_v0, %v3727_v11  ;;  %v669_v13 = vld [vmem:[%s6637_s1 + $0x1458] sm:$0xff] }
 0x121   :  { %v703_v0 = vld [vmem:[%s6637_s1 + $0x1568] sm:$0xff] }
 0x122   :  { %2639 = vmatpush1.bf16.msra.mxu0 %v2638_v27  ;;  %v2658_v27 = vpack.c.bf16 %v630_v18, %v626_v17  ;;  %v2676_v17 = vpack.c.bf16 %v671_v10, %v667_v9  ;;  %v666_v18 = vld [vmem:[%s6637_s1 + $0x1440] sm:$0xff]  ;;  %v707_v9 = vld [vmem:[%s6637_s1 + $0x1588] sm:$0xff] }
 0x123   :  { %3151 = vmatpush1.bf16.msra.mxu1 %v3150_v28  ;;  %2641 = vmatprep.subr.bf16.mxu0 %v2640_v29  ;;  %v3170_v28 = vpack.c.bf16 %v632_v50, %v628_v19  ;;  %v2660_v29 = vpack.c.bf16 %v639_v22, %v635_v21  ;;  %v670_v19 = vld [vmem:[%s6637_s1 + $0x1460] sm:$0xff]  ;;  %v672_v21 = vld [vmem:[%s6637_s1 + $0x1470] sm:$0xff]  ;;  %v675_v22 = vld [vmem:[%s6637_s1 + $0x1488] sm:$0xff] }
 0x124   :  { %3153 = vmatprep.subr.bf16.mxu1 %v3152_v33  ;;  %v3172_v33 = vpack.c.bf16 %v641_v26, %v637_v23  ;;  %v679_v23 = vld [vmem:[%s6637_s1 + $0x14a8] sm:$0xff]  ;;  %v1118_v26 = vcombine.high %v5461_v12, %v5461_v12 }
 0x125   :  { %v711_v10 = vld [vmem:[%s6637_s1 + $0x15a8] sm:$0xff] }
 0x126   :  { %2643 = vmatpush1.bf16.msra.mxu0 %v2642_v40  ;;  %v2662_v40 = vpack.c.bf16 %v638_v31, %v634_v30  ;;  %v2680_v31 = vpack.c.bf16 %v679_v23, %v675_v22  ;;  %v715_v22 = vld [vmem:[%s6637_s1 + $0x15c8] sm:$0xff] }
 0x127   :  { %3155 = vmatpush1.bf16.msra.mxu1 %v3154_v41  ;;  %2645 = vmatprep.subr.bf16.mxu0 %v2644_v42  ;;  %v3174_v41 = vpack.c.bf16 %v640_v34, %v636_v32  ;;  %v2664_v42 = vpack.c.bf16 %v647_v36, %v643_v35  ;;  %v674_v32 = vld [vmem:[%s6637_s1 + $0x1480] sm:$0xff]  ;;  %v676_v34 = vld [vmem:[%s6637_s1 + $0x1490] sm:$0xff]  ;;  %v683_v36 = vld [vmem:[%s6637_s1 + $0x14c8] sm:$0xff] }
 0x128   :  { %3157 = vmatprep.subr.bf16.mxu1 %v3156_v46  ;;  %v3176_v46 = vpack.c.bf16 %v649_v38, %v645_v37  ;;  %v687_v37 = vld [vmem:[%s6637_s1 + $0x14e8] sm:$0xff]  ;;  %v685_v38 = vld [vmem:[%s6637_s1 + $0x14d8] sm:$0xff] }
 0x129   :  { %v719_v23 = vld [vmem:[%s6637_s1 + $0x15e8] sm:$0xff] }
 0x12a   :  { %2647 = vmatpush1.bf16.msra.mxu0 %v2646_v53  ;;  %v2666_v53 = vpack.c.bf16 %v646_v44, %v642_v43  ;;  %v2684_v43 = vpack.c.bf16 %v687_v37, %v683_v36  ;;  %v682_v44 = vld [vmem:[%s6637_s1 + $0x14c0] sm:$0xff]  ;;  %v727_v36 = vld [vmem:[%s6637_s1 + $0x1628] sm:$0xff]  ;;  %v725_v37 = vld [vmem:[%s6637_s1 + $0x1618] sm:$0xff] }
 0x12b   :  { %3159 = vmatpush1.bf16.msra.mxu1 %v3158_v54  ;;  %2649 = vmatprep.subr.bf16.mxu0 %v2648_v55  ;;  %v3178_v54 = vpack.c.bf16 %v648_v47, %v644_v39  ;;  %v2668_v55 = vpack.c.bf16 %v655_v48, %v651_v25  ;;  %v686_v39 = vld [vmem:[%s6637_s1 + $0x14e0] sm:$0xff]  ;;  %v688_v25 = vld [vmem:[%s6637_s1 + $0x14f0] sm:$0xff]  ;;  %v691_v48 = vld [vmem:[%s6637_s1 + $0x1508] sm:$0xff] }
 0x12c   :  { %3161 = vmatprep.subr.bf16.mxu1 %v3160_v24  ;;  %v3180_v24 = vpack.c.bf16 %v657_v52, %v653_v49  ;;  %v695_v49 = vld [vmem:[%s6637_s1 + $0x1528] sm:$0xff]  ;;  %v693_v52 = vld [vmem:[%s6637_s1 + $0x1518] sm:$0xff] }
 0x12e   :  { %2651 = vmatpush1.bf16.msra.mxu0 %v2650_v2  ;;  %v665_v2 = vld [vmem:[%s6637_s1 + $0x1438] sm:$0xff] }
 0x12f   :  { %3163 = vmatpush1.bf16.msra.mxu1 %v3162_v3  ;;  %2653 = vmatprep.subr.bf16.mxu0 %v2652_v4  ;;  %v2670_v3 = vpack.c.bf16 %v654_v57, %v650_v56  ;;  %v3182_v4 = vpack.c.bf16 %v656_v59, %v652_v58  ;;  %v2688_v56 = vpack.c.bf16 %v695_v49, %v691_v48  ;;  %v690_v57 = vld [vmem:[%s6637_s1 + $0x1500] sm:$0xff]  ;;  %v735_v48 = vld [vmem:[%s6637_s1 + $0x1668] sm:$0xff]  ;;  %v733_v49 = vld [vmem:[%s6637_s1 + $0x1658] sm:$0xff] }
 0x130   :  { %3165 = vmatprep.subr.bf16.mxu1 %v3164_v8  ;;  %v3184_v8 = vpack.c.bf16 %v665_v2, %v661_v1  ;;  %v694_v58 = vld [vmem:[%s6637_s1 + $0x1520] sm:$0xff]  ;;  %v701_v1 = vld [vmem:[%s6637_s1 + $0x1558] sm:$0xff] }
 0x131   :  { %v705_v2 = vld [vmem:[%s6637_s1 + $0x1578] sm:$0xff] }
 0x132   :  { %2655 = vmatpush1.bf16.msra.mxu0 %v2654_v14  ;;  %v673_v14 = vld [vmem:[%s6637_s1 + $0x1478] sm:$0xff] }
 0x133   :  { %3167 = vmatpush1.bf16.msra.mxu1 %v3166_v15  ;;  %2657 = vmatprep.subr.bf16.mxu0 %v2656_v16  ;;  %v2674_v15 = vpack.c.bf16 %v662_v51, %v658_v6  ;;  %v3186_v16 = vpack.c.bf16 %v664_v45, %v660_v7  ;;  %v3188_v50 = vpack.c.bf16 %v673_v14, %v669_v13  ;;  %v698_v6 = vld [vmem:[%s6637_s1 + $0x1540] sm:$0xff]  ;;  %v700_v7 = vld [vmem:[%s6637_s1 + $0x1550] sm:$0xff]  ;;  %v709_v13 = vld [vmem:[%s6637_s1 + $0x1598] sm:$0xff] }
 0x134   :  { %3169 = vmatprep.subr.bf16.mxu1 %v3168_v20  ;;  %v668_v20 = vld [vmem:[%s6637_s1 + $0x1450] sm:$0xff]  ;;  %v702_v51 = vld [vmem:[%s6637_s1 + $0x1560] sm:$0xff]  ;;  %v713_v14 = vld [vmem:[%s6637_s1 + $0x15b8] sm:$0xff] }
 0x135   :  { %v3190_v30 = vpack.c.bf16 %v672_v21, %v668_v20  ;;  %v704_v45 = vld [vmem:[%s6637_s1 + $0x1570] sm:$0xff] }
 0x136   :  { %2659 = vmatpush1.bf16.msra.mxu0 %v2658_v27  ;;  %v677_v27 = vld [vmem:[%s6637_s1 + $0x1498] sm:$0xff]  ;;  %v708_v20 = vld [vmem:[%s6637_s1 + $0x1590] sm:$0xff] }
 0x137   :  { %3171 = vmatpush1.bf16.msra.mxu1 %v3170_v28  ;;  %2661 = vmatprep.subr.bf16.mxu0 %v2660_v29  ;;  %v681_v28 = vld [vmem:[%s6637_s1 + $0x14b8] sm:$0xff]  ;;  %v2678_v29 = vpack.c.bf16 %v670_v19, %v666_v18  ;;  %v706_v18 = vld [vmem:[%s6637_s1 + $0x1580] sm:$0xff]  ;;  %v712_v21 = vld [vmem:[%s6637_s1 + $0x15b0] sm:$0xff] }
 0x138   :  { %3173 = vmatprep.subr.bf16.mxu1 %v3172_v33  ;;  %v678_v33 = vld [vmem:[%s6637_s1 + $0x14a0] sm:$0xff]  ;;  %v3192_v35 = vpack.c.bf16 %v681_v28, %v677_v27  ;;  %v721_v27 = vld [vmem:[%s6637_s1 + $0x15f8] sm:$0xff] }
 0x139   :  { %v710_v19 = vld [vmem:[%s6637_s1 + $0x15a0] sm:$0xff] }
 0x13a   :  { %2663 = vmatpush1.bf16.msra.mxu0 %v2662_v40  ;;  %v689_v40 = vld [vmem:[%s6637_s1 + $0x14f8] sm:$0xff]  ;;  %v2698_v28 = vpack.c.bf16 %v710_v19, %v706_v18  ;;  %v750_v18 = vld [vmem:[%s6637_s1 + $0x16e0] sm:$0xff]  ;;  %v748_v19 = vld [vmem:[%s6637_s1 + $0x16d0] sm:$0xff] }
 0x13b   :  { %3175 = vmatpush1.bf16.msra.mxu1 %v3174_v41  ;;  %2665 = vmatprep.subr.bf16.mxu0 %v2664_v42  ;;  %v2682_v41 = vpack.c.bf16 %v678_v33, %v674_v32  ;;  %v3196_v47 = vpack.c.bf16 %v689_v40, %v685_v38  ;;  %v718_v32 = vld [vmem:[%s6637_s1 + $0x15e0] sm:$0xff]  ;;  %v716_v33 = vld [vmem:[%s6637_s1 + $0x15d0] sm:$0xff]  ;;  %v729_v38 = vld [vmem:[%s6637_s1 + $0x1638] sm:$0xff] }
 0x13c   :  { %3177 = vmatprep.subr.bf16.mxu1 %v3176_v46  ;;  %v684_v46 = vld [vmem:[%s6637_s1 + $0x14d0] sm:$0xff] }
 0x13e   :  { %2667 = vmatpush1.bf16.msra.mxu0 %v2666_v53  ;;  %v697_v53 = vld [vmem:[%s6637_s1 + $0x1538] sm:$0xff] }
 0x13f   :  { %3179 = vmatpush1.bf16.msra.mxu1 %v3178_v54  ;;  %2669 = vmatprep.subr.bf16.mxu0 %v2668_v55  ;;  %v2686_v54 = vpack.c.bf16 %v686_v39, %v682_v44  ;;  %v3198_v55 = vpack.c.bf16 %v688_v25, %v684_v46  ;;  %v3200_v59 = vpack.c.bf16 %v697_v53, %v693_v52  ;;  %v726_v44 = vld [vmem:[%s6637_s1 + $0x1620] sm:$0xff]  ;;  %v724_v39 = vld [vmem:[%s6637_s1 + $0x1610] sm:$0xff]  ;;  %v731_v25 = vld [vmem:[%s6637_s1 + $0x1648] sm:$0xff] }
 0x140   :  { %3181 = vmatprep.subr.bf16.mxu1 %v3180_v24  ;;  %v692_v24 = vld [vmem:[%s6637_s1 + $0x1510] sm:$0xff]  ;;  %v3216_v46 = vpack.c.bf16 %v729_v38, %v725_v37  ;;  %v737_v52 = vld [vmem:[%s6637_s1 + $0x1678] sm:$0xff] }
 0x141   :  { %v769_v37 = vld [vmem:[%s6637_s1 + $0x1778] sm:$0xff] }
 0x142   :  { %2671 = vmatpush1.bf16.msra.mxu0 %v2670_v3  ;;  %v2690_v3 = vpack.c.bf16 %v694_v58, %v690_v57  ;;  %v734_v57 = vld [vmem:[%s6637_s1 + $0x1660] sm:$0xff]  ;;  %v732_v58 = vld [vmem:[%s6637_s1 + $0x1650] sm:$0xff] }
 0x143   :  { %3183 = vmatpush1.bf16.msra.mxu1 %v3182_v4  ;;  %2673 = vmatprep.subr.bf16.mxu0 %v2672_v5  ;;  %v3202_v4 = vpack.c.bf16 %v696_v60, %v692_v24  ;;  %v2692_v5 = vpack.c.bf16 %v703_v0, %v699_v63  ;;  %v3220_v24 = vpack.c.bf16 %v737_v52, %v733_v49  ;;  %v739_v60 = vld [vmem:[%s6637_s1 + $0x1688] sm:$0xff]  ;;  %v741_v0 = vld [vmem:[%s6637_s1 + $0x1698] sm:$0xff] }
 0x144   :  { %3185 = vmatprep.subr.bf16.mxu1 %v3184_v8  ;;  %v3204_v8 = vpack.c.bf16 %v705_v2, %v701_v1  ;;  %v743_v63 = vld [vmem:[%s6637_s1 + $0x16a8] sm:$0xff]  ;;  %v745_v1 = vld [vmem:[%s6637_s1 + $0x16b8] sm:$0xff] }
 0x145   :  { %1501 = vmatmul.mubr.f32.vlgmr.msra.gmra.mrb[0].mxu0 %v5068_v62  ;;  %v777_v49 = vld [vmem:[%s6637_s1 + $0x17b8] sm:$0xff] }
 0x146   :  { %2675 = vmatpush1.bf16.msra.mxu0 %v2674_v15  ;;  %2069 = vmatmul.mubr.f32.vlgmr.msra.gmra.mrb[0].mxu1 %v5068_v62  ;;  %v680_v62 = vld [vmem:[%s6637_s1 + $0x14b0] sm:$0xff]  ;;  %v2694_v15 = vpack.c.bf16 %v702_v51, %v698_v6  ;;  %v742_v6 = vld [vmem:[%s6637_s1 + $0x16a0] sm:$0xff] }
 0x147   :  { %3187 = vmatpush1.bf16.msra.mxu1 %v3186_v16  ;;  %2677 = vmatprep.subr.bf16.mxu0 %v2676_v17  ;;  %v3194_v42 = vpack.c.bf16 %v680_v62, %v676_v34  ;;  %v3206_v16 = vpack.c.bf16 %v704_v45, %v700_v7  ;;  %v2696_v17 = vpack.c.bf16 %v711_v10, %v707_v9  ;;  %v723_v62 = vld [vmem:[%s6637_s1 + $0x1608] sm:$0xff]  ;;  %v740_v51 = vld [vmem:[%s6637_s1 + $0x1690] sm:$0xff]  ;;  %v749_v10 = vld [vmem:[%s6637_s1 + $0x16d8] sm:$0xff] }
 0x148   :  { %3189 = vmatprep.subr.bf16.mxu1 %v3188_v50  ;;  %1571 = vmatprep.mubr.f32.mxu0 %v1118_v26  ;;  %v3208_v50 = vpack.c.bf16 %v713_v14, %v709_v13  ;;  %v3224_v7 = vpack.c.bf16 %v745_v1, %v741_v0  ;;  %v747_v45 = vld [vmem:[%s6637_s1 + $0x16c8] sm:$0xff]  ;;  %v753_v13 = vld [vmem:[%s6637_s1 + $0x16f8] sm:$0xff] }
 0x149   :  { %2139 = vmatprep.mubr.f32.mxu1 %v1118_v26  ;;  %v717_v26 = vld [vmem:[%s6637_s1 + $0x15d8] sm:$0xff]  ;;  %v751_v9 = vld [vmem:[%s6637_s1 + $0x16e8] sm:$0xff] }
 0x14a   :  { %2679 = vmatpush1.bf16.msra.mxu0 %v2678_v29  ;;  %v3210_v29 = vpack.c.bf16 %v712_v21, %v708_v20  ;;  %v3212_v34 = vpack.c.bf16 %v721_v27, %v717_v26  ;;  %v3228_v20 = vpack.c.bf16 %v753_v13, %v749_v10  ;;  %v755_v21 = vld [vmem:[%s6637_s1 + $0x1708] sm:$0xff]  ;;  %v761_v26 = vld [vmem:[%s6637_s1 + $0x1738] sm:$0xff] }
 0x14b   :  { %3191 = vmatpush1.bf16.msra.mxu1 %v3190_v30  ;;  %2681 = vmatprep.subr.bf16.mxu0 %v2680_v31  ;;  %v2700_v30 = vpack.c.bf16 %v719_v23, %v715_v22  ;;  %v714_v31 = vld [vmem:[%s6637_s1 + $0x15c0] sm:$0xff]  ;;  %v759_v22 = vld [vmem:[%s6637_s1 + $0x1728] sm:$0xff]  ;;  %v757_v23 = vld [vmem:[%s6637_s1 + $0x1718] sm:$0xff] }
 0x14c   :  { %3193 = vmatprep.subr.bf16.mxu1 %v3192_v35  ;;  %v720_v35 = vld [vmem:[%s6637_s1 + $0x15f0] sm:$0xff]  ;;  %v2702_v40 = vpack.c.bf16 %v718_v32, %v714_v31  ;;  %v758_v31 = vld [vmem:[%s6637_s1 + $0x1720] sm:$0xff]  ;;  %v785_v0 = vld [vmem:[%s6637_s1 + $0x17f8] sm:$0xff] }
 0x14d   :  { %v756_v32 = vld [vmem:[%s6637_s1 + $0x1710] sm:$0xff]  ;;  %v793_v10 = vld [vmem:[%s6637_s1 + $0x1838] sm:$0xff] }
 0x14e   :  { %2683 = vmatpush1.bf16.msra.mxu0 %v2682_v41  ;;  %v3214_v41 = vpack.c.bf16 %v720_v35, %v716_v33  ;;  %v3232_v33 = vpack.c.bf16 %v761_v26, %v757_v23  ;;  %v763_v35 = vld [vmem:[%s6637_s1 + $0x1748] sm:$0xff]  ;;  %v5836_v13 = vld [vmem:[%s6638_s0 + $0x18] sm:$0xff] }
 0x14f   :  { %3195 = vmatpush1.bf16.msra.mxu1 %v3194_v42  ;;  %2685 = vmatprep.subr.bf16.mxu0 %v2684_v43  ;;  %v2704_v42 = vpack.c.bf16 %v727_v36, %v723_v62  ;;  %v722_v43 = vld [vmem:[%s6637_s1 + $0x1600] sm:$0xff]  ;;  %v767_v62 = vld [vmem:[%s6637_s1 + $0x1768] sm:$0xff]  ;;  %v765_v36 = vld [vmem:[%s6637_s1 + $0x1758] sm:$0xff]  ;;  %v5858_v23 = vrot.slane %v5836_v13, %v3727_v11 }
 0x150   :  { %3197 = vmatprep.subr.bf16.mxu1 %v3196_v47  ;;  %v728_v47 = vld [vmem:[%s6637_s1 + $0x1630] sm:$0xff]  ;;  %v2706_v53 = vpack.c.bf16 %v726_v44, %v722_v43  ;;  %v766_v43 = vld [vmem:[%s6637_s1 + $0x1760] sm:$0xff]  ;;  %v797_v26 = vld [vmem:[%s6637_s1 + $0x1858] sm:$0xff] }
 0x151   :  { %v764_v44 = vld [vmem:[%s6637_s1 + $0x1750] sm:$0xff] }
 0x152   :  { %2687 = vmatpush1.bf16.msra.mxu0 %v2686_v54  ;;  %v3218_v54 = vpack.c.bf16 %v728_v47, %v724_v39  ;;  %v3236_v39 = vpack.c.bf16 %v769_v37, %v765_v36  ;;  %v771_v47 = vld [vmem:[%s6637_s1 + $0x1788] sm:$0xff]  ;;  %v1134_v37 = vcombine.high %v5858_v23, %v5858_v23 }
 0x153   :  { %3199 = vmatpush1.bf16.msra.mxu1 %v3198_v55  ;;  %2689 = vmatprep.subr.bf16.mxu0 %v2688_v56  ;;  %v2708_v55 = vpack.c.bf16 %v735_v48, %v731_v25  ;;  %v730_v56 = vld [vmem:[%s6637_s1 + $0x1640] sm:$0xff]  ;;  %v775_v25 = vld [vmem:[%s6637_s1 + $0x17a8] sm:$0xff]  ;;  %v773_v48 = vld [vmem:[%s6637_s1 + $0x1798] sm:$0xff] }
 0x154   :  { %3201 = vmatprep.subr.bf16.mxu1 %v3200_v59  ;;  %v736_v59 = vld [vmem:[%s6637_s1 + $0x1670] sm:$0xff]  ;;  %v2710_v2 = vpack.c.bf16 %v734_v57, %v730_v56  ;;  %v774_v56 = vld [vmem:[%s6637_s1 + $0x17a0] sm:$0xff]  ;;  %v807_v36 = vld [vmem:[%s6637_s1 + $0x18a8] sm:$0xff] }
 0x155   :  { %v772_v57 = vld [vmem:[%s6637_s1 + $0x1790] sm:$0xff] }
 0x156   :  { %2691 = vmatpush1.bf16.msra.mxu0 %v2690_v3  ;;  %v3222_v3 = vpack.c.bf16 %v736_v59, %v732_v58  ;;  %v3240_v58 = vpack.c.bf16 %v777_v49, %v773_v48  ;;  %v779_v59 = vld [vmem:[%s6637_s1 + $0x17c8] sm:$0xff]  ;;  %v813_v49 = vld [vmem:[%s6637_s1 + $0x18d8] sm:$0xff] }
 0x157   :  { %3203 = vmatpush1.bf16.msra.mxu1 %v3202_v4  ;;  %2693 = vmatprep.subr.bf16.mxu0 %v2692_v5  ;;  %v2712_v4 = vpack.c.bf16 %v743_v63, %v739_v60  ;;  %v738_v5 = vld [vmem:[%s6637_s1 + $0x1680] sm:$0xff]  ;;  %v783_v60 = vld [vmem:[%s6637_s1 + $0x17e8] sm:$0xff]  ;;  %v781_v63 = vld [vmem:[%s6637_s1 + $0x17d8] sm:$0xff] }
 0x158   :  { %3205 = vmatprep.subr.bf16.mxu1 %v3204_v8  ;;  %v744_v8 = vld [vmem:[%s6637_s1 + $0x16b0] sm:$0xff]  ;;  %v2714_v14 = vpack.c.bf16 %v742_v6, %v738_v5  ;;  %v782_v5 = vld [vmem:[%s6637_s1 + $0x17e0] sm:$0xff]  ;;  %v815_v48 = vld [vmem:[%s6637_s1 + $0x18e8] sm:$0xff] }
 0x159   :  { %v780_v6 = vld [vmem:[%s6637_s1 + $0x17d0] sm:$0xff] }
 0x15a   :  { %2695 = vmatpush1.bf16.msra.mxu0 %v2694_v15  ;;  %v3226_v15 = vpack.c.bf16 %v744_v8, %v740_v51  ;;  %v3244_v51 = vpack.c.bf16 %v785_v0, %v781_v63  ;;  %v787_v8 = vld [vmem:[%s6637_s1 + $0x1808] sm:$0xff]  ;;  %v821_v0 = vld [vmem:[%s6637_s1 + $0x1918] sm:$0xff] }
 0x15b   :  { %3207 = vmatpush1.bf16.msra.mxu1 %v3206_v16  ;;  %2697 = vmatprep.subr.bf16.mxu0 %v2696_v17  ;;  %v2716_v16 = vpack.c.bf16 %v751_v9, %v747_v45  ;;  %v746_v17 = vld [vmem:[%s6637_s1 + $0x16c0] sm:$0xff]  ;;  %v791_v45 = vld [vmem:[%s6637_s1 + $0x1828] sm:$0xff]  ;;  %v789_v9 = vld [vmem:[%s6637_s1 + $0x1818] sm:$0xff] }
 0x15c   :  { %3209 = vmatprep.subr.bf16.mxu1 %v3208_v50  ;;  %v752_v50 = vld [vmem:[%s6637_s1 + $0x16f0] sm:$0xff]  ;;  %v2718_v27 = vpack.c.bf16 %v750_v18, %v746_v17  ;;  %v786_v17 = vld [vmem:[%s6637_s1 + $0x1800] sm:$0xff]  ;;  %v823_v63 = vld [vmem:[%s6637_s1 + $0x1928] sm:$0xff] }
 0x15d   :  { %v790_v18 = vld [vmem:[%s6637_s1 + $0x1820] sm:$0xff] }
 0x15e   :  { %2699 = vmatpush1.bf16.msra.mxu0 %v2698_v28  ;;  %v3230_v28 = vpack.c.bf16 %v752_v50, %v748_v19  ;;  %v788_v19 = vld [vmem:[%s6637_s1 + $0x1810] sm:$0xff] }
 0x15f   :  { %3211 = vmatpush1.bf16.msra.mxu1 %v3210_v29  ;;  %2701 = vmatprep.subr.bf16.mxu0 %v2700_v30  ;;  %v2720_v29 = vpack.c.bf16 %v759_v22, %v755_v21  ;;  %v754_v30 = vld [vmem:[%s6637_s1 + $0x1700] sm:$0xff]  ;;  %v792_v50 = vld [vmem:[%s6637_s1 + $0x1830] sm:$0xff]  ;;  %v795_v21 = vld [vmem:[%s6637_s1 + $0x1848] sm:$0xff] }
 0x160   :  { %3213 = vmatprep.subr.bf16.mxu1 %v3212_v34  ;;  %v760_v34 = vld [vmem:[%s6637_s1 + $0x1730] sm:$0xff]  ;;  %v2722_v38 = vpack.c.bf16 %v758_v31, %v754_v30  ;;  %v799_v22 = vld [vmem:[%s6637_s1 + $0x1868] sm:$0xff]  ;;  %v794_v31 = vld [vmem:[%s6637_s1 + $0x1840] sm:$0xff] }
 0x161   :  { %v2740_v30 = vpack.c.bf16 %v799_v22, %v795_v21  ;;  %v832_v21 = vld [vmem:[%s6637_s1 + $0x1970] sm:$0xff]  ;;  %v835_v22 = vld [vmem:[%s6637_s1 + $0x1988] sm:$0xff] }
 0x162   :  { %2703 = vmatpush1.bf16.msra.mxu0 %v2702_v40  ;;  %v3234_v40 = vpack.c.bf16 %v760_v34, %v756_v32  ;;  %v798_v32 = vld [vmem:[%s6637_s1 + $0x1860] sm:$0xff] }
 0x163   :  { %3215 = vmatpush1.bf16.msra.mxu1 %v3214_v41  ;;  %2705 = vmatprep.subr.bf16.mxu0 %v2704_v42  ;;  %v2724_v41 = vpack.c.bf16 %v767_v62, %v763_v35  ;;  %v762_v42 = vld [vmem:[%s6637_s1 + $0x1740] sm:$0xff]  ;;  %v800_v35 = vld [vmem:[%s6637_s1 + $0x1870] sm:$0xff]  ;;  %v803_v62 = vld [vmem:[%s6637_s1 + $0x1888] sm:$0xff] }
 0x164   :  { %3217 = vmatprep.subr.bf16.mxu1 %v3216_v46  ;;  %v768_v46 = vld [vmem:[%s6637_s1 + $0x1770] sm:$0xff]  ;;  %v2726_v52 = vpack.c.bf16 %v766_v43, %v762_v42  ;;  %v2744_v43 = vpack.c.bf16 %v807_v36, %v803_v62  ;;  %v843_v36 = vld [vmem:[%s6637_s1 + $0x19c8] sm:$0xff] }
 0x165   :  { %v840_v62 = vld [vmem:[%s6637_s1 + $0x19b0] sm:$0xff] }
 0x166   :  { %2707 = vmatpush1.bf16.msra.mxu0 %v2706_v53  ;;  %v3238_v53 = vpack.c.bf16 %v768_v46, %v764_v44  ;;  %v802_v44 = vld [vmem:[%s6637_s1 + $0x1880] sm:$0xff]  ;;  %v804_v46 = vld [vmem:[%s6637_s1 + $0x1890] sm:$0xff] }
 0x167   :  { %3219 = vmatpush1.bf16.msra.mxu1 %v3218_v54  ;;  %2709 = vmatprep.subr.bf16.mxu0 %v2708_v55  ;;  %v2728_v54 = vpack.c.bf16 %v775_v25, %v771_v47  ;;  %v770_v55 = vld [vmem:[%s6637_s1 + $0x1780] sm:$0xff]  ;;  %v811_v25 = vld [vmem:[%s6637_s1 + $0x18c8] sm:$0xff] }
 0x168   :  { %3221 = vmatprep.subr.bf16.mxu1 %v3220_v24  ;;  %v776_v24 = vld [vmem:[%s6637_s1 + $0x17b0] sm:$0xff]  ;;  %v2730_v1 = vpack.c.bf16 %v774_v56, %v770_v55  ;;  %v2748_v55 = vpack.c.bf16 %v815_v48, %v811_v25  ;;  %v810_v56 = vld [vmem:[%s6637_s1 + $0x18c0] sm:$0xff]  ;;  %v851_v25 = vld [vmem:[%s6637_s1 + $0x1a08] sm:$0xff] }
 0x169   :  { %v855_v48 = vld [vmem:[%s6637_s1 + $0x1a28] sm:$0xff] }
 0x16a   :  { %2711 = vmatpush1.bf16.msra.mxu0 %v2710_v2  ;;  %v3242_v2 = vpack.c.bf16 %v776_v24, %v772_v57  ;;  %v814_v57 = vld [vmem:[%s6637_s1 + $0x18e0] sm:$0xff] }
 0x16b   :  { %3223 = vmatpush1.bf16.msra.mxu1 %v3222_v3  ;;  %2713 = vmatprep.subr.bf16.mxu0 %v2712_v4  ;;  %v2732_v3 = vpack.c.bf16 %v783_v60, %v779_v59  ;;  %v778_v4 = vld [vmem:[%s6637_s1 + $0x17c0] sm:$0xff]  ;;  %v816_v59 = vld [vmem:[%s6637_s1 + $0x18f0] sm:$0xff]  ;;  %v819_v60 = vld [vmem:[%s6637_s1 + $0x1908] sm:$0xff] }
 0x16c   :  { %3225 = vmatprep.subr.bf16.mxu1 %v3224_v7  ;;  %v784_v7 = vld [vmem:[%s6637_s1 + $0x17f0] sm:$0xff] }
 0x16e   :  { %2715 = vmatpush1.bf16.msra.mxu0 %v2714_v14  ;;  %v2734_v14 = vpack.c.bf16 %v782_v5, %v778_v4  ;;  %v2752_v4 = vpack.c.bf16 %v823_v63, %v819_v60  ;;  %v818_v5 = vld [vmem:[%s6637_s1 + $0x1900] sm:$0xff]  ;;  %v859_v60 = vld [vmem:[%s6637_s1 + $0x1a48] sm:$0xff] }
 0x16f   :  { %3227 = vmatpush1.bf16.msra.mxu1 %v3226_v15  ;;  %2717 = vmatprep.subr.bf16.mxu0 %v2716_v16  ;;  %v3246_v15 = vpack.c.bf16 %v784_v7, %v780_v6  ;;  %v2736_v16 = vpack.c.bf16 %v791_v45, %v787_v8  ;;  %v822_v6 = vld [vmem:[%s6637_s1 + $0x1920] sm:$0xff]  ;;  %v824_v8 = vld [vmem:[%s6637_s1 + $0x1930] sm:$0xff]  ;;  %v827_v45 = vld [vmem:[%s6637_s1 + $0x1948] sm:$0xff] }
 0x170   :  { %3229 = vmatprep.subr.bf16.mxu1 %v3228_v20  ;;  %v3248_v20 = vpack.c.bf16 %v793_v10, %v789_v9  ;;  %v831_v9 = vld [vmem:[%s6637_s1 + $0x1968] sm:$0xff]  ;;  %v829_v10 = vld [vmem:[%s6637_s1 + $0x1958] sm:$0xff] }
 0x171   :  { %v863_v63 = vld [vmem:[%s6637_s1 + $0x1a68] sm:$0xff] }
 0x172   :  { %2719 = vmatpush1.bf16.msra.mxu0 %v2718_v27  ;;  %v801_v27 = vld [vmem:[%s6637_s1 + $0x1878] sm:$0xff] }
 0x173   :  { %3231 = vmatpush1.bf16.msra.mxu1 %v3230_v28  ;;  %2721 = vmatprep.subr.bf16.mxu0 %v2720_v29  ;;  %v2738_v28 = vpack.c.bf16 %v790_v18, %v786_v17  ;;  %v3250_v29 = vpack.c.bf16 %v792_v50, %v788_v19  ;;  %v3252_v34 = vpack.c.bf16 %v801_v27, %v797_v26  ;;  %v826_v18 = vld [vmem:[%s6637_s1 + $0x1940] sm:$0xff]  ;;  %v839_v26 = vld [vmem:[%s6637_s1 + $0x19a8] sm:$0xff]  ;;  %v837_v27 = vld [vmem:[%s6637_s1 + $0x1998] sm:$0xff] }
 0x174   :  { %3233 = vmatprep.subr.bf16.mxu1 %v3232_v33  ;;  %v796_v33 = vld [vmem:[%s6637_s1 + $0x1850] sm:$0xff]  ;;  %v2756_v17 = vpack.c.bf16 %v831_v9, %v827_v45  ;;  %v830_v19 = vld [vmem:[%s6637_s1 + $0x1960] sm:$0xff]  ;;  %v867_v45 = vld [vmem:[%s6637_s1 + $0x1a88] sm:$0xff] }
 0x175   :  { %v3254_v42 = vpack.c.bf16 %v800_v35, %v796_v33  ;;  %v838_v33 = vld [vmem:[%s6637_s1 + $0x19a0] sm:$0xff]  ;;  %v871_v9 = vld [vmem:[%s6637_s1 + $0x1aa8] sm:$0xff] }
 0x176   :  { %2723 = vmatpush1.bf16.msra.mxu0 %v2722_v38  ;;  %v805_v38 = vld [vmem:[%s6637_s1 + $0x1898] sm:$0xff] }
 0x177   :  { %3235 = vmatpush1.bf16.msra.mxu1 %v3234_v40  ;;  %2725 = vmatprep.subr.bf16.mxu0 %v2724_v41  ;;  %v809_v40 = vld [vmem:[%s6637_s1 + $0x18b8] sm:$0xff]  ;;  %v2742_v41 = vpack.c.bf16 %v798_v32, %v794_v31  ;;  %v2760_v31 = vpack.c.bf16 %v839_v26, %v835_v22  ;;  %v834_v32 = vld [vmem:[%s6637_s1 + $0x1980] sm:$0xff]  ;;  %v875_v22 = vld [vmem:[%s6637_s1 + $0x1ac8] sm:$0xff] }
 0x178   :  { %3237 = vmatprep.subr.bf16.mxu1 %v3236_v39  ;;  %v806_v39 = vld [vmem:[%s6637_s1 + $0x18a0] sm:$0xff]  ;;  %v3256_v47 = vpack.c.bf16 %v809_v40, %v805_v38  ;;  %v845_v38 = vld [vmem:[%s6637_s1 + $0x19d8] sm:$0xff]  ;;  %v879_v26 = vld [vmem:[%s6637_s1 + $0x1ae8] sm:$0xff] }
 0x179   :  { %v849_v40 = vld [vmem:[%s6637_s1 + $0x19f8] sm:$0xff] }
 0x17a   :  { %2727 = vmatpush1.bf16.msra.mxu0 %v2726_v52  ;;  %v817_v52 = vld [vmem:[%s6637_s1 + $0x18f8] sm:$0xff] }
 0x17b   :  { %3239 = vmatpush1.bf16.msra.mxu1 %v3238_v53  ;;  %2729 = vmatprep.subr.bf16.mxu0 %v2728_v54  ;;  %v2746_v53 = vpack.c.bf16 %v806_v39, %v802_v44  ;;  %v3260_v24 = vpack.c.bf16 %v817_v52, %v813_v49  ;;  %v842_v44 = vld [vmem:[%s6637_s1 + $0x19c0] sm:$0xff]  ;;  %v853_v49 = vld [vmem:[%s6637_s1 + $0x1a18] sm:$0xff] }
 0x17c   :  { %3241 = vmatprep.subr.bf16.mxu1 %v3240_v58  ;;  %v812_v58 = vld [vmem:[%s6637_s1 + $0x18d0] sm:$0xff]  ;;  %v846_v39 = vld [vmem:[%s6637_s1 + $0x19e0] sm:$0xff]  ;;  %v857_v52 = vld [vmem:[%s6637_s1 + $0x1a38] sm:$0xff] }
 0x17e   :  { %2731 = vmatpush1.bf16.msra.mxu0 %v2730_v1  ;;  %v825_v1 = vld [vmem:[%s6637_s1 + $0x1938] sm:$0xff] }
 0x17f   :  { %3243 = vmatpush1.bf16.msra.mxu1 %v3242_v2  ;;  %2733 = vmatprep.subr.bf16.mxu0 %v2732_v3  ;;  %v2750_v2 = vpack.c.bf16 %v814_v57, %v810_v56  ;;  %v3262_v3 = vpack.c.bf16 %v816_v59, %v812_v58  ;;  %v3264_v7 = vpack.c.bf16 %v825_v1, %v821_v0  ;;  %v850_v56 = vld [vmem:[%s6637_s1 + $0x1a00] sm:$0xff]  ;;  %v852_v58 = vld [vmem:[%s6637_s1 + $0x1a10] sm:$0xff]  ;;  %v861_v0 = vld [vmem:[%s6637_s1 + $0x1a58] sm:$0xff] }
 0x180   :  { %3245 = vmatprep.subr.bf16.mxu1 %v3244_v51  ;;  %v820_v51 = vld [vmem:[%s6637_s1 + $0x1910] sm:$0xff]  ;;  %v854_v57 = vld [vmem:[%s6637_s1 + $0x1a20] sm:$0xff]  ;;  %v865_v1 = vld [vmem:[%s6637_s1 + $0x1a78] sm:$0xff] }
 0x181   :  { %v856_v59 = vld [vmem:[%s6637_s1 + $0x1a30] sm:$0xff] }
 0x182   :  { %2735 = vmatpush1.bf16.msra.mxu0 %v2734_v14  ;;  %v833_v14 = vld [vmem:[%s6637_s1 + $0x1978] sm:$0xff] }
 0x183   :  { %3247 = vmatpush1.bf16.msra.mxu1 %v3246_v15  ;;  %2737 = vmatprep.subr.bf16.mxu0 %v2736_v16  ;;  %v2754_v15 = vpack.c.bf16 %v822_v6, %v818_v5  ;;  %v3266_v16 = vpack.c.bf16 %v824_v8, %v820_v51  ;;  %v3268_v50 = vpack.c.bf16 %v833_v14, %v829_v10  ;;  %v858_v5 = vld [vmem:[%s6637_s1 + $0x1a40] sm:$0xff]  ;;  %v860_v51 = vld [vmem:[%s6637_s1 + $0x1a50] sm:$0xff]  ;;  %v869_v10 = vld [vmem:[%s6637_s1 + $0x1a98] sm:$0xff] }
 0x184   :  { %3249 = vmatprep.subr.bf16.mxu1 %v3248_v20  ;;  %v828_v20 = vld [vmem:[%s6637_s1 + $0x1950] sm:$0xff]  ;;  %v862_v6 = vld [vmem:[%s6637_s1 + $0x1a60] sm:$0xff]  ;;  %v873_v14 = vld [vmem:[%s6637_s1 + $0x1ab8] sm:$0xff] }
 0x185   :  { %1572 = vmatmul.mubr.f32.vlgmr.msra.gmra.mrb[0].mxu0 %v5461_v12  ;;  %v864_v8 = vld [vmem:[%s6637_s1 + $0x1a70] sm:$0xff] }
 0x186   :  { %2739 = vmatpush1.bf16.msra.mxu0 %v2738_v28  ;;  %2140 = vmatmul.mubr.f32.vlgmr.msra.gmra.mrb[0].mxu1 %v5461_v12  ;;  %v808_v12 = vld [vmem:[%s6637_s1 + $0x18b0] sm:$0xff]  ;;  %v841_v28 = vld [vmem:[%s6637_s1 + $0x19b8] sm:$0xff] }
 0x187   :  { %3251 = vmatpush1.bf16.msra.mxu1 %v3250_v29  ;;  %2741 = vmatprep.subr.bf16.mxu0 %v2740_v30  ;;  %v3258_v54 = vpack.c.bf16 %v808_v12, %v804_v46  ;;  %v2758_v29 = vpack.c.bf16 %v830_v19, %v826_v18  ;;  %v3270_v30 = vpack.c.bf16 %v832_v21, %v828_v20  ;;  %v844_v46 = vld [vmem:[%s6637_s1 + $0x19d0] sm:$0xff]  ;;  %v866_v18 = vld [vmem:[%s6637_s1 + $0x1a80] sm:$0xff] }
 0x188   :  { %3253 = vmatprep.subr.bf16.mxu1 %v3252_v34  ;;  %1642 = vmatprep.mubr.f32.mxu0 %v1134_v37  ;;  %v836_v34 = vld [vmem:[%s6637_s1 + $0x1990] sm:$0xff]  ;;  %v3272_v35 = vpack.c.bf16 %v841_v28, %v837_v27  ;;  %v870_v19 = vld [vmem:[%s6637_s1 + $0x1aa0] sm:$0xff]  ;;  %v877_v27 = vld [vmem:[%s6637_s1 + $0x1ad8] sm:$0xff] }
 0x189   :  { %2210 = vmatprep.mubr.f32.mxu1 %v1134_v37  ;;  %v847_v37 = vld [vmem:[%s6637_s1 + $0x19e8] sm:$0xff]  ;;  %v848_v12 = vld [vmem:[%s6637_s1 + $0x19f0] sm:$0xff]  ;;  %v881_v28 = vld [vmem:[%s6637_s1 + $0x1af8] sm:$0xff] }
 0x18a   :  { %2743 = vmatpush1.bf16.msra.mxu0 %v2742_v41  ;;  %v2762_v41 = vpack.c.bf16 %v838_v33, %v834_v32  ;;  %v868_v20 = vld [vmem:[%s6637_s1 + $0x1a90] sm:$0xff]  ;;  %v874_v32 = vld [vmem:[%s6637_s1 + $0x1ac0] sm:$0xff] }
 0x18b   :  { %3255 = vmatpush1.bf16.msra.mxu1 %v3254_v42  ;;  %2745 = vmatprep.subr.bf16.mxu0 %v2744_v43  ;;  %v3274_v42 = vpack.c.bf16 %v840_v62, %v836_v34  ;;  %v2764_v43 = vpack.c.bf16 %v847_v37, %v843_v36  ;;  %v872_v21 = vld [vmem:[%s6637_s1 + $0x1ab0] sm:$0xff]  ;;  %v878_v33 = vld [vmem:[%s6637_s1 + $0x1ae0] sm:$0xff]  ;;  %v883_v36 = vld [vmem:[%s6637_s1 + $0x1b08] sm:$0xff] }
 0x18c   :  { %3257 = vmatprep.subr.bf16.mxu1 %v3256_v47  ;;  %v3276_v47 = vpack.c.bf16 %v849_v40, %v845_v38  ;;  %v876_v34 = vld [vmem:[%s6637_s1 + $0x1ad0] sm:$0xff]  ;;  %v887_v37 = vld [vmem:[%s6637_s1 + $0x1b28] sm:$0xff]  ;;  %v885_v38 = vld [vmem:[%s6637_s1 + $0x1b18] sm:$0xff] }
 0x18d   :  { %v880_v62 = vld [vmem:[%s6637_s1 + $0x1af0] sm:$0xff]  ;;  %v889_v40 = vld [vmem:[%s6637_s1 + $0x1b38] sm:$0xff] }
 0x18e   :  { %2747 = vmatpush1.bf16.msra.mxu0 %v2746_v53  ;;  %v2766_v53 = vpack.c.bf16 %v846_v39, %v842_v44  ;;  %v882_v44 = vld [vmem:[%s6637_s1 + $0x1b00] sm:$0xff] }
 0x18f   :  { %3259 = vmatpush1.bf16.msra.mxu1 %v3258_v54  ;;  %2749 = vmatprep.subr.bf16.mxu0 %v2748_v55  ;;  %v3278_v54 = vpack.c.bf16 %v848_v12, %v844_v46  ;;  %v2768_v55 = vpack.c.bf16 %v855_v48, %v851_v25  ;;  %v886_v39 = vld [vmem:[%s6637_s1 + $0x1b20] sm:$0xff]  ;;  %v884_v46 = vld [vmem:[%s6637_s1 + $0x1b10] sm:$0xff]  ;;  %v891_v25 = vld [vmem:[%s6637_s1 + $0x1b48] sm:$0xff] }
 0x190   :  { %3261 = vmatprep.subr.bf16.mxu1 %v3260_v24  ;;  %v3280_v24 = vpack.c.bf16 %v857_v52, %v853_v49  ;;  %v888_v12 = vld [vmem:[%s6637_s1 + $0x1b30] sm:$0xff]  ;;  %v895_v48 = vld [vmem:[%s6637_s1 + $0x1b68] sm:$0xff]  ;;  %v893_v49 = vld [vmem:[%s6637_s1 + $0x1b58] sm:$0xff] }
 0x191   :  { %v897_v52 = vld [vmem:[%s6637_s1 + $0x1b78] sm:$0xff] }
 0x192   :  { %2751 = vmatpush1.bf16.msra.mxu0 %v2750_v2  ;;  %v2770_v2 = vpack.c.bf16 %v854_v57, %v850_v56  ;;  %v890_v56 = vld [vmem:[%s6637_s1 + $0x1b40] sm:$0xff] }
 0x193   :  { %3263 = vmatpush1.bf16.msra.mxu1 %v3262_v3  ;;  %2753 = vmatprep.subr.bf16.mxu0 %v2752_v4  ;;  %v3282_v3 = vpack.c.bf16 %v856_v59, %v852_v58  ;;  %v2772_v4 = vpack.c.bf16 %v863_v63, %v859_v60  ;;  %v894_v57 = vld [vmem:[%s6637_s1 + $0x1b60] sm:$0xff]  ;;  %v892_v58 = vld [vmem:[%s6637_s1 + $0x1b50] sm:$0xff]  ;;  %v899_v60 = vld [vmem:[%s6637_s1 + $0x1b88] sm:$0xff] }
 0x194   :  { %3265 = vmatprep.subr.bf16.mxu1 %v3264_v7  ;;  %v3284_v7 = vpack.c.bf16 %v865_v1, %v861_v0  ;;  %v896_v59 = vld [vmem:[%s6637_s1 + $0x1b70] sm:$0xff]  ;;  %v903_v63 = vld [vmem:[%s6637_s1 + $0x1ba8] sm:$0xff]  ;;  %v901_v0 = vld [vmem:[%s6637_s1 + $0x1b98] sm:$0xff] }
 0x195   :  { %v905_v1 = vld [vmem:[%s6637_s1 + $0x1bb8] sm:$0xff] }
 0x196   :  { %2755 = vmatpush1.bf16.msra.mxu0 %v2754_v15  ;;  %v2774_v15 = vpack.c.bf16 %v862_v6, %v858_v5  ;;  %v898_v5 = vld [vmem:[%s6637_s1 + $0x1b80] sm:$0xff] }
 0x197   :  { %3267 = vmatpush1.bf16.msra.mxu1 %v3266_v16  ;;  %2757 = vmatprep.subr.bf16.mxu0 %v2756_v17  ;;  %v3286_v16 = vpack.c.bf16 %v864_v8, %v860_v51  ;;  %v2776_v17 = vpack.c.bf16 %v871_v9, %v867_v45  ;;  %v902_v6 = vld [vmem:[%s6637_s1 + $0x1ba0] sm:$0xff]  ;;  %v900_v51 = vld [vmem:[%s6637_s1 + $0x1b90] sm:$0xff]  ;;  %v907_v45 = vld [vmem:[%s6637_s1 + $0x1bc8] sm:$0xff] }
 0x198   :  { %3269 = vmatprep.subr.bf16.mxu1 %v3268_v50  ;;  %v3288_v50 = vpack.c.bf16 %v873_v14, %v869_v10  ;;  %v904_v8 = vld [vmem:[%s6637_s1 + $0x1bb0] sm:$0xff]  ;;  %v911_v9 = vld [vmem:[%s6637_s1 + $0x1be8] sm:$0xff]  ;;  %v909_v10 = vld [vmem:[%s6637_s1 + $0x1bd8] sm:$0xff] }
 0x199   :  { %v913_v14 = vld [vmem:[%s6637_s1 + $0x1bf8] sm:$0xff] }
 0x19a   :  { %2759 = vmatpush1.bf16.msra.mxu0 %v2758_v29  ;;  %v2778_v29 = vpack.c.bf16 %v870_v19, %v866_v18  ;;  %v906_v18 = vld [vmem:[%s6637_s1 + $0x1bc0] sm:$0xff] }
 0x19b   :  { %3271 = vmatpush1.bf16.msra.mxu1 %v3270_v30  ;;  %2761 = vmatprep.subr.bf16.mxu0 %v2760_v31  ;;  %v3290_v30 = vpack.c.bf16 %v872_v21, %v868_v20  ;;  %v2780_v31 = vpack.c.bf16 %v879_v26, %v875_v22  ;;  %v910_v19 = vld [vmem:[%s6637_s1 + $0x1be0] sm:$0xff]  ;;  %v908_v20 = vld [vmem:[%s6637_s1 + $0x1bd0] sm:$0xff]  ;;  %v915_v22 = vld [vmem:[%s6637_s1 + $0x1c08] sm:$0xff] }
 0x19c   :  { %3273 = vmatprep.subr.bf16.mxu1 %v3272_v35  ;;  %v3292_v35 = vpack.c.bf16 %v881_v28, %v877_v27  ;;  %v912_v21 = vld [vmem:[%s6637_s1 + $0x1bf0] sm:$0xff]  ;;  %v919_v26 = vld [vmem:[%s6637_s1 + $0x1c28] sm:$0xff]  ;;  %v1119_v27 = vcombine.high %v5836_v13, %v5836_v13  ;;  %v917_v28 = vld [vmem:[%s6637_s1 + $0x1c18] sm:$0xff] }
 0x19d   :  { %v918_v13 = vld [vmem:[%s6637_s1 + $0x1c20] sm:$0xff] }
 0x19e   :  { %2763 = vmatpush1.bf16.msra.mxu0 %v2762_v41  ;;  %v2782_v41 = vpack.c.bf16 %v878_v33, %v874_v32  ;;  %v2800_v32 = vpack.c.bf16 %v919_v26, %v915_v22  ;;  %v914_v33 = vld [vmem:[%s6637_s1 + $0x1c00] sm:$0xff]  ;;  %v955_v22 = vld [vmem:[%s6637_s1 + $0x1d48] sm:$0xff] }
 0x19f   :  { %3275 = vmatpush1.bf16.msra.mxu1 %v3274_v42  ;;  %2765 = vmatprep.subr.bf16.mxu0 %v2764_v43  ;;  %v3294_v42 = vpack.c.bf16 %v880_v62, %v876_v34  ;;  %v2784_v43 = vpack.c.bf16 %v887_v37, %v883_v36  ;;  %v916_v34 = vld [vmem:[%s6637_s1 + $0x1c10] sm:$0xff]  ;;  %v923_v36 = vld [vmem:[%s6637_s1 + $0x1c48] sm:$0xff] }
 0x1a0   :  { %3277 = vmatprep.subr.bf16.mxu1 %v3276_v47  ;;  %v3296_v47 = vpack.c.bf16 %v889_v40, %v885_v38  ;;  %v920_v62 = vld [vmem:[%s6637_s1 + $0x1c30] sm:$0xff]  ;;  %v927_v37 = vld [vmem:[%s6637_s1 + $0x1c68] sm:$0xff]  ;;  %v6251_v38 = vrot.slane %v1119_v27, %v3727_v11  ;;  %v925_v40 = vld [vmem:[%s6637_s1 + $0x1c58] sm:$0xff] }
 0x1a1   :  { %v926_v11 = vld [vmem:[%s6637_s1 + $0x1c60] sm:$0xff]  ;;  %v959_v26 = vld [vmem:[%s6637_s1 + $0x1d68] sm:$0xff]  ;;  %v957_v27 = vld [vmem:[%s6637_s1 + $0x1d58] sm:$0xff] }
 0x1a2   :  { %2767 = vmatpush1.bf16.msra.mxu0 %v2766_v53  ;;  %v2786_v53 = vpack.c.bf16 %v886_v39, %v882_v44  ;;  %v2804_v44 = vpack.c.bf16 %v927_v37, %v923_v36  ;;  %v922_v39 = vld [vmem:[%s6637_s1 + $0x1c40] sm:$0xff]  ;;  %v967_v36 = vld [vmem:[%s6637_s1 + $0x1da8] sm:$0xff]  ;;  %v965_v37 = vld [vmem:[%s6637_s1 + $0x1d98] sm:$0xff] }
 0x1a3   :  { %3279 = vmatpush1.bf16.msra.mxu1 %v3278_v54  ;;  %2769 = vmatprep.subr.bf16.mxu0 %v2768_v55  ;;  %v3298_v54 = vpack.c.bf16 %v888_v12, %v884_v46  ;;  %v2788_v55 = vpack.c.bf16 %v895_v48, %v891_v25  ;;  %v924_v46 = vld [vmem:[%s6637_s1 + $0x1c50] sm:$0xff]  ;;  %v931_v25 = vld [vmem:[%s6637_s1 + $0x1c88] sm:$0xff] }
 0x1a4   :  { %3281 = vmatprep.subr.bf16.mxu1 %v3280_v24  ;;  %v3300_v24 = vpack.c.bf16 %v897_v52, %v893_v49  ;;  %v928_v12 = vld [vmem:[%s6637_s1 + $0x1c70] sm:$0xff]  ;;  %v935_v48 = vld [vmem:[%s6637_s1 + $0x1ca8] sm:$0xff]  ;;  %v1135_v49 = vcombine.high %v6251_v38, %v6251_v38  ;;  %v933_v52 = vld [vmem:[%s6637_s1 + $0x1c98] sm:$0xff] }
 0x1a6   :  { %2771 = vmatpush1.bf16.msra.mxu0 %v2770_v2  ;;  %v2790_v2 = vpack.c.bf16 %v894_v57, %v890_v56  ;;  %v2808_v56 = vpack.c.bf16 %v935_v48, %v931_v25  ;;  %v930_v57 = vld [vmem:[%s6637_s1 + $0x1c80] sm:$0xff]  ;;  %v975_v25 = vld [vmem:[%s6637_s1 + $0x1de8] sm:$0xff]  ;;  %v973_v48 = vld [vmem:[%s6637_s1 + $0x1dd8] sm:$0xff] }
 0x1a7   :  { %3283 = vmatpush1.bf16.msra.mxu1 %v3282_v3  ;;  %2773 = vmatprep.subr.bf16.mxu0 %v2772_v4  ;;  %v3302_v3 = vpack.c.bf16 %v896_v59, %v892_v58  ;;  %v2792_v4 = vpack.c.bf16 %v903_v63, %v899_v60  ;;  %v934_v58 = vld [vmem:[%s6637_s1 + $0x1ca0] sm:$0xff]  ;;  %v939_v60 = vld [vmem:[%s6637_s1 + $0x1cc8] sm:$0xff] }
 0x1a8   :  { %3285 = vmatprep.subr.bf16.mxu1 %v3284_v7  ;;  %v3304_v7 = vpack.c.bf16 %v905_v1, %v901_v0  ;;  %v943_v63 = vld [vmem:[%s6637_s1 + $0x1ce8] sm:$0xff]  ;;  %v941_v0 = vld [vmem:[%s6637_s1 + $0x1cd8] sm:$0xff] }
 0x1a9   :  { %v945_v1 = vld [vmem:[%s6637_s1 + $0x1cf8] sm:$0xff] }
 0x1aa   :  { %2775 = vmatpush1.bf16.msra.mxu0 %v2774_v15  ;;  %v2794_v15 = vpack.c.bf16 %v902_v6, %v898_v5  ;;  %v938_v5 = vld [vmem:[%s6637_s1 + $0x1cc0] sm:$0xff] }
 0x1ab   :  { %3287 = vmatpush1.bf16.msra.mxu1 %v3286_v16  ;;  %2777 = vmatprep.subr.bf16.mxu0 %v2776_v17  ;;  %v3306_v16 = vpack.c.bf16 %v904_v8, %v900_v51  ;;  %v2796_v17 = vpack.c.bf16 %v911_v9, %v907_v45  ;;  %v942_v6 = vld [vmem:[%s6637_s1 + $0x1ce0] sm:$0xff]  ;;  %v940_v51 = vld [vmem:[%s6637_s1 + $0x1cd0] sm:$0xff]  ;;  %v947_v45 = vld [vmem:[%s6637_s1 + $0x1d08] sm:$0xff] }
 0x1ac   :  { %3289 = vmatprep.subr.bf16.mxu1 %v3288_v50  ;;  %v3308_v50 = vpack.c.bf16 %v913_v14, %v909_v10  ;;  %v944_v8 = vld [vmem:[%s6637_s1 + $0x1cf0] sm:$0xff]  ;;  %v951_v9 = vld [vmem:[%s6637_s1 + $0x1d28] sm:$0xff]  ;;  %v949_v10 = vld [vmem:[%s6637_s1 + $0x1d18] sm:$0xff] }
 0x1ad   :  { %v953_v14 = vld [vmem:[%s6637_s1 + $0x1d38] sm:$0xff] }
 0x1ae   :  { %2779 = vmatpush1.bf16.msra.mxu0 %v2778_v29  ;;  %v921_v29 = vld [vmem:[%s6637_s1 + $0x1c38] sm:$0xff] }
 0x1af   :  { %3291 = vmatpush1.bf16.msra.mxu1 %v3290_v30  ;;  %2781 = vmatprep.subr.bf16.mxu0 %v2780_v31  ;;  %v2798_v30 = vpack.c.bf16 %v910_v19, %v906_v18  ;;  %v3310_v31 = vpack.c.bf16 %v912_v21, %v908_v20  ;;  %v946_v18 = vld [vmem:[%s6637_s1 + $0x1d00] sm:$0xff]  ;;  %v948_v20 = vld [vmem:[%s6637_s1 + $0x1d10] sm:$0xff] }
 0x1b0   :  { %3293 = vmatprep.subr.bf16.mxu1 %v3292_v35  ;;  %v3312_v35 = vpack.c.bf16 %v921_v29, %v917_v28  ;;  %v950_v19 = vld [vmem:[%s6637_s1 + $0x1d20] sm:$0xff]  ;;  %v952_v21 = vld [vmem:[%s6637_s1 + $0x1d30] sm:$0xff]  ;;  %v961_v28 = vld [vmem:[%s6637_s1 + $0x1d78] sm:$0xff] }
 0x1b1   :  { %v2818_v29 = vpack.c.bf16 %v950_v19, %v946_v18  ;;  %v988_v18 = vld [vmem:[%s6637_s1 + $0x1e50] sm:$0xff] }
 0x1b2   :  { %2783 = vmatpush1.bf16.msra.mxu0 %v2782_v41  ;;  %v929_v41 = vld [vmem:[%s6637_s1 + $0x1c78] sm:$0xff] }
 0x1b3   :  { %3295 = vmatpush1.bf16.msra.mxu1 %v3294_v42  ;;  %2785 = vmatprep.subr.bf16.mxu0 %v2784_v43  ;;  %v2802_v42 = vpack.c.bf16 %v918_v13, %v914_v33  ;;  %v3314_v43 = vpack.c.bf16 %v920_v62, %v916_v34  ;;  %v958_v33 = vld [vmem:[%s6637_s1 + $0x1d60] sm:$0xff]  ;;  %v956_v13 = vld [vmem:[%s6637_s1 + $0x1d50] sm:$0xff]  ;;  %v3332_v34 = vpack.c.bf16 %v961_v28, %v957_v27  ;;  %v963_v62 = vld [vmem:[%s6637_s1 + $0x1d88] sm:$0xff] }
 0x1b4   :  { %3297 = vmatprep.subr.bf16.mxu1 %v3296_v47  ;;  %v3316_v47 = vpack.c.bf16 %v929_v41, %v925_v40  ;;  %v969_v40 = vld [vmem:[%s6637_s1 + $0x1db8] sm:$0xff] }
 0x1b6   :  { %2787 = vmatpush1.bf16.msra.mxu0 %v2786_v53  ;;  %v937_v53 = vld [vmem:[%s6637_s1 + $0x1cb8] sm:$0xff] }
 0x1b7   :  { %3299 = vmatpush1.bf16.msra.mxu1 %v3298_v54  ;;  %2789 = vmatprep.subr.bf16.mxu0 %v2788_v55  ;;  %v2806_v54 = vpack.c.bf16 %v926_v11, %v922_v39  ;;  %v3318_v55 = vpack.c.bf16 %v928_v12, %v924_v46  ;;  %v3320_v59 = vpack.c.bf16 %v937_v53, %v933_v52  ;;  %v966_v39 = vld [vmem:[%s6637_s1 + $0x1da0] sm:$0xff]  ;;  %v964_v11 = vld [vmem:[%s6637_s1 + $0x1d90] sm:$0xff]  ;;  %v971_v12 = vld [vmem:[%s6637_s1 + $0x1dc8] sm:$0xff] }
 0x1b8   :  { %3301 = vmatprep.subr.bf16.mxu1 %v3300_v24  ;;  %v932_v24 = vld [vmem:[%s6637_s1 + $0x1c90] sm:$0xff]  ;;  %v3336_v46 = vpack.c.bf16 %v969_v40, %v965_v37 }
 0x1ba   :  { %2791 = vmatpush1.bf16.msra.mxu0 %v2790_v2  ;;  %v2810_v2 = vpack.c.bf16 %v934_v58, %v930_v57  ;;  %v972_v57 = vld [vmem:[%s6637_s1 + $0x1dd0] sm:$0xff] }
 0x1bb   :  { %3303 = vmatpush1.bf16.msra.mxu1 %v3302_v3  ;;  %2793 = vmatprep.subr.bf16.mxu0 %v2792_v4  ;;  %v2812_v4 = vpack.c.bf16 %v943_v63, %v939_v60  ;;  %v981_v60 = vld [vmem:[%s6637_s1 + $0x1e18] sm:$0xff] }
 0x1bc   :  { %3305 = vmatprep.subr.bf16.mxu1 %v3304_v7  ;;  %v3324_v7 = vpack.c.bf16 %v945_v1, %v941_v0  ;;  %v985_v63 = vld [vmem:[%s6637_s1 + $0x1e38] sm:$0xff] }
 0x1be   :  { %2795 = vmatpush1.bf16.msra.mxu0 %v2794_v15  ;;  %v2814_v15 = vpack.c.bf16 %v942_v6, %v938_v5  ;;  %v980_v5 = vld [vmem:[%s6637_s1 + $0x1e10] sm:$0xff]  ;;  %v3344_v6 = vpack.c.bf16 %v985_v63, %v981_v60 }
 0x1bf   :  { %3307 = vmatpush1.bf16.msra.mxu1 %v3306_v16  ;;  %2797 = vmatprep.subr.bf16.mxu0 %v2796_v17  ;;  %v3326_v16 = vpack.c.bf16 %v944_v8, %v940_v51  ;;  %v2816_v17 = vpack.c.bf16 %v951_v9, %v947_v45  ;;  %v984_v51 = vld [vmem:[%s6637_s1 + $0x1e30] sm:$0xff]  ;;  %v991_v8 = vld [vmem:[%s6637_s1 + $0x1e68] sm:$0xff]  ;;  %v989_v45 = vld [vmem:[%s6637_s1 + $0x1e58] sm:$0xff] }
 0x1c0   :  { %3309 = vmatprep.subr.bf16.mxu1 %v3308_v50  ;;  %v3328_v50 = vpack.c.bf16 %v953_v14, %v949_v10  ;;  %v993_v9 = vld [vmem:[%s6637_s1 + $0x1e78] sm:$0xff]  ;;  %v3346_v14 = vpack.c.bf16 %v984_v51, %v980_v5  ;;  %v1024_v5 = vld [vmem:[%s6637_s1 + $0x1f70] sm:$0xff]  ;;  %v1031_v51 = vld [vmem:[%s6637_s1 + $0x1fa8] sm:$0xff] }
 0x1c1   :  { %v3348_v19 = vpack.c.bf16 %v993_v9, %v989_v45 }
 0x1c2   :  { %2799 = vmatpush1.bf16.msra.mxu0 %v2798_v30  ;;  %v3330_v30 = vpack.c.bf16 %v952_v21, %v948_v20  ;;  %v992_v20 = vld [vmem:[%s6637_s1 + $0x1e70] sm:$0xff]  ;;  %v999_v21 = vld [vmem:[%s6637_s1 + $0x1ea8] sm:$0xff] }
 0x1c3   :  { %3311 = vmatpush1.bf16.msra.mxu1 %v3310_v31  ;;  %2801 = vmatprep.subr.bf16.mxu0 %v2800_v32  ;;  %v2820_v31 = vpack.c.bf16 %v959_v26, %v955_v22  ;;  %v954_v32 = vld [vmem:[%s6637_s1 + $0x1d40] sm:$0xff]  ;;  %v997_v22 = vld [vmem:[%s6637_s1 + $0x1e98] sm:$0xff]  ;;  %v3350_v28 = vpack.c.bf16 %v992_v20, %v988_v18  ;;  %v1032_v18 = vld [vmem:[%s6637_s1 + $0x1fb0] sm:$0xff] }
 0x1c4   :  { %3313 = vmatprep.subr.bf16.mxu1 %v3312_v35  ;;  %v960_v35 = vld [vmem:[%s6637_s1 + $0x1d70] sm:$0xff]  ;;  %v2822_v41 = vpack.c.bf16 %v958_v33, %v954_v32  ;;  %v1001_v26 = vld [vmem:[%s6637_s1 + $0x1eb8] sm:$0xff]  ;;  %v1039_v20 = vld [vmem:[%s6637_s1 + $0x1fe8] sm:$0xff] }
 0x1c5   :  { %1643 = vmatmul.mubr.f32.vlgmr.msra.gmra.mrb[0].mxu0 %v5858_v23  ;;  %v996_v32 = vld [vmem:[%s6637_s1 + $0x1e90] sm:$0xff]  ;;  %v3352_v33 = vpack.c.bf16 %v1001_v26, %v997_v22 }
 0x1c6   :  { %2803 = vmatpush1.bf16.msra.mxu0 %v2802_v42  ;;  %2211 = vmatmul.mubr.f32.vlgmr.msra.gmra.mrb[0].mxu1 %v5858_v23  ;;  %v936_v23 = vld [vmem:[%s6637_s1 + $0x1cb0] sm:$0xff]  ;;  %v3334_v42 = vpack.c.bf16 %v960_v35, %v956_v13  ;;  %v1007_v35 = vld [vmem:[%s6637_s1 + $0x1ee8] sm:$0xff] }
 0x1c7   :  { %3315 = vmatpush1.bf16.msra.mxu1 %v3314_v43  ;;  %2805 = vmatprep.subr.bf16.mxu0 %v2804_v44  ;;  %v3322_v3 = vpack.c.bf16 %v936_v23, %v932_v24  ;;  %v2824_v43 = vpack.c.bf16 %v967_v36, %v963_v62  ;;  %v962_v44 = vld [vmem:[%s6637_s1 + $0x1d80] sm:$0xff]  ;;  %v976_v24 = vld [vmem:[%s6637_s1 + $0x1df0] sm:$0xff]  ;;  %v983_v23 = vld [vmem:[%s6637_s1 + $0x1e28] sm:$0xff] }
 0x1c8   :  { %3317 = vmatprep.subr.bf16.mxu1 %v3316_v47  ;;  %1713 = vmatprep.mubr.f32.mxu0 %v1135_v49  ;;  %v968_v47 = vld [vmem:[%s6637_s1 + $0x1db0] sm:$0xff]  ;;  %v2826_v52 = vpack.c.bf16 %v966_v39, %v962_v44  ;;  %v3342_v1 = vpack.c.bf16 %v976_v24, %v972_v57  ;;  %v1005_v62 = vld [vmem:[%s6637_s1 + $0x1ed8] sm:$0xff]  ;;  %v1023_v24 = vld [vmem:[%s6637_s1 + $0x1f68] sm:$0xff] }
 0x1c9   :  { %2281 = vmatprep.mubr.f32.mxu1 %v1135_v49  ;;  %v977_v49 = vld [vmem:[%s6637_s1 + $0x1df8] sm:$0xff]  ;;  %v3338_v53 = vpack.c.bf16 %v968_v47, %v964_v11  ;;  %v1000_v13 = vld [vmem:[%s6637_s1 + $0x1eb0] sm:$0xff]  ;;  %v1015_v47 = vld [vmem:[%s6637_s1 + $0x1f28] sm:$0xff] }
 0x1ca   :  { %2807 = vmatpush1.bf16.msra.mxu0 %v2806_v54  ;;  %v2828_v54 = vpack.c.bf16 %v975_v25, %v971_v12  ;;  %v3340_v58 = vpack.c.bf16 %v977_v49, %v973_v48  ;;  %v1009_v36 = vld [vmem:[%s6637_s1 + $0x1ef8] sm:$0xff]  ;;  %v3354_v40 = vpack.c.bf16 %v1000_v13, %v996_v32  ;;  %v1004_v44 = vld [vmem:[%s6637_s1 + $0x1ed0] sm:$0xff] }
 0x1cb   :  { %3319 = vmatpush1.bf16.msra.mxu1 %v3318_v55  ;;  %2809 = vmatprep.subr.bf16.mxu0 %v2808_v56  ;;  %v970_v55 = vld [vmem:[%s6637_s1 + $0x1dc0] sm:$0xff]  ;;  %v3356_v39 = vpack.c.bf16 %v1009_v36, %v1005_v62  ;;  %v1008_v11 = vld [vmem:[%s6637_s1 + $0x1ef0] sm:$0xff]  ;;  %v1013_v12 = vld [vmem:[%s6637_s1 + $0x1f18] sm:$0xff]  ;;  %v1058_v36 = vsub.s32 3, %v3700_v61 }
 0x1cc   :  { %3321 = vmatprep.subr.bf16.mxu1 %v3320_v59  ;;  %v974_v56 = vld [vmem:[%s6637_s1 + $0x1de0] sm:$0xff]  ;;  %v979_v59 = vld [vmem:[%s6637_s1 + $0x1e08] sm:$0xff]  ;;  %v1017_v25 = vld [vmem:[%s6637_s1 + $0x1f38] sm:$0xff]  ;;  %v3358_v49 = vpack.c.bf16 %v1008_v11, %v1004_v44 }
 0x1cd   :  { %v2830_v0 = vpack.c.bf16 %v974_v56, %v970_v55  ;;  %v1012_v55 = vld [vmem:[%s6637_s1 + $0x1f10] sm:$0xff]  ;;  %v3360_v56 = vpack.c.bf16 %v1017_v25, %v1013_v12  ;;  %v1042_v62 = vld [vmem:[%s6639_s2] sm:$0xf] }
 0x1ce   :  { %2811 = vmatpush1.bf16.msra.mxu0 %v2810_v2  ;;  %v2832_v2 = vpack.c.bf16 %v983_v23, %v979_v59  ;;  %v1016_v57 = vld [vmem:[%s6637_s1 + $0x1f30] sm:$0xff]  ;;  %v1021_v59 = vld [vmem:[%s6637_s1 + $0x1f58] sm:$0xff] }
 0x1cf   :  { %3323 = vmatpush1.bf16.msra.mxu1 %v3322_v3  ;;  %2813 = vmatprep.subr.bf16.mxu0 %v2812_v4  ;;  %v978_v3 = vld [vmem:[%s6637_s1 + $0x1e00] sm:$0xff]  ;;  %v1025_v23 = vld [vmem:[%s6637_s1 + $0x1f78] sm:$0xff]  ;;  %v3362_v63 = vpack.c.bf16 %v1016_v57, %v1012_v55  ;;  %v1040_v32 = vld [vmem:[%s6637_s1 + $0x1ff0] sm:$0xff] }
 0x1d0   :  { %3325 = vmatprep.subr.bf16.mxu1 %v3324_v7  ;;  %v982_v4 = vld [vmem:[%s6637_s1 + $0x1e20] sm:$0xff]  ;;  %v987_v7 = vld [vmem:[%s6637_s1 + $0x1e48] sm:$0xff] }
 0x1d1   :  { %v2834_v10 = vpack.c.bf16 %v982_v4, %v978_v3  ;;  %v1020_v3 = vld [vmem:[%s6637_s1 + $0x1f50] sm:$0xff]  ;;  %v3364_v4 = vpack.c.bf16 %v1025_v23, %v1021_v59 }
 0x1d2   :  { %2815 = vmatpush1.bf16.msra.mxu0 %v2814_v15  ;;  %v2836_v15 = vpack.c.bf16 %v991_v8, %v987_v7  ;;  %v1029_v7 = vld [vmem:[%s6637_s1 + $0x1f98] sm:$0xff]  ;;  %v3366_v9 = vpack.c.bf16 %v1024_v5, %v1020_v3 }
 0x1d3   :  { %3327 = vmatpush1.bf16.msra.mxu1 %v3326_v16  ;;  %2817 = vmatprep.subr.bf16.mxu0 %v2816_v17  ;;  %v986_v16 = vld [vmem:[%s6637_s1 + $0x1e40] sm:$0xff]  ;;  %v1033_v8 = vld [vmem:[%s6637_s1 + $0x1fb8] sm:$0xff] }
 0x1d4   :  { %3329 = vmatprep.subr.bf16.mxu1 %v3328_v50  ;;  %v990_v17 = vld [vmem:[%s6637_s1 + $0x1e60] sm:$0xff]  ;;  %v995_v50 = vld [vmem:[%s6637_s1 + $0x1e88] sm:$0xff] }
 0x1d5   :  { %v2838_v27 = vpack.c.bf16 %v990_v17, %v986_v16  ;;  %v1028_v16 = vld [vmem:[%s6637_s1 + $0x1f90] sm:$0xff]  ;;  %v3368_v17 = vpack.c.bf16 %v1033_v8, %v1029_v7 }
 0x1d6   :  { %2819 = vmatpush1.bf16.msra.mxu0 %v2818_v29  ;;  %v2840_v29 = vpack.c.bf16 %v999_v21, %v995_v50  ;;  %v1037_v50 = vld [vmem:[%s6637_s1 + $0x1fd8] sm:$0xff]  ;;  %v3370_v26 = vpack.c.bf16 %v1032_v18, %v1028_v16 }
 0x1d7   :  { %3331 = vmatpush1.bf16.msra.mxu1 %v3330_v30  ;;  %2821 = vmatprep.subr.bf16.mxu0 %v2820_v31  ;;  %v994_v30 = vld [vmem:[%s6637_s1 + $0x1e80] sm:$0xff]  ;;  %v1041_v21 = vld [vmem:[%s6637_s1 + $0x1ff8] sm:$0xff] }
 0x1d8   :  { %3333 = vmatprep.subr.bf16.mxu1 %v3332_v34  ;;  %v998_v31 = vld [vmem:[%s6637_s1 + $0x1ea0] sm:$0xff]  ;;  %v1003_v34 = vld [vmem:[%s6637_s1 + $0x1ec8] sm:$0xff] }
 0x1d9   :  { %v2842_v37 = vpack.c.bf16 %v998_v31, %v994_v30  ;;  %v3372_v30 = vpack.c.bf16 %v1041_v21, %v1037_v50  ;;  %v1036_v31 = vld [vmem:[%s6637_s1 + $0x1fd0] sm:$0xff] }
 0x1da   :  { %2823 = vmatpush1.bf16.msra.mxu0 %v2822_v41  ;;  %v2844_v41 = vpack.c.bf16 %v1007_v35, %v1003_v34  ;;  %v3374_v13 = vpack.c.bf16 %v1040_v32, %v1036_v31  ;;  %v1054_v34 = vsub.s32 2, %v3700_v61  ;;  %v1050_v35 = vsub.s32 1, %v3700_v61 }
 0x1db   :  { %3335 = vmatpush1.bf16.msra.mxu1 %v3334_v42  ;;  %2825 = vmatprep.subr.bf16.mxu0 %v2824_v43  ;;  %v1002_v42 = vld [vmem:[%s6637_s1 + $0x1ec0] sm:$0xff] }
 0x1dc   :  { %3337 = vmatprep.subr.bf16.mxu1 %v3336_v46  ;;  %v1006_v43 = vld [vmem:[%s6637_s1 + $0x1ee0] sm:$0xff]  ;;  %v1011_v46 = vld [vmem:[%s6637_s1 + $0x1f08] sm:$0xff] }
 0x1dd   :  { %v2846_v48 = vpack.c.bf16 %v1006_v43, %v1002_v42  ;;  %v1059_v42 = vrot.slane %v1042_v62, %v1058_v36 }
 0x1de   :  { %2827 = vmatpush1.bf16.msra.mxu0 %v2826_v52  ;;  %v2848_v52 = vpack.c.bf16 %v1015_v47, %v1011_v46 }
 0x1df   :  { %3339 = vmatpush1.bf16.msra.mxu1 %v3338_v53  ;;  %2829 = vmatprep.subr.bf16.mxu0 %v2828_v54  ;;  %v1010_v53 = vld [vmem:[%s6637_s1 + $0x1f00] sm:$0xff] }
 0x1e0   :  { %3341 = vmatprep.subr.bf16.mxu1 %v3340_v58  ;;  %v1014_v54 = vld [vmem:[%s6637_s1 + $0x1f20] sm:$0xff]  ;;  %v1019_v58 = vld [vmem:[%s6637_s1 + $0x1f48] sm:$0xff] }
 0x1e1   :  { %v2850_v60 = vpack.c.bf16 %v1014_v54, %v1010_v53 }
 0x1e2   :  { %2831 = vmatpush1.bf16.msra.mxu0 %v2830_v0  ;;  %v2852_v0 = vpack.c.bf16 %v1023_v24, %v1019_v58 }
 0x1e3   :  { %3343 = vmatpush1.bf16.msra.mxu1 %v3342_v1  ;;  %2833 = vmatprep.subr.bf16.mxu0 %v2832_v2  ;;  %v1018_v1 = vld [vmem:[%s6637_s1 + $0x1f40] sm:$0xff] }
 0x1e4   :  { %3345 = vmatprep.subr.bf16.mxu1 %v3344_v6  ;;  %v1022_v2 = vld [vmem:[%s6637_s1 + $0x1f60] sm:$0xff]  ;;  %v1027_v6 = vld [vmem:[%s6637_s1 + $0x1f88] sm:$0xff] }
 0x1e5   :  { %v2854_v45 = vpack.c.bf16 %v1022_v2, %v1018_v1 }
 0x1e6   :  { %2835 = vmatpush1.bf16.msra.mxu0 %v2834_v10  ;;  %v2856_v10 = vpack.c.bf16 %v1031_v51, %v1027_v6 }
 0x1e7   :  { %3347 = vmatpush1.bf16.msra.mxu1 %v3346_v14  ;;  %2837 = vmatprep.subr.bf16.mxu0 %v2836_v15  ;;  %v1026_v14 = vld [vmem:[%s6637_s1 + $0x1f80] sm:$0xff] }
 0x1e8   :  { %3349 = vmatprep.subr.bf16.mxu1 %v3348_v19  ;;  %v1030_v15 = vld [vmem:[%s6637_s1 + $0x1fa0] sm:$0xff]  ;;  %v1035_v19 = vld [vmem:[%s6637_s1 + $0x1fc8] sm:$0xff] }
 0x1e9   :  { %v2858_v22 = vpack.c.bf16 %v1030_v15, %v1026_v14 }
 0x1ea   :  { %2839 = vmatpush1.bf16.msra.mxu0 %v2838_v27  ;;  %v2860_v27 = vpack.c.bf16 %v1039_v20, %v1035_v19 }
 0x1eb   :  { %3351 = vmatpush1.bf16.msra.mxu1 %v3350_v28  ;;  %2841 = vmatprep.subr.bf16.mxu0 %v2840_v29  ;;  %v1034_v28 = vld [vmem:[%s6637_s1 + $0x1fc0] sm:$0xff] }
 0x1ec   :  { %3353 = vmatprep.subr.bf16.mxu1 %v3352_v33  ;;  %v1038_v29 = vld [vmem:[%s6637_s1 + $0x1fe0] sm:$0xff] }
 0x1ed   :  { %v2862_v33 = vpack.c.bf16 %v1038_v29, %v1034_v28 }
 0x1ee   :  { %2843 = vmatpush1.bf16.msra.mxu0 %v2842_v37  ;;  %v1046_v37 = vsub.s32 0, %v3700_v61 }
 0x1ef   :  { %3355 = vmatpush1.bf16.msra.mxu1 %v3354_v40  ;;  %2845 = vmatprep.subr.bf16.mxu0 %v2844_v41  ;;  %v1055_v40 = vrot.slane %v1042_v62, %v1054_v34  ;;  %v1051_v41 = vrot.slane %v1042_v62, %v1050_v35 }
 0x1f0   :  { %3357 = vmatprep.subr.bf16.mxu1 %v3356_v39 }
 0x1f2   :  { %2847 = vmatpush1.bf16.msra.mxu0 %v2846_v48 }
 0x1f3   :  { %3359 = vmatpush1.bf16.msra.mxu1 %v3358_v49  ;;  %2849 = vmatprep.subr.bf16.mxu0 %v2848_v52 }
 0x1f4   :  { %3361 = vmatprep.subr.bf16.mxu1 %v3360_v56 }
 0x1f6   :  { %2851 = vmatpush1.bf16.msra.mxu0 %v2850_v60 }
 0x1f7   :  { %3363 = vmatpush1.bf16.msra.mxu1 %v3362_v63  ;;  %2853 = vmatprep.subr.bf16.mxu0 %v2852_v0 }
 0x1f8   :  { %3365 = vmatprep.subr.bf16.mxu1 %v3364_v4 }
 0x1fa   :  { %2855 = vmatpush1.bf16.msra.mxu0 %v2854_v45 }
 0x1fb   :  { %3367 = vmatpush1.bf16.msra.mxu1 %v3366_v9  ;;  %2857 = vmatprep.subr.bf16.mxu0 %v2856_v10 }
 0x1fc   :  { %3369 = vmatprep.subr.bf16.mxu1 %v3368_v17 }
 0x1fe   :  { %2859 = vmatpush1.bf16.msra.mxu0 %v2858_v22 }
 0x1ff   :  { %3371 = vmatpush1.bf16.msra.mxu1 %v3370_v26  ;;  %2861 = vmatprep.subr.bf16.mxu0 %v2860_v27 }
 0x200   :  { %3373 = vmatprep.subr.bf16.mxu1 %v3372_v30 }
 0x202   :  { %2863 = vmatpush1.bf16.msra.mxu0 %v2862_v33 }
 0x203   :  { %3375 = vmatpush1.bf16.msra.mxu1 %v3374_v13 }
 0x205   :  { %1714 = vmatmul.mubr.f32.vlgmr.msra.gmra.mrb[0].mxu0 %v6251_v38 }
 0x206   :  { %2282 = vmatmul.mubr.f32.vlgmr.msra.gmra.mrb[0].mxu1 %v6251_v38  ;;  %v1047_v38 = vrot.slane %v1042_v62, %v1046_v37 }
 0x2d8   :  { %v1715_v43 = vpop.f32.mrb[0].mxu0 }
 0x2d9   :  { %v2283_v44 = vpop.f32.mrb[0].mxu1  ;;  %v1717_v39 = vpop.f32.mrb[1].mxu0  ;;  %v3376_v61 = vadd.f32 %v1715_v43, %v1047_v38 }
 0x2da   :  { %v3378_v11 = vadd.f32 %v2283_v44, %v1055_v40  ;;  %v3377_v46 = vadd.f32 %v1717_v39, %v1051_v41  ;;  %v2285_v47 = vpop.f32.mrb[1].mxu1 }
 0x2db   :  { %v3379_v12 = vadd.f32 %v2285_v47, %v1059_v42  ;;  %v2289_v53 = vsel %vm2288_vm0, %v3376_v61, -inf }
 0x2dc   :  { %v2302_v25 = vsel %vm2288_vm0, %v3377_v46, -inf  ;;  %v2303_v48 = vsel %vm2288_vm0, %v3378_v11, -inf }
 0x2dd   :  { %v2334_v49 = vsel %vm2288_vm0, %v3379_v12, -inf  ;;  %v2304_v52 = vmax.f32 %v2302_v25, %v2303_v48 }
 0x2de   :  { %2335 = vmax.xlane.f32.xlu1 %v2334_v49 }
 0x2df   :  { %2305 = vmax.xlane.f32.xlu0 %v2304_v52 }
 0x2e3   :  { %2290 = vmax.xlane.f32.xlu0 %v2289_v53 }
 0x36b   :  { %v2336_v54 = vpop.xlane.xlu1 %2335 }
 0x36c   :  { %v2306_v55 = vpop.xlane.xlu0 %2305  ;;  %v2337_v58 = vsub.f32 %v3379_v12, %v2336_v54 }
 0x36d   :  { %v2307_v56 = vsub.f32 %v3377_v46, %v2306_v55  ;;  %v2308_v57 = vsub.f32 %v3378_v11, %v2306_v55 }
 0x36e   :  { %v2338_v63 = vmul.f32 1.442695, %v2337_v58 }
 0x36f   :  { %v2309_v24 = vmul.f32 1.442695, %v2307_v56  ;;  %v2311_v59 = vmul.f32 1.442695, %v2308_v57 }
 0x370   :  { %v2291_v23 = vpop.xlane.xlu0 %2290 }
 0x371   :  { %3413 = vpow2.f32 %v2309_v24  ;;  %v2292_v60 = vsub.f32 %v3376_v61, %v2291_v23 }
 0x372   :  { %3415 = vpow2.f32 %v2311_v59 }
 0x373   :  { %v2293_v0 = vmul.f32 1.442695, %v2292_v60 }
 0x375   :  { %3417 = vpow2.f32 %v2293_v0 }
 0x376   :  { %3419 = vpow2.f32 %v2338_v63 }
 0x37b   :  { %v3414_v1 = vpop.eup %3413 }
 0x37c   :  { %v3416_v2 = vpop.eup %3415  ;;  %v2313_v3 = vsel %vm2288_vm0, %v3414_v1, 0.0 }
 0x37d   :  { %v2314_v4 = vsel %vm2288_vm0, %v3416_v2, 0.0 }
 0x37e   :  { %v2315_v5 = vadd.f32 %v2314_v4, %v2313_v3 }
 0x37f   :  { %v3418_v6 = vpop.eup %3417 }
 0x380   :  { %v3420_v51 = vpop.eup %3419  ;;  %2316 = vadd.xlane.f32.xlu1 %v2315_v5  ;;  %v2295_v7 = vsel %vm2288_vm0, %v3418_v6, 0.0 }
 0x381   :  { %2296 = vadd.xlane.f32.xlu0 %v2295_v7  ;;  %v2340_v8 = vsel %vm2288_vm0, %v3420_v51, 0.0 }
 0x384   :  { %2341 = vadd.xlane.f32.xlu1 %v2340_v8 }
 0x40d   :  { %v2317_v45 = vpop.xlane.xlu1 %2316 }
 0x40e   :  { %3421 = vlog2.f32 %v2317_v45  ;;  %v2297_v9 = vpop.xlane.xlu0 %2296 }
 0x40f   :  { %3423 = vlog2.f32 %v2297_v9 }
 0x411   :  { %v2342_v10 = vpop.xlane.xlu1 %2341 }
 0x412   :  { %3425 = vlog2.f32 %v2342_v10 }
 0x418   :  { %v3422_v14 = vpop.eup %3421 }
 0x419   :  { %v3424_v15 = vpop.eup %3423  ;;  %v2319_v16 = vmul.f32 0.6931472, %v3422_v14 }
 0x41a   :  { %v2299_v17 = vmul.f32 0.6931472, %v3424_v15 }
 0x41b   :  { %v2320_v18 = vsub.f32 %v2307_v56, %v2319_v16  ;;  %v2321_v19 = vsub.f32 %v2308_v57, %v2319_v16 }
 0x41c   :  { %v3426_v20 = vpop.eup %3425  ;;  %v2300_v50 = vsub.f32 %v2292_v60, %v2299_v17 }
 0x41d   :  { %v2324_v21 = vcombine.low %v2320_v18, %v2321_v19  ;;  %v2344_v22 = vmul.f32 0.6931472, %v3426_v20 }
 0x41e   :  { %2301 = vst [vmem:[%s6640_s3] sm:$0x3] %v2300_v50 }
 0x41f   :  { %2351 = vst.sshfl [vmem:[%s6640_s3 + $0x2] sm:$0x33 pattern:$0x76325410] %v2324_v21  ;;  %v2345_v26 = vsub.f32 %v2337_v58, %v2344_v22 }
 0x421   :  { %2346 = vst [vmem:[%s6640_s3 + $0x6] sm:$0x3] %v2345_v26 }

</bundles_post_ra>
